<compile_context>
chip_gen: v6e
topology: v6e:2x2x1
jax: 0.10.0
libtpu: 0.0.40
codegen_flags: <defaults>
</compile_context>

<pallas_src>
import functools
import math

import jax
import jax.numpy as jnp
from jax.experimental import pallas as pl
from jax.experimental.pallas import tpu as pltpu

LOG_2PI = math.log(2.0 * math.pi)


def _round_up(x, m):
    return ((x + m - 1) // m) * m


# ----------------------------------------------------------------------------
# Generation-aware VMEM budgets (v5e/v6e: 128 MiB, 1 TC ; v7x: 64 MiB, 2 TC)
# ----------------------------------------------------------------------------

def _vmem_capacity_bytes():
    try:
        info = pltpu.get_tpu_info()
        cap = getattr(info, "vmem_capacity_bytes", None)
        if cap:
            return int(cap)
    except Exception:
        pass
    return 64 * 1024 * 1024                 # conservative (v7x per-core size)


_VMEM_CAP = _vmem_capacity_bytes()
if _VMEM_CAP >= 96 * 1024 * 1024:           # v5e / v6e class chips
    _MM_TILE_BUDGET = 48 * 1024 * 1024
    _VMEM_LIMIT = 96 * 1024 * 1024
    _MULTI_TC = False
else:                                       # v7x class: less VMEM, 2 TensorCores
    _MM_TILE_BUDGET = 28 * 1024 * 1024
    _VMEM_LIMIT = 48 * 1024 * 1024
    _MULTI_TC = True


def _probe_buffered_one():
    """Check once whether pl.Buffered(1) (single-buffered resident block) works."""
    try:
        def k(x_ref, o_ref):
            o_ref[...] = x_ref[...]
        x = jnp.zeros((8, 128), jnp.float32)
        y = pl.pallas_call(
            k,
            out_shape=jax.ShapeDtypeStruct((8, 128), jnp.float32),
            grid=(1,),
            in_specs=[pl.BlockSpec((8, 128), lambda i: (0, 0),
                                   pipeline_mode=pl.Buffered(1))],
            out_specs=pl.BlockSpec((8, 128), lambda i: (0, 0)),
        )(x)
        jax.block_until_ready(y)
        return True
    except Exception:
        return False


_HAS_BUFFERED1 = _probe_buffered_one()


def _resident_spec(shape, index_map):
    """BlockSpec for blocks with a constant index_map (weights stay resident)."""
    if _HAS_BUFFERED1:
        return pl.BlockSpec(shape, index_map, pipeline_mode=pl.Buffered(1))
    return pl.BlockSpec(shape, index_map)


# ----------------------------------------------------------------------------
# MXU matmul: bf16 inputs / f32 accumulation, optional fused BN statistics
# ----------------------------------------------------------------------------

def _matmul_kernel(a_ref, b_ref, o_ref):
    o_ref[...] = jnp.dot(a_ref[...], b_ref[...],
                         preferred_element_type=jnp.float32).astype(o_ref.dtype)


def _matmul_stats_kernel(a_ref, b_ref, o_ref, s_ref, q_ref):
    acc = jnp.dot(a_ref[...], b_ref[...], preferred_element_type=jnp.float32)
    o_ref[...] = acc.astype(o_ref.dtype)
    # per-M-block partial per-channel sums (padded zero rows contribute 0)
    s_ref[...] = jnp.sum(acc, axis=0, keepdims=True)
    q_ref[...] = jnp.sum(acc * acc, axis=0, keepdims=True)


def _pick_tm(M, K, N):
    """Largest row tile fitting the generation-dependent VMEM budget."""
    mp8 = _round_up(max(M, 1), 8)
    best = 8
    for tm in (2048, 1024, 512, 256, 128, 64, 32, 16, 8):
        if tm > mp8:
            continue
        # A double-buffered bf16, B resident single-buffered bf16, out double f32
        footprint = 2 * 2 * tm * K + 2 * K * N + 2 * 4 * tm * N
        if footprint <= _MM_TILE_BUDGET:
            best = tm
            break
    if _MULTI_TC:
        # only on the 2-TensorCore chip: keep >=2 row blocks so both cores work
        while best >= 16 and (M + best - 1) // best < 2:
            best //= 2
    return best


def pallas_matmul(a, b, *, out_dtype=jnp.float32, with_stats=False):
    """(M, K) @ (K, N).  A is cast to bf16, B must be (or is cast to) bf16."""
    M, K = a.shape
    K2, N = b.shape
    assert K == K2
    tm = _pick_tm(M, K, N)
    Mp = _round_up(M, tm)
    a = a.astype(jnp.bfloat16)
    if Mp != M:
        a = jnp.pad(a, ((0, Mp - M), (0, 0)))
    b = b.astype(jnp.bfloat16)
    nblk = Mp // tm
    a_spec = pl.BlockSpec((tm, K), lambda i: (i, 0))
    b_spec = _resident_spec((K, N), lambda i: (0, 0))
    cparams = pltpu.CompilerParams(dimension_semantics=("parallel",),
                                   vmem_limit_bytes=_VMEM_LIMIT)
    if with_stats:
        out, s, q = pl.pallas_call(
            _matmul_stats_kernel,
            out_shape=(jax.ShapeDtypeStruct((Mp, N), out_dtype),
                       jax.ShapeDtypeStruct((nblk, 1, N), jnp.float32),
                       jax.ShapeDtypeStruct((nblk, 1, N), jnp.float32)),
            grid=(nblk,),
            in_specs=[a_spec, b_spec],
            out_specs=(pl.BlockSpec((tm, N), lambda i: (i, 0)),
                       pl.BlockSpec((None, 1, N), lambda i: (i, 0, 0)),
                       pl.BlockSpec((None, 1, N), lambda i: (i, 0, 0))),
            compiler_params=cparams,
        )(a, b)
        out = out[:M] if Mp != M else out
        return out, s.reshape(nblk, N).sum(axis=0), q.reshape(nblk, N).sum(axis=0)
    out = pl.pallas_call(
        _matmul_kernel,
        out_shape=jax.ShapeDtypeStruct((Mp, N), out_dtype),
        grid=(nblk,),
        in_specs=[a_spec, b_spec],
        out_specs=pl.BlockSpec((tm, N), lambda i: (i, 0)),
        compiler_params=cparams,
    )(a, b)
    return out[:M] if Mp != M else out


# ----------------------------------------------------------------------------
# Fused stride-1 KxK convolution: tap-shifted reads of the flattened padded
# activation + per-tap MXU matmul into a f32 VMEM accumulator.  No im2col
# patch matrix in HBM.  Per-channel BN sum / sumsq are fused as extra outputs.
# ----------------------------------------------------------------------------

def _conv_s1_kernel(x_ref, w_ref, o_ref, s_ref, q_ref, acc_ref, *,
                    ksize, Wp, OH, OW):
    # x_ref: (Hp2*Wp, Cin) bf16  (zero-padded image, row-major flattened)
    # w_ref: (K*K, Cin, Cout) bf16 ; o_ref: (OH*Wp, Cout) bf16
    rows = OH * Wp
    for ki in range(ksize):
        for kj in range(ksize):
            a = x_ref[pl.ds(ki * Wp + kj, rows), :]
            contrib = jnp.dot(a, w_ref[ki * ksize + kj],
                              preferred_element_type=jnp.float32)
            if ki == 0 and kj == 0:
                acc_ref[...] = contrib
            else:
                acc_ref[...] += contrib
    acc = acc_ref[...]
    o_ref[...] = acc.astype(o_ref.dtype)
    # BN statistics over the valid (column < OW) output rows only.
    col = jax.lax.broadcasted_iota(jnp.int32, (rows, 1), 0) % Wp
    accv = jnp.where(col < OW, acc, 0.0)
    s_ref[...] = jnp.sum(accv, axis=0, keepdims=True)
    q_ref[...] = jnp.sum(accv * acc, axis=0, keepdims=True)


def conv2d_s1_fused(x, w3, *, ksize, pad):
    """x: (N,H,W,Cin) ; w3: (K*K, Cin, Cout) bf16.  Stride-1 conv + BN stats."""
    N, H, W, Cin = x.shape
    KK, _, Cout = w3.shape
    OH = H + 2 * pad - ksize + 1
    OW = W + 2 * pad - ksize + 1
    Wp = W + 2 * pad
    Hp2 = H + 2 * pad + ksize            # extra zero rows: slack for shifted reads
    rows = OH * Wp                       # compute the padded-width columns too,
    xb = jnp.pad(x.astype(jnp.bfloat16),  # discard them in the wrapper slice
                 ((0, 0), (pad, pad + ksize), (pad, pad), (0, 0)))
    xf = xb.reshape(N, Hp2 * Wp, Cin)
    kern = functools.partial(_conv_s1_kernel, ksize=ksize, Wp=Wp, OH=OH, OW=OW)
    y, s, q = pl.pallas_call(
        kern,
        out_shape=(jax.ShapeDtypeStruct((N, rows, Cout), jnp.bfloat16),
                   jax.ShapeDtypeStruct((N, 1, Cout), jnp.float32),
                   jax.ShapeDtypeStruct((N, 1, Cout), jnp.float32)),
        grid=(N,),
        in_specs=[pl.BlockSpec((None, Hp2 * Wp, Cin), lambda n: (n, 0, 0)),
                  _resident_spec((KK, Cin, Cout), lambda n: (0, 0, 0))],
        out_specs=(pl.BlockSpec((None, rows, Cout), lambda n: (n, 0, 0)),
                   pl.BlockSpec((None, 1, Cout), lambda n: (n, 0, 0)),
                   pl.BlockSpec((None, 1, Cout), lambda n: (n, 0, 0))),
        scratch_shapes=[pltpu.VMEM((rows, Cout), jnp.float32)],
        compiler_params=pltpu.CompilerParams(
            dimension_semantics=("parallel",),
            vmem_limit_bytes=_VMEM_LIMIT),
    )(xf, w3)
    y = y.reshape(N, OH, Wp, Cout)[:, :, :OW, :]
    return y, s.reshape(N, Cout).sum(axis=0), q.reshape(N, Cout).sum(axis=0)


def conv2d_im2col(x, w3, *, ksize, stride, pad):
    """Strided convs (7x7 s2 stem, 3x3 s2, 1x1 s2 downsample): im2col + matmul."""
    # TODO(synk): fuse the strided window extraction into the matmul kernel
    # (parity-split the stride-2 input) like the stride-1 path, instead of
    # materializing the K*K-expanded patch matrix.
    N, H, W, Cin = x.shape
    KK, _, Cout = w3.shape
    OH = (H + 2 * pad - ksize) // stride + 1
    OW = (W + 2 * pad - ksize) // stride + 1
    xb = x.astype(jnp.bfloat16)
    if pad:
        xb = jnp.pad(xb, ((0, 0), (pad, pad), (pad, pad), (0, 0)))
    cols = [xb[:, i:i + stride * (OH - 1) + 1:stride,
               j:j + stride * (OW - 1) + 1:stride, :]
            for i in range(ksize) for j in range(ksize)]
    patches = jnp.concatenate(cols, axis=-1).reshape(N * OH * OW, KK * Cin)
    w2 = w3.reshape(KK * Cin, Cout)
    K = KK * Cin
    Kp = _round_up(K, 128)               # align contraction depth (stem 147->256)
    if Kp != K:
        patches = jnp.pad(patches, ((0, 0), (0, Kp - K)))
        w2 = jnp.pad(w2, ((0, Kp - K), (0, 0)))
    y, s, q = pallas_matmul(patches, w2, out_dtype=jnp.bfloat16, with_stats=True)
    return y.reshape(N, OH, OW, Cout), s, q


# ----------------------------------------------------------------------------
# Row-tiled elementwise kernels (lane-dense where possible, bf16 stores)
# ----------------------------------------------------------------------------

def _lane_fold(x2d):
    """Fold rows into lanes so the last dim is >=128 (lane-dense stores)."""
    R, C = x2d.shape
    if C < 128 and 128 % C == 0:
        f = 128 // C
        if R % f == 0:
            return x2d.reshape(R // f, C * f), f
    return x2d, 1


def _row_tiles(R, cap=1024):
    tr = min(cap, _round_up(R, 8))
    return tr, _round_up(R, tr)


def _affine_kernel(x_ref, s_ref, b_ref, o_ref, *, relu):
    y = x_ref[...].astype(jnp.float32) * s_ref[...] + b_ref[...]
    if relu:
        y = jnp.maximum(y, 0.0)
    o_ref[...] = y.astype(o_ref.dtype)


def affine_act(x2d, scale, bias, relu):
    """y = x*scale + bias (+ReLU), stored as bf16 (every consumer reads bf16)."""
    R, C = x2d.shape
    tr, Rp = _row_tiles(R)
    xp = jnp.pad(x2d, ((0, Rp - R), (0, 0))) if Rp != R else x2d
    out = pl.pallas_call(
        functools.partial(_affine_kernel, relu=relu),
        out_shape=jax.ShapeDtypeStruct((Rp, C), jnp.bfloat16),
        grid=(Rp // tr,),
        in_specs=[pl.BlockSpec((tr, C), lambda i: (i, 0)),
                  pl.BlockSpec((1, C), lambda i: (0, 0)),
                  pl.BlockSpec((1, C), lambda i: (0, 0))],
        out_specs=pl.BlockSpec((tr, C), lambda i: (i, 0)),
        compiler_params=pltpu.CompilerParams(
            dimension_semantics=("parallel",)),
    )(xp, scale.reshape(1, C).astype(jnp.float32),
      bias.reshape(1, C).astype(jnp.float32))
    return out[:R] if Rp != R else out


def conv_bn_act(x, w3, gamma, beta, *, ksize, stride, pad, relu, eps=1e-5):
    """conv -> training-mode BatchNorm (stats fused in conv) -> optional ReLU."""
    if stride == 1:
        y, s, q = conv2d_s1_fused(x, w3, ksize=ksize, pad=pad)
    else:
        y, s, q = conv2d_im2col(x, w3, ksize=ksize, stride=stride, pad=pad)
    N, OH, OW, C = y.shape
    count = N * OH * OW
    mean = s / count
    var = jnp.maximum(q / count - mean * mean, 0.0)   # biased var, as torch BN
    scale = gamma * jax.lax.rsqrt(var + eps)
    bias = beta - mean * scale
    y2 = y.reshape(count, C)
    y2f, f = _lane_fold(y2)
    if f > 1:
        scale, bias = jnp.tile(scale, f), jnp.tile(bias, f)
    o = affine_act(y2f, scale, bias, relu)
    return o.reshape(N, OH, OW, C)


def _max_taps_kernel(x_ref, o_ref):
    o_ref[...] = jnp.max(x_ref[...], axis=0)


def maxpool3x3s2p1(x):
    # TODO(synk): fuse the 9-tap window extraction into the kernel (same
    # shifted-read trick as the fused conv) to avoid the stacked intermediate.
    N, H, W, C = x.shape
    OH = (H + 2 - 3) // 2 + 1
    OW = (W + 2 - 3) // 2 + 1
    xp = jnp.pad(x, ((0, 0), (1, 1), (1, 1), (0, 0)), constant_values=-jnp.inf)
    taps = [xp[:, i:i + 2 * (OH - 1) + 1:2, j:j + 2 * (OW - 1) + 1:2, :]
            for i in range(3) for j in range(3)]
    R = N * OH * OW
    stacked = jnp.stack(taps, axis=0).reshape(9, R, C)
    Rf, Cf = R, C
    if C < 128 and 128 % C == 0 and R % (128 // C) == 0:
        f = 128 // C
        Rf, Cf = R // f, C * f
        stacked = stacked.reshape(9, Rf, Cf)
    tr, Rp = _row_tiles(Rf)
    if Rp != Rf:
        stacked = jnp.pad(stacked, ((0, 0), (0, Rp - Rf), (0, 0)),
                          constant_values=-jnp.inf)
    out = pl.pallas_call(
        _max_taps_kernel,
        out_shape=jax.ShapeDtypeStruct((Rp, Cf), x.dtype),
        grid=(Rp // tr,),
        in_specs=[pl.BlockSpec((9, tr, Cf), lambda i: (0, i, 0))],
        out_specs=pl.BlockSpec((tr, Cf), lambda i: (i, 0)),
        compiler_params=pltpu.CompilerParams(
            dimension_semantics=("parallel",)),
    )(stacked)
    return out[:Rf].reshape(N, OH, OW, C)


# ----------------------------------------------------------------------------
# DisLayer kernels
# ----------------------------------------------------------------------------

def _dis_inc_kernel(par_ref, coords_ref, emb_ref, o_ref):
    # par_ref (SMEM): per-batch [mu_row, mu_col, sigma_row, sigma_col]
    n = pl.program_id(0)
    mu_r, mu_c = par_ref[n, 0], par_ref[n, 1]
    s_r, s_c = par_ref[n, 2], par_ref[n, 3]
    d0 = (coords_ref[0:1, :] - mu_r) / s_r
    d1 = (coords_ref[1:2, :] - mu_c) / s_c
    logp = (-0.5 * (d0 * d0 + d1 * d1)
            - jnp.log(s_r) - jnp.log(s_c) - LOG_2PI)
    pdf = jnp.exp(logp)
    pdf = jnp.where(pdf != pdf, jnp.zeros_like(pdf), pdf)   # pdf[pdf!=pdf] = 0
    o_ref[...] = emb_ref[...] * pdf


def dis_increment_map(x, p):
    """Per-pixel DisLayer increment (broadcast over channels later): (R, 1)."""
    N, H, W, C = x.shape
    R = N * H * W
    HW = H * W
    # 1x1 embedding conv to one channel: tiny mat-vec, plain JAX (a Pallas
    # (R,1) store would waste 127/128 lanes).
    emb = x.reshape(R, C).astype(jnp.float32) @ p['emb_w'] + p['emb_b'][0]
    emb = emb.reshape(N, H, W)
    row_idx = jnp.argmax(jnp.max(emb, axis=2), axis=1)
    col_idx = jnp.argmax(jnp.max(emb, axis=1), axis=1)
    aa = jnp.std(jnp.mean(emb, axis=2), axis=1, ddof=1)
    bb = jnp.std(jnp.mean(emb, axis=1), axis=1, ddof=1)
    ps = p['position_scal'][0]
    params = jnp.stack([row_idx.astype(jnp.float32) * ps,
                        col_idx.astype(jnp.float32) * ps,
                        aa * p['normal_scal'][0],
                        bb * p['normal_scal'][1]], axis=1)          # (N, 4)
    ii = (jax.lax.broadcasted_iota(jnp.float32, (H, W), 0) * ps).reshape(1, HW)
    jj = (jax.lax.broadcasted_iota(jnp.float32, (H, W), 1) * ps).reshape(1, HW)
    coords = jnp.concatenate([ii, jj], axis=0)                      # (2, HW)
    inc = pl.pallas_call(
        _dis_inc_kernel,
        out_shape=jax.ShapeDtypeStruct((N, 1, HW), jnp.float32),
        grid=(N,),
        in_specs=[pl.BlockSpec(memory_space=pltpu.MemorySpace.SMEM),
                  pl.BlockSpec((2, HW), lambda n: (0, 0)),
                  pl.BlockSpec((None, 1, HW), lambda n: (n, 0, 0))],
        out_specs=pl.BlockSpec((None, 1, HW), lambda n: (n, 0, 0)),
        compiler_params=pltpu.CompilerParams(
            dimension_semantics=("parallel",)),
    )(params, coords, emb.reshape(N, 1, HW))
    return inc.reshape(R, 1)


def _residual_kernel(x_ref, idn_ref, inc_ref, o_ref):
    # relu(dis(x) + identity) = relu(x + inc + identity), fused in one pass
    y = (x_ref[...].astype(jnp.float32) + idn_ref[...].astype(jnp.float32)
         + inc_ref[...])
    o_ref[...] = jnp.maximum(y, 0.0).astype(o_ref.dtype)


def fused_dis_residual_relu(out, identity, inc):
    N, H, W, C = out.shape
    R = N * H * W
    x2 = out.reshape(R, C)
    i2 = identity.astype(jnp.bfloat16).reshape(R, C)
    tr, Rp = _row_tiles(R)
    if Rp != R:
        x2 = jnp.pad(x2, ((0, Rp - R), (0, 0)))
        i2 = jnp.pad(i2, ((0, Rp - R), (0, 0)))
        inc = jnp.pad(inc, ((0, Rp - R), (0, 0)))
    y = pl.pallas_call(
        _residual_kernel,
        out_shape=jax.ShapeDtypeStruct((Rp, C), jnp.bfloat16),
        grid=(Rp // tr,),
        in_specs=[pl.BlockSpec((tr, C), lambda i: (i, 0)),
                  pl.BlockSpec((tr, C), lambda i: (i, 0)),
                  pl.BlockSpec((tr, 1), lambda i: (i, 0))],
        out_specs=pl.BlockSpec((tr, C), lambda i: (i, 0)),
        compiler_params=pltpu.CompilerParams(
            dimension_semantics=("parallel",)),
    )(x2, i2, inc)
    return y[:R].reshape(N, H, W, C)


# ----------------------------------------------------------------------------
# Model
# ----------------------------------------------------------------------------

def basic_block(x, p):
    stride = p['stride']
    out = conv_bn_act(x, p['conv1_w'], p['bn1_g'], p['bn1_b'],
                      ksize=3, stride=stride, pad=1, relu=True)
    out = conv_bn_act(out, p['conv2_w'], p['bn2_g'], p['bn2_b'],
                      ksize=3, stride=1, pad=1, relu=False)
    inc = dis_increment_map(out, p['dis'])
    if 'down_w' in p:
        identity = conv_bn_act(x, p['down_w'], p['down_g'], p['down_b'],
                               ksize=1, stride=stride, pad=0, relu=False)
    else:
        identity = x
    return fused_dis_residual_relu(out, identity, inc)


def resnet_forward(x_nchw, params):
    x = jnp.transpose(x_nchw, (0, 2, 3, 1))              # NCHW -> NHWC
    x = conv_bn_act(x, params['conv1_w'], params['bn1_g'], params['bn1_b'],
                    ksize=7, stride=2, pad=3, relu=True)
    x = maxpool3x3s2p1(x)
    for stage in params['stages']:
        for blk in stage:
            x = basic_block(x, blk)
    x = jnp.mean(x.astype(jnp.float32), axis=(1, 2))     # AdaptiveAvgPool2d((1,1))
    logits = pallas_matmul(x, params['fc_w']) + params['fc_b']
    return logits[:, :params['num_classes']]


# ----------------------------------------------------------------------------
# Deterministic parameter init (shapes follow the torch __init__; weights are
# stored in matmul layout (K*K, Cin, Cout) and pre-cast to bf16 once; FC padded
# to 128 output lanes)
# ----------------------------------------------------------------------------

def init_params(key, layers=(1, 1, 1, 1), num_classes=10):
    keys = iter(jax.random.split(key, 512))

    def conv_w(cin, cout, k):
        fan_out = cout * k * k
        std = math.sqrt(2.0 / fan_out)               # kaiming_normal fan_out/relu
        w = jax.random.normal(next(keys), (k, k, cin, cout), jnp.float32) * std
        return w.reshape(k * k, cin, cout).astype(jnp.bfloat16)

    params = {'conv1_w': conv_w(3, 64, 7),
              'bn1_g': jnp.ones((64,), jnp.float32),
              'bn1_b': jnp.zeros((64,), jnp.float32),
              'num_classes': num_classes}
    inplanes = 64
    stages = []
    for planes, nblocks, stride0 in zip((64, 128, 256, 512), layers, (1, 2, 2, 2)):
        stage = []
        for bi in range(nblocks):
            s = stride0 if bi == 0 else 1
            blk = {'stride': s,
                   'conv1_w': conv_w(inplanes, planes, 3),
                   'bn1_g': jnp.ones((planes,), jnp.float32),
                   'bn1_b': jnp.zeros((planes,), jnp.float32),
                   'conv2_w': conv_w(planes, planes, 3),
                   'bn2_g': jnp.ones((planes,), jnp.float32),
                   'bn2_b': jnp.zeros((planes,), jnp.float32),
                   'dis': {
                       'emb_w': (jax.random.normal(next(keys), (planes,),
                                                   jnp.float32) * math.sqrt(2.0)),
                       'emb_b': (jax.random.uniform(next(keys), (1,),
                                                    minval=-1.0, maxval=1.0)
                                 / math.sqrt(planes)).astype(jnp.float32),
                       'normal_scal': jax.random.uniform(next(keys), (2,),
                                                         dtype=jnp.float32),
                       'position_scal': jnp.ones((1,), jnp.float32),
                   }}
            if s != 1 or inplanes != planes:
                blk['down_w'] = conv_w(inplanes, planes, 1)
                blk['down_g'] = jnp.ones((planes,), jnp.float32)
                blk['down_b'] = jnp.zeros((planes,), jnp.float32)
            stage.append(blk)
            inplanes = planes
        stages.append(stage)
    params['stages'] = stages
    ncp = _round_up(num_classes, 128)                 # lane-dense FC output
    fcw = (jax.random.normal(next(keys), (512, num_classes), jnp.float32)
           / math.sqrt(512.0))
    params['fc_w'] = jnp.pad(fcw, ((0, 0), (0, ncp - num_classes))).astype(
        jnp.bfloat16)
    params['fc_b'] = jnp.zeros((ncp,), jnp.float32)
    return params


if __name__ == "__main__":
    key = jax.random.PRNGKey(0)
    pkey, xkey = jax.random.split(key)
    params = init_params(pkey, layers=(1, 1, 1, 1), num_classes=10)
    x = jax.random.normal(xkey, (2, 3, 64, 64), jnp.float32)   # NCHW like PyTorch
    out = resnet_forward(x, params)
    jax.block_until_ready(out)
    assert out.shape == (2, 10)
    print("KERNEL_OK")
</pallas_src>

<mosaic_0001>
module attributes {stable_mosaic.version = 11 : i64} {
  func.func @k(%arg0: i32, %arg1: memref<8x128xf32, #tpu.memory_space<vmem>>, %arg2: memref<8x128xf32, #tpu.memory_space<vmem>>) attributes {dimension_semantics = [#tpu.dimension_semantics<arbitrary>], iteration_bounds = array<i64: 1>, scalar_prefetch = 0 : i64, scratch_operands = 0 : i64, tpu.core_type = #tpu.core_type<tc>, window_params = [{pipeline_mode = #tpu.pipeline_mode<synchronous>, transform_indices = @transform_0, window_bounds = array<i64: 8, 128>}, {pipeline_mode = #tpu.pipeline_mode<synchronous>, transform_indices = @transform_1, window_bounds = array<i64: 8, 128>}]} {
    %c0 = arith.constant 0 : index
    %c0_0 = arith.constant 0 : index
    %0 = vector.load %arg1[%c0, %c0_0] : memref<8x128xf32, #tpu.memory_space<vmem>>, vector<8x128xf32>
    %c0_1 = arith.constant 0 : index
    %c0_2 = arith.constant 0 : index
    %1 = vector.load %arg2[%c0_1, %c0_2] : memref<8x128xf32, #tpu.memory_space<vmem>>, vector<8x128xf32>
    tpu.vector_store %arg2[%c0_1, %c0_2], %0 {strides = array<i32>} : memref<8x128xf32, #tpu.memory_space<vmem>>, vector<8x128xf32>,
    return
  }
  func.func @transform_0(%arg0: i32) -> (i32, i32) {
    %c0_i32 = arith.constant 0 : i32
    %c0_i32_0 = arith.constant 0 : i32
    %c0_i32_1 = arith.constant 0 : i32
    return %c0_i32, %c0_i32_0 : i32, i32
  }
  func.func @transform_1(%arg0: i32) -> (i32, i32) {
    %c0_i32 = arith.constant 0 : i32
    %c0_i32_0 = arith.constant 0 : i32
    %c0_i32_1 = arith.constant 0 : i32
    return %c0_i32, %c0_i32_0 : i32, i32
  }
}

module attributes {stable_mosaic.version = 11 : i64} {
  func.func @_matmul_stats_kernel(%arg0: i32, %arg1: memref<1024x256xbf16, #tpu.memory_space<vmem>>, %arg2: memref<256x64xbf16, #tpu.memory_space<vmem>>, %arg3: memref<1024x64xbf16, #tpu.memory_space<vmem>>, %arg4: memref<1x1x64xf32, #tpu.memory_space<vmem>>, %arg5: memref<1x1x64xf32, #tpu.memory_space<vmem>>) attributes {dimension_semantics = [#tpu.dimension_semantics<parallel>], iteration_bounds = array<i64: 2>, scalar_prefetch = 0 : i64, scratch_operands = 0 : i64, tpu.core_type = #tpu.core_type<tc>, window_params = [{transform_indices = @transform_0, window_bounds = array<i64: 1024, 256>}, {pipeline_mode = #tpu.pipeline_mode<synchronous>, transform_indices = @transform_1, window_bounds = array<i64: 256, 64>}, {transform_indices = @transform_2, window_bounds = array<i64: 1024, 64>}, {transform_indices = @transform_3, window_bounds = array<i64: 1, 1, 64>}, {transform_indices = @transform_4, window_bounds = array<i64: 1, 1, 64>}]} {
    %c0 = arith.constant 0 : index
    %c0_0 = arith.constant 0 : index
    %0 = vector.load %arg1[%c0, %c0_0] : memref<1024x256xbf16, #tpu.memory_space<vmem>>, vector<1024x256xbf16>
    %c0_1 = arith.constant 0 : index
    %c0_2 = arith.constant 0 : index
    %1 = vector.load %arg2[%c0_1, %c0_2] : memref<256x64xbf16, #tpu.memory_space<vmem>>, vector<256x64xbf16>
    %cst = arith.constant dense<0.000000e+00> : vector<1024x64xf32>
    %2 = tpu.matmul %0, %1, %cst {dimension_numbers = #tpu.dot_dimension_numbers<[1], [0], [0], [1], [0, 0, 1, 1], [], []>} : vector<1024x256xbf16>, vector<256x64xbf16>, vector<1024x64xf32> -> vector<1024x64xf32>
    %3 = arith.truncf %2 : vector<1024x64xf32> to vector<1024x64xbf16>
    %c0_3 = arith.constant 0 : index
    %c0_4 = arith.constant 0 : index
    %4 = vector.load %arg3[%c0_3, %c0_4] : memref<1024x64xbf16, #tpu.memory_space<vmem>>, vector<1024x64xbf16>
    tpu.vector_store %arg3[%c0_3, %c0_4], %3 {strides = array<i32>} : memref<1024x64xbf16, #tpu.memory_space<vmem>>, vector<1024x64xbf16>,
    %cst_5 = arith.constant dense<0.000000e+00> : vector<64xf32>
    %5 = vector.multi_reduction <add>, %2, %cst_5 [0] : vector<1024x64xf32> to vector<64xf32>
    %6 = vector.shape_cast %5 : vector<64xf32> to vector<1x64xf32>
    %c0_6 = arith.constant 0 : index
    %c0_7 = arith.constant 0 : index
    %c0_8 = arith.constant 0 : index
    %7 = vector.load %arg4[%c0_6, %c0_7, %c0_8] : memref<1x1x64xf32, #tpu.memory_space<vmem>>, vector<1x1x64xf32>
    %8 = vector.shape_cast %7 : vector<1x1x64xf32> to vector<1x64xf32>
    %9 = vector.shape_cast %6 : vector<1x64xf32> to vector<1x1x64xf32>
    tpu.vector_store %arg4[%c0_6, %c0_7, %c0_8], %9 {strides = array<i32>} : memref<1x1x64xf32, #tpu.memory_space<vmem>>, vector<1x1x64xf32>,
    %10 = arith.mulf %2, %2 : vector<1024x64xf32>
    %cst_9 = arith.constant dense<0.000000e+00> : vector<64xf32>
    %11 = vector.multi_reduction <add>, %10, %cst_9 [0] : vector<1024x64xf32> to vector<64xf32>
    %12 = vector.shape_cast %11 : vector<64xf32> to vector<1x64xf32>
    %c0_10 = arith.constant 0 : index
    %c0_11 = arith.constant 0 : index
    %c0_12 = arith.constant 0 : index
    %13 = vector.load %arg5[%c0_10, %c0_11, %c0_12] : memref<1x1x64xf32, #tpu.memory_space<vmem>>, vector<1x1x64xf32>
    %14 = vector.shape_cast %13 : vector<1x1x64xf32> to vector<1x64xf32>
    %15 = vector.shape_cast %12 : vector<1x64xf32> to vector<1x1x64xf32>
    tpu.vector_store %arg5[%c0_10, %c0_11, %c0_12], %15 {strides = array<i32>} : memref<1x1x64xf32, #tpu.memory_space<vmem>>, vector<1x1x64xf32>,
    return
  }
  func.func @transform_0(%arg0: i32) -> (i32, i32) {
    %c0_i32 = arith.constant 0 : i32
    %c0_i32_0 = arith.constant 0 : i32
    return %arg0, %c0_i32 : i32, i32
  }
  func.func @transform_1(%arg0: i32) -> (i32, i32) {
    %c0_i32 = arith.constant 0 : i32
    %c0_i32_0 = arith.constant 0 : i32
    %c0_i32_1 = arith.constant 0 : i32
    return %c0_i32, %c0_i32_0 : i32, i32
  }
  func.func @transform_2(%arg0: i32) -> (i32, i32) {
    %c0_i32 = arith.constant 0 : i32
    %c0_i32_0 = arith.constant 0 : i32
    return %arg0, %c0_i32 : i32, i32
  }
  func.func @transform_3(%arg0: i32) -> (i32, i32, i32) {
    %c0_i32 = arith.constant 0 : i32
    %c0_i32_0 = arith.constant 0 : i32
    %c0_i32_1 = arith.constant 0 : i32
    return %arg0, %c0_i32, %c0_i32_0 : i32, i32, i32
  }
  func.func @transform_4(%arg0: i32) -> (i32, i32, i32) {
    %c0_i32 = arith.constant 0 : i32
    %c0_i32_0 = arith.constant 0 : i32
    %c0_i32_1 = arith.constant 0 : i32
    return %arg0, %c0_i32, %c0_i32_0 : i32, i32, i32
  }
}

</mosaic_0001>

<bundles_post_ra>
// kernel: tpu_custom_call.1
= control target key start
LH: loop header
LB: loop body
LE: loop exit
PB: predicated region body
PF: predicated region fallthrough
CT: control target
= control target key end

     0   :  { %6 = vsyncpa [#allocation3], 0  ;;  %s102_s0 = inlined_call_operand.hbm [shape: f32[8,128], index: 0, kind: input, shape index: {}]   ;;  %s103_s1 = inlined_call_operand.hbm [shape: f32[8,128], index: 1, kind: output, shape index: {}]  }
   0x1   :  { %7 = vsyncpa [#allocation4], 0  ;;  %s84_s6 = smov [#allocation2]  }
   0x2   :  { %s14_s7 = sshll.u32 %s84_s6, 4  ;;  %s15_s7 = int_to_ptr.vmem [resolvable:$true] %s14_s7 }
   0x3   :  { %s48_s8 = scalar_lea.vmem %s15_s7, 128  ;;  %p53_p1 = scmp.lt.s32.totalorder %s15_s7, %s15_s7 }
   0x4   :  { %p49_p0 = scmp.ne.s32.totalorder %s15_s7, %s48_s8  ;;  %p54_p2 = scmp.lt.s32.totalorder %s48_s8, %s48_s8 }
   0x6   :  { %p55_p3 = por %p54_p2, %p53_p1 }
   0x8   :  { %p56_p4 = pnand %p55_p3, %p49_p0 }
   0xa   :  { %59 = shalt.err (!%p56_p4)
}
   0xb   :  { %17 = dma.hbm_to_vmem [thread:$0]  %s102_s0, 128, %s15_s7, [#allocation3]  }
   0xc   :  { %80 = dma.done.wait [#allocation3], 128  }
   0xd   :  { %81 = vsyncadd [#allocation3], 4294967168  ;;  %s85_s11 = smov [#allocation5]   ;;  %v21_v0 = vld [vmem:[#allocation2] sm:$0xff] }
   0xe   :  { %s29_s12 = sshll.u32 %s85_s11, 4  ;;  %22 = vst [vmem:[#allocation5] sm:$0xff] %v21_v0  ;;  %s30_s12 = int_to_ptr.vmem [resolvable:$true] %s29_s12 }
   0xf   :  { %s60_s13 = scalar_lea.vmem %s30_s12, 128  ;;  %p65_p6 = scmp.lt.s32.totalorder %s30_s12, %s30_s12 }
  0x10   :  { %p61_p5 = scmp.ne.s32.totalorder %s30_s12, %s60_s13  ;;  %p66_p7 = scmp.lt.s32.totalorder %s60_s13, %s60_s13 }
  0x12   :  { %p67_p8 = por %p66_p7, %p65_p6 }
  0x14   :  { %p68_p9 = pnand %p67_p8, %p61_p5 }
  0x16   :  { %71 = shalt.err (!%p68_p9)
}
  0x17   :  { %32 = dma.vmem_to_hbm [thread:$0]  %s30_s12, 128, %s103_s1, [#allocation4]  }
  0x18   :  { %82 = dma.done.wait [#allocation4], 128  }
  0x19   :  { %83 = vsyncadd [#allocation4], 4294967168 }
  0x1a   :  { %36 = vsyncpa [#allocation3], 1 }
  0x1b   :  { %37 = vsyncpa [#allocation4], 1 }

// kernel: tpu_custom_call.1
= control target key start
LH: loop header
LB: loop body
LE: loop exit
PB: predicated region body
PF: predicated region fallthrough
CT: control target
= control target key end

     0   :  { %10 = vsyncpa [#allocation3], 0  ;;  %s5539_s0 = inlined_call_operand.hbm [shape: bf16[2048,256], index: 0, kind: input, shape index: {}]   ;;  %s5540_s1 = inlined_call_operand.vmem [shape: bf16[256,64], index: 1, kind: input, shape index: {}]   ;;  %s5541_s2 = inlined_call_operand.vmem [shape: bf16[2048,64], index: 2, kind: output, shape index: {0}]   ;;  %s5542_s3 = inlined_call_operand.hbm [shape: f32[2,1,64], index: 3, kind: output, shape index: {1}]   ;;  %s5543_s4 = inlined_call_operand.hbm [shape: f32[2,1,64], index: 4, kind: output, shape index: {2}]  }
   0x1   :  { %12 = vsyncpa [#allocation3 + $0x1], 0 }
   0x2   :  { %13 = vsyncpa [#allocation4], 0 }
   0x3   :  { %15 = vsyncpa [#allocation4 + $0x1], 0 }
   0x4   :  { %16 = vsyncpa [#allocation7], 0 }
   0x5   :  { %18 = vsyncpa [#allocation7 + $0x1], 0  ;;  %s3993_s15 = smov 0   ;;  %s3995_s16 = smov 0  }
   0x6   :  { %s3997_s17 = smov 0   ;;  %s3999_s18 = smov 0  }
   0x7 LB: > { %s4014_s19 = sadd.s32 4294967295, %s3960_s18   ;;  %s3135_s20 = sadd.s32 4294967294, %s3960_s18   ;;  %s3960_s18 = sphi %s3999_s18, %s5642_s18   ;;  %s3956_s17 = sphi %s3997_s17, %s5641_s17   ;;  %s3952_s16 = sphi %s3995_s16, %s5640_s16   ;;  %s3948_s15 = sphi %s3993_s15, %s5639_s15  }
   0x8   : > { %s4018_s21 = sadd.s32 1, %s3960_s18   ;;  %s31_s22 = sadd.s32 1, %s3956_s17 }
   0x9   : > { %s28_s23 = ssub.s32 %s3960_s18, %s4018_s21  ;;  %p38_p0 = scmp.ne.s32.totalorder %s3956_s17, %s3952_s16 }
   0xa   : > { %p29_p1 = scmp.eq.s32.totalorder %s28_s23, 0  ;;  %p39_p2 = scmp.eq.s32.totalorder %s3960_s18, 0 }
   0xb   : > { %p44_p3 = scmp.ne.s32.totalorder %s3952_s16, %s3948_s15  ;;  %p45_p4 = scmp.eq.s32.totalorder %s4014_s19, 0 }
   0xc   : > { %s4030_s24 = scalar_select %p29_p1, %s3956_s17, %s31_s22  }
   0xd   : > { %p4032_p5 = por %p39_p2, %p38_p0  ;;  %p4036_p6 = por %p45_p4, %p44_p3 }
   0xe   : > { %p115_p7 = scmp.eq.s32.totalorder %s4014_s19, 1  ;;  %p121_p8 = scmp.eq.s32.totalorder %s3135_s20, 1 }
   0xf   : > { %s5589_s26 = scalar_select %p4036_p6, 1, 0 }
  0x10   : > { %p3601_p10 = scmp.lt.s32.totalorder %s3960_s18, 2  ;;  %p4043_p11 = por %p115_p7, %p38_p0 }
  0x11   : > { %p4047_p12 = por %p121_p8, %p44_p3  ;;  %s170_s29 = sand.u32 1, %s3956_s17  }
  0x12   : > { %s5590_s27 = scalar_select %p4043_p11, 1, 0 }
  0x13   : > { %s5591_s28 = scalar_select %p4047_p12, 1, 0 }
  0x14   : > { %s3423_s30 = sshll.u32 %s3960_s18, 14  ;;  %s3138_s5 = sshll.u32 %s170_s29, 10 }
  0x15   : > { %s4056_s8 = scalar_lea.hbm %s5539_s0, %s3423_s30  ;;  %s174_s9 = scalar_lea.vmem [#allocation2], %s3138_s5 }
  0x16   : > { %s182_s10 = sshll.u32 %s174_s9, 4  ;;  %p4060_p13 = pnand %p3601_p10, %p4032_p5  ;;  %s4064_s10 = int_to_ptr.vmem [resolvable:$true] %s182_s10 }
  0x17   : > { %s4066_s12 = scalar_lea.sflag [#allocation3], %s170_s29  ;;  %s3838_s13 = scalar_lea.hbm %s4056_s8, 16384 }
  0x18   : > { %p3839_p0 = scmp.ne.s32.totalorder %s4056_s8, %s3838_s13  ;;  %p3840_p1 = pneg %p4060_p13 }
  0x19   : > { %s3843_s22 = scalar_lea.hbm %s5539_s0, 32768  ;;  %p3844_p4 = scmp.lt.s32.totalorder %s4056_s8, %s5539_s0 }
  0x1a   : > { %p3841_p2 = pnand %p3840_p1, %p3839_p0  ;;  %p3845_p5 = scmp.lt.s32.totalorder %s3843_s22, %s3838_s13 }
  0x1c   : > { %p3842_p3 = pneg %p3841_p2  ;;  %p3846_p7 = por %p3845_p5, %p3844_p4 }
  0x1e   : > { %p3847_p8 = pnand %p3846_p7, %p3842_p3 }
  0x20   : > { %3850 = shalt.err (!%p3847_p8)
}
  0x21   : > { %s3851_s29 = scalar_lea.vmem %s4064_s10, 16384  ;;  %s3962_s30 = smov [#allocation2]  }
  0x22   : > { %p3852_p10 = scmp.ne.s32.totalorder %s4064_s10, %s3851_s29  ;;  %s3856_s5 = sshll.u32 %s3962_s30, 4  ;;  %s3857_s5 = int_to_ptr.vmem [resolvable:$false] %s3856_s5 }
  0x23   : > { %s3858_s6 = scalar_lea.vmem %s3857_s5, 32768  ;;  %p3859_p2 = scmp.lt.s32.totalorder %s4064_s10, %s3857_s5 }
  0x24   : > { %p3854_p9 = pnand %p3852_p10, %p3840_p1  ;;  %p3860_p12 = scmp.lt.s32.totalorder %s3858_s6, %s3851_s29 }
  0x26   : > { %p3855_p0 = pneg %p3854_p9  ;;  %p3861_p11 = por %p3860_p12, %p3859_p2 }
  0x28   : > { %p3862_p6 = pnand %p3861_p11, %p3855_p0 }
  0x2a   : > { %3865 = shalt.err (!%p3862_p6)
}
  0x2b   : > { %s3963_s7 = smov 128   ;;  %s3964_s9 = smov 8  }
  0x2c   : > { %3593 = dma.hbm_to_vmem [thread:$0]  (!%p4060_p13), %s4056_s8, 16384, %s4064_s10, %s4066_s12, %s3963_s7, %s3963_s7, %s3964_s9  }
  0x2d   : > { %p3142_p9 = scmp.ge.s32.totalorder %s3960_s18, 1  ;;  %p190_p1 = scmp.lt.s32.totalorder %s3960_s18, 3 }
  0x2f   : > { %p191_p3 = pnand %p3142_p9, %p190_p1 }
  0x31   : > { %194 = sbr.rel (%p191_p3) target bundleno = 746 (0x2ea), region = 28 }
  0x36   : > { %s4090_s13 = sand.u32 1, %s3952_s16   ;;  %p5593_p6 = scmp.ne.s32.totalorder %s5589_s26, 0 }
  0x37   : > { %s3143_s14 = sshll.u32 %s4090_s13, 10  ;;  %s197_s20 = scalar_lea.sflag [#allocation3], %s4090_s13 }
  0x38   : > { %s4094_s22 = scalar_lea.vmem [#allocation2], %s3143_s14 }
  0x39   : > { %3935 = dma.done.wait (%p5593_p6), %s197_s20, 16384  }
  0x3a   : > { %3937 = vsyncadd (%p5593_p6), %s197_s20, 4294950912  ;;  %v3965_v0 = vmov 0   ;;  %v3638_v1 = vld [vmem:[%s5540_s1 + $0x38] sm:$0xff]   ;;  %v3639_v2 = vld [vmem:[%s5540_s1 + $0x30] sm:$0xff]   ;;  %s3144_s11 = sshll.u32 %s4014_s19, 7  ;;  %vm2194_vm0 = vcmask 519168  }
  0x3b   : > { %1137 = vmatprep.subr.bf16.mxu0 %v3965_v0  ;;  %3552 = vmatprep.subr.bf16.mxu1 %v3965_v0  ;;  %v3640_v3 = vld [vmem:[%s5540_s1 + $0x28] sm:$0xff]   ;;  %v3641_v4 = vld [vmem:[%s5540_s1 + $0x20] sm:$0xff]   ;;  %v3642_v5 = vld [vmem:[%s5540_s1 + $0x18] sm:$0xff]   ;;  %p235_p11 = scmp.lt.s32.totalorder %s3144_s11, 255  ;;  %vm2323_vm1 = vcmask 523264   ;;  %s226_s29 = scalar_lea.vmem [#allocation5], %s4090_s13 }
  0x3c   : > { %1138 = vmatpush1.bf16.msra.mxu0 %v3638_v1  ;;  %3568 = vmatpush1.bf16.msra.mxu1 %v3638_v1  ;;  %v3656_v6 = vld [vmem:[%s4094_s22 + $0x4] ss:$8 sps:$4 sm:$0xff]   ;;  %v3643_v7 = vld [vmem:[%s5540_s1 + $0x10] sm:$0xff]   ;;  %v3646_v10 = vld [vmem:[%s5540_s1 + $0x78] sm:$0xff]   ;;  %s3003_s30 = sshll.u32 %s226_s29, 4  ;;  %vm2585_vm2 = vcmask 516096   ;;  %s5466_s30 = int_to_ptr.vmem [resolvable:$true] %s3003_s30 }
  0x3d   : > { %1139 = vmatprep.subr.bf16.mxu0 %v3965_v0  ;;  %3553 = vmatprep.subr.bf16.mxu1 %v3965_v0  ;;  %v3644_v8 = vld [vmem:[%s5540_s1 + $0x8] sm:$0xff]   ;;  %v3645_v9 = vld [vmem:[%s5540_s1] sm:$0xff]   ;;  %v3647_v11 = vld [vmem:[%s5540_s1 + $0x70] sm:$0xff]   ;;  %s5644_s11 = smov (!%p235_p11, %s3144_s11), 255  ;;  %s232_s5 = scalar_lea.vmem [#allocation6], %s4090_s13 }
  0x3e   : > { %1169 = vmatprep.mubr.bf16.mxu0 %v3656_v6  ;;  %v3648_v12 = vld [vmem:[%s5540_s1 + $0x68] sm:$0xff]   ;;  %v3649_v13 = vld [vmem:[%s5540_s1 + $0x60] sm:$0xff]   ;;  %v3650_v14 = vld [vmem:[%s5540_s1 + $0x58] sm:$0xff]   ;;  %s3145_s12 = sshll.u32 %s5644_s11, 2  ;;  %s3016_s6 = sshll.u32 %s232_s5, 4  ;;  %s5474_s6 = int_to_ptr.vmem [resolvable:$true] %s3016_s6 }
  0x3f   : > { %v3651_v15 = vld [vmem:[%s5540_s1 + $0x50] sm:$0xff]   ;;  %v3652_v16 = vld [vmem:[%s5540_s1 + $0x48] sm:$0xff]   ;;  %v3653_v18 = vld [vmem:[%s5540_s1 + $0x40] sm:$0xff]   ;;  %s4288_s25 = scalar_lea.vmem %s5541_s2, %s3145_s12  ;;  %s2983_s10 = scalar_lea.sflag [#allocation4], %s4090_s13 }
  0x40   : > { %1140 = vmatpush1.bf16.msra.mxu0 %v3639_v2  ;;  %3569 = vmatpush1.bf16.msra.mxu1 %v3639_v2  ;;  %v3704_v17 = vld [vmem:[%s4094_s22 + $0x204] ss:$8 sps:$4 sm:$0xff]   ;;  %v3654_v19 = vld [vmem:[%s4094_s22] ss:$8 sps:$4 sm:$0xff]   ;;  %v3657_v21 = vld [vmem:[%s4094_s22 + $0x14] ss:$8 sps:$4 sm:$0xff]  }
  0x41   : > { %1141 = vmatprep.subr.bf16.mxu0 %v3965_v0  ;;  %3554 = vmatprep.subr.bf16.mxu1 %v3965_v0  ;;  %v3702_v20 = vld [vmem:[%s4094_s22 + $0x200] ss:$8 sps:$4 sm:$0xff]   ;;  %v3708_v22 = vld [vmem:[%s4094_s22 + $0x214] ss:$8 sps:$4 sm:$0xff]   ;;  %v3659_v23 = vld [vmem:[%s4094_s22 + $0x10] ss:$8 sps:$4 sm:$0xff]  }
  0x42   : > { %1425 = vmatprep.mubr.bf16.mxu1 %v3704_v17  ;;  %v3710_v24 = vld [vmem:[%s4094_s22 + $0x210] ss:$8 sps:$4 sm:$0xff]   ;;  %v3660_v25 = vld [vmem:[%s4094_s22 + $0x24] ss:$8 sps:$4 sm:$0xff]   ;;  %v3662_v27 = vld [vmem:[%s4094_s22 + $0x20] ss:$8 sps:$4 sm:$0xff]  }
  0x43   : > { %v3714_v26 = vld [vmem:[%s4094_s22 + $0x224] ss:$8 sps:$4 sm:$0xff]   ;;  %v3716_v28 = vld [vmem:[%s4094_s22 + $0x220] ss:$8 sps:$4 sm:$0xff]   ;;  %v3663_v29 = vld [vmem:[%s4094_s22 + $0x34] ss:$8 sps:$4 sm:$0xff]  }
  0x44   : > { %1142 = vmatpush1.bf16.msra.mxu0 %v3640_v3  ;;  %3570 = vmatpush1.bf16.msra.mxu1 %v3640_v3  ;;  %v3720_v30 = vld [vmem:[%s4094_s22 + $0x234] ss:$8 sps:$4 sm:$0xff]   ;;  %v3665_v31 = vld [vmem:[%s4094_s22 + $0x30] ss:$8 sps:$4 sm:$0xff]   ;;  %v3666_v33 = vld [vmem:[%s4094_s22 + $0x44] ss:$8 sps:$4 sm:$0xff]  }
  0x45   : > { %1143 = vmatprep.subr.bf16.mxu0 %v3965_v0  ;;  %3555 = vmatprep.subr.bf16.mxu1 %v3965_v0  ;;  %v3722_v32 = vld [vmem:[%s4094_s22 + $0x230] ss:$8 sps:$4 sm:$0xff]   ;;  %v3726_v34 = vld [vmem:[%s4094_s22 + $0x244] ss:$8 sps:$4 sm:$0xff]   ;;  %v3668_v35 = vld [vmem:[%s4094_s22 + $0x40] ss:$8 sps:$4 sm:$0xff]  }
  0x46   : > { %v3728_v36 = vld [vmem:[%s4094_s22 + $0x240] ss:$8 sps:$4 sm:$0xff]   ;;  %v3669_v37 = vld [vmem:[%s4094_s22 + $0x54] ss:$8 sps:$4 sm:$0xff]   ;;  %v3671_v39 = vld [vmem:[%s4094_s22 + $0x50] ss:$8 sps:$4 sm:$0xff]  }
  0x47   : > { %v3732_v38 = vld [vmem:[%s4094_s22 + $0x254] ss:$8 sps:$4 sm:$0xff]   ;;  %v3734_v40 = vld [vmem:[%s4094_s22 + $0x250] ss:$8 sps:$4 sm:$0xff]   ;;  %v3672_v41 = vld [vmem:[%s4094_s22 + $0x64] ss:$8 sps:$4 sm:$0xff]  }
  0x48   : > { %1144 = vmatpush1.bf16.msra.mxu0 %v3641_v4  ;;  %3571 = vmatpush1.bf16.msra.mxu1 %v3641_v4  ;;  %v3738_v42 = vld [vmem:[%s4094_s22 + $0x264] ss:$8 sps:$4 sm:$0xff]   ;;  %v3674_v43 = vld [vmem:[%s4094_s22 + $0x60] ss:$8 sps:$4 sm:$0xff]   ;;  %v3675_v45 = vld [vmem:[%s4094_s22 + $0x74] ss:$8 sps:$4 sm:$0xff]  }
  0x49   : > { %1145 = vmatprep.subr.bf16.mxu0 %v3965_v0  ;;  %3556 = vmatprep.subr.bf16.mxu1 %v3965_v0  ;;  %v3740_v44 = vld [vmem:[%s4094_s22 + $0x260] ss:$8 sps:$4 sm:$0xff]   ;;  %v3744_v46 = vld [vmem:[%s4094_s22 + $0x274] ss:$8 sps:$4 sm:$0xff]   ;;  %v3677_v47 = vld [vmem:[%s4094_s22 + $0x70] ss:$8 sps:$4 sm:$0xff]  }
  0x4a   : > { %v3746_v48 = vld [vmem:[%s4094_s22 + $0x270] ss:$8 sps:$4 sm:$0xff]   ;;  %v3678_v49 = vld [vmem:[%s4094_s22 + $0x84] ss:$8 sps:$4 sm:$0xff]   ;;  %v3680_v51 = vld [vmem:[%s4094_s22 + $0x80] ss:$8 sps:$4 sm:$0xff]  }
  0x4b   : > { %v3750_v50 = vld [vmem:[%s4094_s22 + $0x284] ss:$8 sps:$4 sm:$0xff]   ;;  %v3752_v52 = vld [vmem:[%s4094_s22 + $0x280] ss:$8 sps:$4 sm:$0xff]   ;;  %v3681_v53 = vld [vmem:[%s4094_s22 + $0x94] ss:$8 sps:$4 sm:$0xff]  }
  0x4c   : > { %1146 = vmatpush1.bf16.msra.mxu0 %v3642_v5  ;;  %3572 = vmatpush1.bf16.msra.mxu1 %v3642_v5  ;;  %v3755_v54 = vld [vmem:[%s4094_s22 + $0x294] ss:$8 sps:$4 sm:$0xff]   ;;  %v3683_v55 = vld [vmem:[%s4094_s22 + $0x90] ss:$8 sps:$4 sm:$0xff]   ;;  %v3684_v57 = vld [vmem:[%s4094_s22 + $0xa4] ss:$8 sps:$4 sm:$0xff]  }
  0x4d   : > { %1147 = vmatprep.subr.bf16.mxu0 %v3965_v0  ;;  %3557 = vmatprep.subr.bf16.mxu1 %v3965_v0  ;;  %v3757_v56 = vld [vmem:[%s4094_s22 + $0x290] ss:$8 sps:$4 sm:$0xff]   ;;  %v3760_v58 = vld [vmem:[%s4094_s22 + $0x2a4] ss:$8 sps:$4 sm:$0xff]   ;;  %v3686_v59 = vld [vmem:[%s4094_s22 + $0xa0] ss:$8 sps:$4 sm:$0xff]  }
  0x4e   : > { %v3762_v60 = vld [vmem:[%s4094_s22 + $0x2a0] ss:$8 sps:$4 sm:$0xff]   ;;  %v3687_v61 = vld [vmem:[%s4094_s22 + $0xb4] ss:$8 sps:$4 sm:$0xff]   ;;  %v3689_v63 = vld [vmem:[%s4094_s22 + $0xb0] ss:$8 sps:$4 sm:$0xff]  }
  0x4f   : > { %v3765_v62 = vld [vmem:[%s4094_s22 + $0x2b4] ss:$8 sps:$4 sm:$0xff]   ;;  %v3690_v1 = vld [vmem:[%s4094_s22 + $0xc4] ss:$8 sps:$4 sm:$0xff]   ;;  %v3692_v3 = vld [vmem:[%s4094_s22 + $0xc0] ss:$8 sps:$4 sm:$0xff]  }
  0x50   : > { %1148 = vmatpush1.bf16.msra.mxu0 %v3643_v7  ;;  %3573 = vmatpush1.bf16.msra.mxu1 %v3643_v7  ;;  %v3770_v2 = vld [vmem:[%s4094_s22 + $0x2c4] ss:$8 sps:$4 sm:$0xff]   ;;  %v3772_v4 = vld [vmem:[%s4094_s22 + $0x2c0] ss:$8 sps:$4 sm:$0xff]   ;;  %v3693_v5 = vld [vmem:[%s4094_s22 + $0xd4] ss:$8 sps:$4 sm:$0xff]  }
  0x51   : > { %1149 = vmatprep.subr.bf16.mxu0 %v3965_v0  ;;  %3558 = vmatprep.subr.bf16.mxu1 %v3965_v0  ;;  %v3776_v6 = vld [vmem:[%s4094_s22 + $0x2d4] ss:$8 sps:$4 sm:$0xff]   ;;  %v3695_v7 = vld [vmem:[%s4094_s22 + $0xd0] ss:$8 sps:$4 sm:$0xff]   ;;  %v3705_v17 = vld [vmem:[%s4094_s22 + $0x104] ss:$8 sps:$4 sm:$0xff]  }
  0x52   : > { %s3866_s11 = scalar_lea.vmem %s5466_s30, 16  ;;  %p5636_p13 = scmp.ne.s32.totalorder %s5590_s27, 0 }
  0x53   : > { %p3867_p12 = scmp.ne.s32.totalorder %s5466_s30, %s3866_s11  ;;  %s3966_s12 = smov [#allocation5]  }
  0x54   : > { %1150 = vmatpush1.bf16.msra.mxu0 %v3644_v8  ;;  %3574 = vmatpush1.bf16.msra.mxu1 %v3644_v8  ;;  %v3778_v8 = vld [vmem:[%s4094_s22 + $0x2d0] ss:$8 sps:$4 sm:$0xff]   ;;  %s3870_s26 = sshll.u32 %s3966_s12, 4  ;;  %s3871_s26 = int_to_ptr.vmem [resolvable:$false] %s3870_s26 }
  0x55   : > { %1151 = vmatprep.subr.bf16.mxu0 %v3965_v0  ;;  %3559 = vmatprep.subr.bf16.mxu1 %v3965_v0  ;;  %p3868_p4 = pnand %p3867_p12, %p5636_p13  ;;  %s3872_s23 = scalar_lea.vmem %s3871_s26, 32 }
  0x56   : > { %p3873_p7 = scmp.lt.s32.totalorder %s5466_s30, %s3871_s26  ;;  %p3874_p8 = scmp.lt.s32.totalorder %s3872_s23, %s3866_s11 }
  0x57   : > { %p3869_p5 = pneg %p3868_p4 }
  0x58   : > { %1152 = vmatpush1.bf16.msra.mxu0 %v3645_v9  ;;  %3575 = vmatpush1.bf16.msra.mxu1 %v3645_v9  ;;  %v3696_v9 = vld [vmem:[%s4094_s22 + $0xe4] ss:$8 sps:$4 sm:$0xff]   ;;  %p3875_p10 = por %p3874_p8, %p3873_p7 }
  0x59   : > { %1153 = vmatprep.subr.bf16.mxu0 %v3965_v0  ;;  %3560 = vmatprep.subr.bf16.mxu1 %v3965_v0 }
  0x5a   : > { %p3876_p0 = pnand %p3875_p10, %p3869_p5 }
  0x5c   : > { %1154 = vmatpush2.bf16.msra.mxu0 %v3646_v10  ;;  %3576 = vmatpush2.bf16.msra.mxu1 %v3646_v10  ;;  %v3782_v10 = vld [vmem:[%s4094_s22 + $0x2e4] ss:$8 sps:$4 sm:$0xff]  }
  0x5d   : > { %1155 = vmatprep.subr.bf16.mxu0 %v3965_v0  ;;  %3561 = vmatprep.subr.bf16.mxu1 %v3965_v0 }
  0x60   : > { %1156 = vmatpush2.bf16.msra.mxu0 %v3647_v11  ;;  %3577 = vmatpush2.bf16.msra.mxu1 %v3647_v11  ;;  %v3698_v11 = vld [vmem:[%s4094_s22 + $0xe0] ss:$8 sps:$4 sm:$0xff]  }
  0x61   : > { %1157 = vmatprep.subr.bf16.mxu0 %v3965_v0  ;;  %3562 = vmatprep.subr.bf16.mxu1 %v3965_v0 }
  0x64   : > { %1158 = vmatpush2.bf16.msra.mxu0 %v3648_v12  ;;  %3578 = vmatpush2.bf16.msra.mxu1 %v3648_v12  ;;  %v3784_v12 = vld [vmem:[%s4094_s22 + $0x2e0] ss:$8 sps:$4 sm:$0xff]  }
  0x65   : > { %1159 = vmatprep.subr.bf16.mxu0 %v3965_v0  ;;  %3563 = vmatprep.subr.bf16.mxu1 %v3965_v0 }
  0x68   : > { %1160 = vmatpush2.bf16.msra.mxu0 %v3649_v13  ;;  %3579 = vmatpush2.bf16.msra.mxu1 %v3649_v13  ;;  %v3699_v13 = vld [vmem:[%s4094_s22 + $0xf4] ss:$8 sps:$4 sm:$0xff]  }
  0x69   : > { %1161 = vmatprep.subr.bf16.mxu0 %v3965_v0  ;;  %3564 = vmatprep.subr.bf16.mxu1 %v3965_v0 }
  0x6c   : > { %1162 = vmatpush2.bf16.msra.mxu0 %v3650_v14  ;;  %3580 = vmatpush2.bf16.msra.mxu1 %v3650_v14  ;;  %v3788_v14 = vld [vmem:[%s4094_s22 + $0x2f4] ss:$8 sps:$4 sm:$0xff]  }
  0x6d   : > { %1163 = vmatprep.subr.bf16.mxu0 %v3965_v0  ;;  %3565 = vmatprep.subr.bf16.mxu1 %v3965_v0 }
  0x70   : > { %1164 = vmatpush2.bf16.msra.mxu0 %v3651_v15  ;;  %3581 = vmatpush2.bf16.msra.mxu1 %v3651_v15  ;;  %v3701_v15 = vld [vmem:[%s4094_s22 + $0xf0] ss:$8 sps:$4 sm:$0xff]  }
  0x71   : > { %1165 = vmatprep.subr.bf16.mxu0 %v3965_v0  ;;  %3566 = vmatprep.subr.bf16.mxu1 %v3965_v0 }
  0x74   : > { %1166 = vmatpush2.bf16.msra.mxu0 %v3652_v16  ;;  %3582 = vmatpush2.bf16.msra.mxu1 %v3652_v16  ;;  %v3790_v16 = vld [vmem:[%s4094_s22 + $0x2f0] ss:$8 sps:$4 sm:$0xff]  }
  0x75   : > { %1167 = vmatprep.subr.bf16.mxu0 %v3965_v0  ;;  %3567 = vmatprep.subr.bf16.mxu1 %v3965_v0  ;;  %v3767_v0 = vld [vmem:[%s4094_s22 + $0x2b0] ss:$8 sps:$4 sm:$0xff]  }
  0x78   : > { %1168 = vmatpush2.bf16.msra.mxu0 %v3653_v18  ;;  %3583 = vmatpush2.bf16.msra.mxu1 %v3653_v18  ;;  %v3794_v18 = vld [vmem:[%s4094_s22 + $0x304] ss:$8 sps:$4 sm:$0xff]  }
  0x7b   : > { %1170 = vmatmul.mubr.bf16.vlgmr.msra.gmra.mxu0 %v3654_v19  ;;  %1426 = vmatmul.mubr.bf16.vlgmr.msra.gmra.mxu1 %v3702_v20  ;;  %v3707_v19 = vld [vmem:[%s4094_s22 + $0x100] ss:$8 sps:$4 sm:$0xff]  }
  0x7c   : > { %1177 = vmatprep.mubr.bf16.mxu0 %v3657_v21  ;;  %1433 = vmatprep.mubr.bf16.mxu1 %v3708_v22  ;;  %v3796_v20 = vld [vmem:[%s4094_s22 + $0x300] ss:$8 sps:$4 sm:$0xff]   ;;  %v3711_v21 = vld [vmem:[%s4094_s22 + $0x114] ss:$8 sps:$4 sm:$0xff]  }
  0x7d   : > { %v3797_v22 = vld [vmem:[%s4094_s22 + $0x314] ss:$8 sps:$4 sm:$0xff]  }
  0x83   : > { %1178 = vmatmul.mubr.bf16.gmra.mxu0 %v3659_v23  ;;  %1434 = vmatmul.mubr.bf16.gmra.mxu1 %v3710_v24  ;;  %v3713_v23 = vld [vmem:[%s4094_s22 + $0x110] ss:$8 sps:$4 sm:$0xff]  }
  0x84   : > { %1185 = vmatprep.mubr.bf16.mxu0 %v3660_v25  ;;  %1441 = vmatprep.mubr.bf16.mxu1 %v3714_v26  ;;  %v3799_v24 = vld [vmem:[%s4094_s22 + $0x310] ss:$8 sps:$4 sm:$0xff]   ;;  %v3717_v25 = vld [vmem:[%s4094_s22 + $0x124] ss:$8 sps:$4 sm:$0xff]  }
  0x85   : > { %v3800_v26 = vld [vmem:[%s4094_s22 + $0x324] ss:$8 sps:$4 sm:$0xff]  }
  0x8b   : > { %1186 = vmatmul.mubr.bf16.gmra.mxu0 %v3662_v27  ;;  %1442 = vmatmul.mubr.bf16.gmra.mxu1 %v3716_v28  ;;  %v3719_v27 = vld [vmem:[%s4094_s22 + $0x120] ss:$8 sps:$4 sm:$0xff]  }
  0x8c   : > { %1193 = vmatprep.mubr.bf16.mxu0 %v3663_v29  ;;  %1449 = vmatprep.mubr.bf16.mxu1 %v3720_v30  ;;  %v3802_v28 = vld [vmem:[%s4094_s22 + $0x320] ss:$8 sps:$4 sm:$0xff]   ;;  %v3723_v29 = vld [vmem:[%s4094_s22 + $0x134] ss:$8 sps:$4 sm:$0xff]  }
  0x8d   : > { %v3803_v30 = vld [vmem:[%s4094_s22 + $0x334] ss:$8 sps:$4 sm:$0xff]  }
  0x93   : > { %1194 = vmatmul.mubr.bf16.gmra.mxu0 %v3665_v31  ;;  %1450 = vmatmul.mubr.bf16.gmra.mxu1 %v3722_v32  ;;  %v3725_v31 = vld [vmem:[%s4094_s22 + $0x130] ss:$8 sps:$4 sm:$0xff]  }
  0x94   : > { %1201 = vmatprep.mubr.bf16.mxu0 %v3666_v33  ;;  %1457 = vmatprep.mubr.bf16.mxu1 %v3726_v34  ;;  %v3805_v32 = vld [vmem:[%s4094_s22 + $0x330] ss:$8 sps:$4 sm:$0xff]   ;;  %v3729_v33 = vld [vmem:[%s4094_s22 + $0x144] ss:$8 sps:$4 sm:$0xff]  }
  0x95   : > { %v3806_v34 = vld [vmem:[%s4094_s22 + $0x344] ss:$8 sps:$4 sm:$0xff]  }
  0x9b   : > { %1202 = vmatmul.mubr.bf16.gmra.mxu0 %v3668_v35  ;;  %1458 = vmatmul.mubr.bf16.gmra.mxu1 %v3728_v36  ;;  %v3731_v35 = vld [vmem:[%s4094_s22 + $0x140] ss:$8 sps:$4 sm:$0xff]  }
  0x9c   : > { %1209 = vmatprep.mubr.bf16.mxu0 %v3669_v37  ;;  %1465 = vmatprep.mubr.bf16.mxu1 %v3732_v38  ;;  %v3808_v36 = vld [vmem:[%s4094_s22 + $0x340] ss:$8 sps:$4 sm:$0xff]   ;;  %v3735_v37 = vld [vmem:[%s4094_s22 + $0x154] ss:$8 sps:$4 sm:$0xff]  }
  0x9d   : > { %v3809_v38 = vld [vmem:[%s4094_s22 + $0x354] ss:$8 sps:$4 sm:$0xff]  }
  0xa3   : > { %1210 = vmatmul.mubr.bf16.gmra.mxu0 %v3671_v39  ;;  %1466 = vmatmul.mubr.bf16.gmra.mxu1 %v3734_v40  ;;  %v3737_v39 = vld [vmem:[%s4094_s22 + $0x150] ss:$8 sps:$4 sm:$0xff]  }
  0xa4   : > { %1217 = vmatprep.mubr.bf16.mxu0 %v3672_v41  ;;  %1473 = vmatprep.mubr.bf16.mxu1 %v3738_v42  ;;  %v3811_v40 = vld [vmem:[%s4094_s22 + $0x350] ss:$8 sps:$4 sm:$0xff]   ;;  %v3741_v41 = vld [vmem:[%s4094_s22 + $0x164] ss:$8 sps:$4 sm:$0xff]  }
  0xa5   : > { %v3812_v42 = vld [vmem:[%s4094_s22 + $0x364] ss:$8 sps:$4 sm:$0xff]  }
  0xab   : > { %1218 = vmatmul.mubr.bf16.gmra.mxu0 %v3674_v43  ;;  %1474 = vmatmul.mubr.bf16.gmra.mxu1 %v3740_v44  ;;  %v3743_v43 = vld [vmem:[%s4094_s22 + $0x160] ss:$8 sps:$4 sm:$0xff]  }
  0xac   : > { %1225 = vmatprep.mubr.bf16.mxu0 %v3675_v45  ;;  %1481 = vmatprep.mubr.bf16.mxu1 %v3744_v46  ;;  %v3814_v44 = vld [vmem:[%s4094_s22 + $0x360] ss:$8 sps:$4 sm:$0xff]   ;;  %v3747_v45 = vld [vmem:[%s4094_s22 + $0x174] ss:$8 sps:$4 sm:$0xff]  }
  0xad   : > { %v3815_v46 = vld [vmem:[%s4094_s22 + $0x374] ss:$8 sps:$4 sm:$0xff]  }
  0xb3   : > { %1226 = vmatmul.mubr.bf16.gmra.mxu0 %v3677_v47  ;;  %1482 = vmatmul.mubr.bf16.gmra.mxu1 %v3746_v48  ;;  %v3749_v47 = vld [vmem:[%s4094_s22 + $0x170] ss:$8 sps:$4 sm:$0xff]  }
  0xb4   : > { %1233 = vmatprep.mubr.bf16.mxu0 %v3678_v49  ;;  %1489 = vmatprep.mubr.bf16.mxu1 %v3750_v50  ;;  %v3817_v48 = vld [vmem:[%s4094_s22 + $0x370] ss:$8 sps:$4 sm:$0xff]   ;;  %v3753_v49 = vld [vmem:[%s4094_s22 + $0x184] ss:$8 sps:$4 sm:$0xff]  }
  0xb5   : > { %v3818_v50 = vld [vmem:[%s4094_s22 + $0x384] ss:$8 sps:$4 sm:$0xff]  }
  0xbb   : > { %1234 = vmatmul.mubr.bf16.gmra.mxu0 %v3680_v51  ;;  %1490 = vmatmul.mubr.bf16.gmra.mxu1 %v3752_v52  ;;  %v289_v51 = vld [vmem:[%s4094_s22 + $0x180] sm:$0xff]  ;;  %v290_v52 = vld [vmem:[%s4094_s22 + $0x188] sm:$0xff] }
  0xbc   : > { %1241 = vmatprep.mubr.bf16.mxu0 %v3681_v53  ;;  %1497 = vmatprep.mubr.bf16.mxu1 %v3755_v54  ;;  %v353_v53 = vld [vmem:[%s4094_s22 + $0x380] sm:$0xff]  ;;  %v354_v54 = vld [vmem:[%s4094_s22 + $0x388] sm:$0xff] }
  0xc3   : > { %1242 = vmatmul.mubr.bf16.gmra.mxu0 %v3683_v55  ;;  %1498 = vmatmul.mubr.bf16.gmra.mxu1 %v3757_v56  ;;  %v3194_v55 = vcombine.low %v289_v51, %v290_v52  ;;  %v3258_v56 = vcombine.low %v353_v53, %v354_v54  ;;  %v3824_v51 = vld [vmem:[%s4094_s22 + $0x3b4] ss:$8 sps:$4 sm:$0xff]  }
  0xc4   : > { %1249 = vmatprep.mubr.bf16.mxu0 %v3684_v57  ;;  %1505 = vmatprep.mubr.bf16.mxu1 %v3760_v58  ;;  %v3758_v57 = vld [vmem:[%s4094_s22 + $0x194] ss:$8 sps:$4 sm:$0xff]  }
  0xc5   : > { %v3820_v58 = vld [vmem:[%s4094_s22 + $0x394] ss:$8 sps:$4 sm:$0xff]  }
  0xc6   : > { %v295_v54 = vld [vmem:[%s4094_s22 + $0x1b0] sm:$0xff] }
  0xcb   : > { %1250 = vmatmul.mubr.bf16.gmra.mxu0 %v3686_v59  ;;  %1506 = vmatmul.mubr.bf16.gmra.mxu1 %v3762_v60  ;;  %v291_v60 = vld [vmem:[%s4094_s22 + $0x190] sm:$0xff] }
  0xcc   : > { %1257 = vmatprep.mubr.bf16.mxu0 %v3687_v61  ;;  %1513 = vmatprep.mubr.bf16.mxu1 %v3765_v62 }
  0xd3   : > { %1258 = vmatmul.mubr.bf16.gmra.mxu0 %v3689_v63  ;;  %1514 = vmatmul.mubr.bf16.gmra.mxu1 %v3767_v0  ;;  %v292_v63 = vld [vmem:[%s4094_s22 + $0x198] sm:$0xff] }
  0xd4   : > { %1265 = vmatprep.mubr.bf16.mxu0 %v3690_v1  ;;  %1521 = vmatprep.mubr.bf16.mxu1 %v3770_v2  ;;  %v355_v1 = vld [vmem:[%s4094_s22 + $0x390] sm:$0xff]  ;;  %v356_v2 = vld [vmem:[%s4094_s22 + $0x398] sm:$0xff] }
  0xdb   : > { %1266 = vmatmul.mubr.bf16.gmra.mxu0 %v3692_v3  ;;  %1522 = vmatmul.mubr.bf16.gmra.mxu1 %v3772_v4 }
  0xdc   : > { %1273 = vmatprep.mubr.bf16.mxu0 %v3693_v5  ;;  %1529 = vmatprep.mubr.bf16.mxu1 %v3776_v6 }
  0xe3   : > { %1274 = vmatmul.mubr.bf16.gmra.mxu0 %v3695_v7  ;;  %1530 = vmatmul.mubr.bf16.gmra.mxu1 %v3778_v8  ;;  %v3196_v8 = vcombine.low %v291_v60, %v292_v63  ;;  %v360_v63 = vld [vmem:[%s4094_s22 + $0x3b8] sm:$0xff] }
  0xe4   : > { %1281 = vmatprep.mubr.bf16.mxu0 %v3696_v9  ;;  %1537 = vmatprep.mubr.bf16.mxu1 %v3782_v10  ;;  %v3260_v10 = vcombine.low %v355_v1, %v356_v2 }
  0xeb   : > { %1282 = vmatmul.mubr.bf16.gmra.mxu0 %v3698_v11  ;;  %1538 = vmatmul.mubr.bf16.gmra.mxu1 %v3784_v12 }
  0xec   : > { %1289 = vmatprep.mubr.bf16.mxu0 %v3699_v13  ;;  %1545 = vmatprep.mubr.bf16.mxu1 %v3788_v14  ;;  %v3763_v14 = vld [vmem:[%s4094_s22 + $0x1a4] ss:$8 sps:$4 sm:$0xff]  }
  0xf3   : > { %1290 = vmatmul.mubr.bf16.gmra.mxu0 %v3701_v15  ;;  %1546 = vmatmul.mubr.bf16.gmra.mxu1 %v3790_v16 }
  0xf4   : > { %1297 = vmatprep.mubr.bf16.mxu0 %v3705_v17  ;;  %1553 = vmatprep.mubr.bf16.mxu1 %v3794_v18 }
  0xfb   : > { %1298 = vmatmul.mubr.bf16.gmra.mxu0 %v3707_v19  ;;  %1554 = vmatmul.mubr.bf16.gmra.mxu1 %v3796_v20 }
  0xfc   : > { %1305 = vmatprep.mubr.bf16.mxu0 %v3711_v21  ;;  %1561 = vmatprep.mubr.bf16.mxu1 %v3797_v22  ;;  %v3822_v21 = vld [vmem:[%s4094_s22 + $0x3a4] ss:$8 sps:$4 sm:$0xff]  }
 0x103   : > { %1306 = vmatmul.mubr.bf16.gmra.mxu0 %v3713_v23  ;;  %1562 = vmatmul.mubr.bf16.gmra.mxu1 %v3799_v24  ;;  %v293_v24 = vld [vmem:[%s4094_s22 + $0x1a0] sm:$0xff] }
 0x104   : > { %1313 = vmatprep.mubr.bf16.mxu0 %v3717_v25  ;;  %1569 = vmatprep.mubr.bf16.mxu1 %v3800_v26 }
 0x10b   : > { %1314 = vmatmul.mubr.bf16.gmra.mxu0 %v3719_v27  ;;  %1570 = vmatmul.mubr.bf16.gmra.mxu1 %v3802_v28 }
 0x10c   : > { %1321 = vmatprep.mubr.bf16.mxu0 %v3723_v29  ;;  %1577 = vmatprep.mubr.bf16.mxu1 %v3803_v30  ;;  %v294_v29 = vld [vmem:[%s4094_s22 + $0x1a8] sm:$0xff] }
 0x113   : > { %1322 = vmatmul.mubr.bf16.gmra.mxu0 %v3725_v31  ;;  %1578 = vmatmul.mubr.bf16.gmra.mxu1 %v3805_v32  ;;  %v357_v31 = vld [vmem:[%s4094_s22 + $0x3a0] sm:$0xff]  ;;  %v358_v32 = vld [vmem:[%s4094_s22 + $0x3a8] sm:$0xff] }
 0x114   : > { %1329 = vmatprep.mubr.bf16.mxu0 %v3729_v33  ;;  %1585 = vmatprep.mubr.bf16.mxu1 %v3806_v34 }
 0x11b   : > { %1330 = vmatmul.mubr.bf16.gmra.mxu0 %v3731_v35  ;;  %1586 = vmatmul.mubr.bf16.gmra.mxu1 %v3808_v36 }
 0x11c   : > { %1337 = vmatprep.mubr.bf16.mxu0 %v3735_v37  ;;  %1593 = vmatprep.mubr.bf16.mxu1 %v3809_v38 }
 0x123   : > { %1338 = vmatmul.mubr.bf16.gmra.mxu0 %v3737_v39  ;;  %1594 = vmatmul.mubr.bf16.gmra.mxu1 %v3811_v40  ;;  %v3198_v39 = vcombine.low %v293_v24, %v294_v29 }
 0x124   : > { %1345 = vmatprep.mubr.bf16.mxu0 %v3741_v41  ;;  %1601 = vmatprep.mubr.bf16.mxu1 %v3812_v42  ;;  %v3262_v41 = vcombine.low %v357_v31, %v358_v32 }
 0x12b   : > { %1346 = vmatmul.mubr.bf16.gmra.mxu0 %v3743_v43  ;;  %1602 = vmatmul.mubr.bf16.gmra.mxu1 %v3814_v44 }
 0x12c   : > { %1353 = vmatprep.mubr.bf16.mxu0 %v3747_v45  ;;  %1609 = vmatprep.mubr.bf16.mxu1 %v3815_v46  ;;  %v3768_v45 = vld [vmem:[%s4094_s22 + $0x1b4] ss:$8 sps:$4 sm:$0xff]  }
 0x133   : > { %1354 = vmatmul.mubr.bf16.gmra.mxu0 %v3749_v47  ;;  %1610 = vmatmul.mubr.bf16.gmra.mxu1 %v3817_v48 }
 0x134   : > { %1361 = vmatprep.mubr.bf16.mxu0 %v3753_v49  ;;  %1617 = vmatprep.mubr.bf16.mxu1 %v3818_v50 }
 0x13b   : > { %v1171_v59 = vpop.f32.mrf.mxu0  ;;  %1362 = vmatmul.mubr.bf16.gmra.mxu0 %v3194_v55  ;;  %v4291_v61 = vpop.f32.mrf.mxu1  ;;  %1618 = vmatmul.mubr.bf16.gmra.mxu1 %v3258_v56 }
 0x13c   : > { %v3424_v62 = vpack.c.bf16 %v1171_v59, %v1171_v59  ;;  %1369 = vmatprep.mubr.bf16.mxu0 %v3758_v57  ;;  %v3488_v0 = vpack.c.bf16 %v4291_v61, %v4291_v61  ;;  %1625 = vmatprep.mubr.bf16.mxu1 %v3820_v58  ;;  %v2587_v5 = vmul.f32 %v1171_v59, %v1171_v59  ;;  %v2324_v6 = vsel %vm2323_vm1, %v1171_v59, 0.0  ;;  %v296_v59 = vld [vmem:[%s4094_s22 + $0x1b8] sm:$0xff] }
 0x13d   : > { %v1173_v3 = vpop.f32.mrf.mxu0  ;;  %v1429_v4 = vpop.f32.mrf.mxu1 }
 0x13e   : > { %2195 = vst.msk [vmem:[%s4288_s25] sm:$0xf] %vm2194_vm0, %v3424_v62  ;;  %2259 = vst.msk [vmem:[%s4288_s25 + $0x100] sm:$0xf] %vm2194_vm0, %v3488_v0  ;;  %v2715_v19 = vsel %vm2323_vm1, %v2587_v5, 0.0  ;;  %v359_v62 = vld [vmem:[%s4094_s22 + $0x3b0] sm:$0xff] }
 0x13f   : > { %v1174_v7 = vpop.f32.mrf.mxu0  ;;  %v4303_v9 = vpop.f32.mrf.mxu1 }
 0x140   : > { %v3425_v11 = vpack.c.bf16 %v1174_v7, %v1174_v7  ;;  %v2325_v12 = vsel %vm2323_vm1, %v1174_v7, 0.0  ;;  %v2588_v13 = vmul.f32 %v1174_v7, %v1174_v7  ;;  %v3489_v15 = vpack.c.bf16 %v4303_v9, %v4303_v9 }
 0x141   : > { %v2326_v16 = vadd.f32 %v2325_v12, %v2324_v6  ;;  %v1176_v17 = vpop.f32.mrf.mxu0  ;;  %v1432_v18 = vpop.f32.mrf.mxu1  ;;  %v3200_v6 = vcombine.low %v295_v54, %v296_v59 }
 0x142   : > { %2196 = vst.msk [vmem:[%s4288_s25 + $0x4] sm:$0xf] %vm2194_vm0, %v3425_v11  ;;  %v2716_v20 = vsel %vm2323_vm1, %v2588_v13, 0.0  ;;  %2260 = vst.msk [vmem:[%s4288_s25 + $0x104] sm:$0xf] %vm2194_vm0, %v3489_v15 }
 0x143   : > { %v2717_v22 = vadd.f32 %v2716_v20, %v2715_v19  ;;  %v1179_v23 = vpop.f32.mrf.mxu0  ;;  %1370 = vmatmul.mubr.bf16.gmra.mxu0 %v3196_v8  ;;  %v4317_v25 = vpop.f32.mrf.mxu1  ;;  %1626 = vmatmul.mubr.bf16.gmra.mxu1 %v3260_v10  ;;  %v3264_v8 = vcombine.low %v359_v62, %v360_v63  ;;  %v3775_v13 = vld [vmem:[%s4094_s22 + $0x1c4] ss:$8 sps:$4 sm:$0xff]   ;;  %v3779_v63 = vld [vmem:[%s4094_s22 + $0x1d0] ss:$8 sps:$4 sm:$0xff]  }
 0x144   : > { %v3426_v26 = vpack.c.bf16 %v1179_v23, %v1179_v23  ;;  %v2327_v27 = vsel %vm2323_vm1, %v1179_v23, 0.0  ;;  %v2589_v28 = vmul.f32 %v1179_v23, %v1179_v23  ;;  %1377 = vmatprep.mubr.bf16.mxu0 %v3763_v14  ;;  %v3490_v30 = vpack.c.bf16 %v4317_v25, %v4317_v25  ;;  %1633 = vmatprep.mubr.bf16.mxu1 %v3822_v21  ;;  %v3828_v19 = vld [vmem:[%s4094_s22 + $0x3c4] ss:$8 sps:$4 sm:$0xff]  }
 0x145   : > { %v2328_v33 = vadd.f32 %v2327_v27, %v2326_v16  ;;  %v1181_v34 = vpop.f32.mrf.mxu0  ;;  %v1437_v35 = vpop.f32.mrf.mxu1 }
 0x146   : > { %2197 = vst.msk [vmem:[%s4288_s25 + $0x8] sm:$0xf] %vm2194_vm0, %v3426_v26  ;;  %v2718_v36 = vsel %vm2323_vm1, %v2589_v28, 0.0  ;;  %2261 = vst.msk [vmem:[%s4288_s25 + $0x108] sm:$0xf] %vm2194_vm0, %v3490_v30 }
 0x147   : > { %v2719_v37 = vadd.f32 %v2718_v36, %v2717_v22  ;;  %v1182_v38 = vpop.f32.mrf.mxu0  ;;  %v4330_v40 = vpop.f32.mrf.mxu1  ;;  %v3773_v34 = vld [vmem:[%s4094_s22 + $0x1c0] ss:$8 sps:$4 sm:$0xff]  }
 0x148   : > { %v3427_v42 = vpack.c.bf16 %v1182_v38, %v1182_v38  ;;  %v2329_v43 = vsel %vm2323_vm1, %v1182_v38, 0.0  ;;  %v2590_v44 = vmul.f32 %v1182_v38, %v1182_v38  ;;  %v3491_v46 = vpack.c.bf16 %v4330_v40, %v4330_v40  ;;  %v3826_v36 = vld [vmem:[%s4094_s22 + $0x3c0] ss:$8 sps:$4 sm:$0xff]  }
 0x149   : > { %v2330_v47 = vadd.f32 %v2329_v43, %v2328_v33  ;;  %v1184_v48 = vpop.f32.mrf.mxu0  ;;  %v1440_v49 = vpop.f32.mrf.mxu1 }
 0x14a   : > { %2198 = vst.msk [vmem:[%s4288_s25 + $0xc] sm:$0xf] %vm2194_vm0, %v3427_v42  ;;  %v2720_v50 = vsel %vm2323_vm1, %v2590_v44, 0.0  ;;  %2262 = vst.msk [vmem:[%s4288_s25 + $0x10c] sm:$0xf] %vm2194_vm0, %v3491_v46 }
 0x14b   : > { %v2721_v52 = vadd.f32 %v2720_v50, %v2719_v37  ;;  %v1187_v53 = vpop.f32.mrf.mxu0  ;;  %1378 = vmatmul.mubr.bf16.gmra.mxu0 %v3198_v39  ;;  %v4343_v55 = vpop.f32.mrf.mxu1  ;;  %1634 = vmatmul.mubr.bf16.gmra.mxu1 %v3262_v41  ;;  %v3781_v41 = vld [vmem:[%s4094_s22 + $0x1d4] ss:$8 sps:$4 sm:$0xff]  }
 0x14c   : > { %v3428_v56 = vpack.c.bf16 %v1187_v53, %v1187_v53  ;;  %v2331_v57 = vsel %vm2323_vm1, %v1187_v53, 0.0  ;;  %v2591_v58 = vmul.f32 %v1187_v53, %v1187_v53  ;;  %1385 = vmatprep.mubr.bf16.mxu0 %v3768_v45  ;;  %v3492_v60 = vpack.c.bf16 %v4343_v55, %v4343_v55  ;;  %1641 = vmatprep.mubr.bf16.mxu1 %v3824_v51 }
 0x14d   : > { %v2332_v0 = vadd.f32 %v2331_v57, %v2330_v47  ;;  %v1189_v1 = vpop.f32.mrf.mxu0  ;;  %v1445_v2 = vpop.f32.mrf.mxu1  ;;  %v3831_v47 = vld [vmem:[%s4094_s22 + $0x3d4] ss:$8 sps:$4 sm:$0xff]  }
 0x14e   : > { %2199 = vst.msk [vmem:[%s4288_s25 + $0x10] sm:$0xf] %vm2194_vm0, %v3428_v56  ;;  %v2722_v3 = vsel %vm2323_vm1, %v2591_v58, 0.0  ;;  %2263 = vst.msk [vmem:[%s4288_s25 + $0x110] sm:$0xf] %vm2194_vm0, %v3492_v60 }
 0x14f   : > { %v2723_v4 = vadd.f32 %v2722_v3, %v2721_v52  ;;  %v1190_v5 = vpop.f32.mrf.mxu0  ;;  %v4356_v7 = vpop.f32.mrf.mxu1  ;;  %v3829_v1 = vld [vmem:[%s4094_s22 + $0x3d0] ss:$8 sps:$4 sm:$0xff]  }
 0x150   : > { %v3429_v10 = vpack.c.bf16 %v1190_v5, %v1190_v5  ;;  %v2333_v11 = vsel %vm2323_vm1, %v1190_v5, 0.0  ;;  %v2592_v12 = vmul.f32 %v1190_v5, %v1190_v5  ;;  %v3493_v14 = vpack.c.bf16 %v4356_v7, %v4356_v7  ;;  %v3787_v5 = vld [vmem:[%s4094_s22 + $0x1e4] ss:$8 sps:$4 sm:$0xff]  }
 0x151   : > { %v2334_v15 = vadd.f32 %v2333_v11, %v2332_v0  ;;  %v1192_v16 = vpop.f32.mrf.mxu0  ;;  %v1448_v17 = vpop.f32.mrf.mxu1 }
 0x152   : > { %2200 = vst.msk [vmem:[%s4288_s25 + $0x14] sm:$0xf] %vm2194_vm0, %v3429_v10  ;;  %v2724_v18 = vsel %vm2323_vm1, %v2592_v12, 0.0  ;;  %2264 = vst.msk [vmem:[%s4288_s25 + $0x114] sm:$0xf] %vm2194_vm0, %v3493_v14 }
 0x153   : > { %v2725_v20 = vadd.f32 %v2724_v18, %v2723_v4  ;;  %v1195_v21 = vpop.f32.mrf.mxu0  ;;  %1386 = vmatmul.mubr.bf16.gmra.mxu0 %v3200_v6  ;;  %v4368_v22 = vpop.f32.mrf.mxu1  ;;  %1642 = vmatmul.mubr.bf16.gmra.mxu1 %v3264_v8 }
 0x154   : > { %v3430_v23 = vpack.c.bf16 %v1195_v21, %v1195_v21  ;;  %v2335_v24 = vsel %vm2323_vm1, %v1195_v21, 0.0  ;;  %v2593_v26 = vmul.f32 %v1195_v21, %v1195_v21  ;;  %1393 = vmatprep.mubr.bf16.mxu0 %v3775_v13  ;;  %v3494_v27 = vpack.c.bf16 %v4368_v22, %v4368_v22  ;;  %1649 = vmatprep.mubr.bf16.mxu1 %v3828_v19  ;;  %v3834_v13 = vld [vmem:[%s4094_s22 + $0x3e4] ss:$8 sps:$4 sm:$0xff]  }
 0x155   : > { %v2336_v28 = vadd.f32 %v2335_v24, %v2334_v15  ;;  %v1197_v29 = vpop.f32.mrf.mxu0  ;;  %v1453_v30 = vpop.f32.mrf.mxu1 }
 0x156   : > { %2201 = vst.msk [vmem:[%s4288_s25 + $0x18] sm:$0xf] %vm2194_vm0, %v3430_v23  ;;  %v2726_v31 = vsel %vm2323_vm1, %v2593_v26, 0.0  ;;  %2265 = vst.msk [vmem:[%s4288_s25 + $0x118] sm:$0xf] %vm2194_vm0, %v3494_v27 }
 0x157   : > { %v2727_v32 = vadd.f32 %v2726_v31, %v2725_v20  ;;  %v1198_v33 = vpop.f32.mrf.mxu0  ;;  %v4379_v35 = vpop.f32.mrf.mxu1  ;;  %v3785_v29 = vld [vmem:[%s4094_s22 + $0x1e0] ss:$8 sps:$4 sm:$0xff]  }
 0x158   : > { %v3431_v37 = vpack.c.bf16 %v1198_v33, %v1198_v33  ;;  %v2337_v38 = vsel %vm2323_vm1, %v1198_v33, 0.0  ;;  %v2594_v39 = vmul.f32 %v1198_v33, %v1198_v33  ;;  %v3495_v42 = vpack.c.bf16 %v4379_v35, %v4379_v35  ;;  %v3832_v31 = vld [vmem:[%s4094_s22 + $0x3e0] ss:$8 sps:$4 sm:$0xff]  }
 0x159   : > { %v2338_v43 = vadd.f32 %v2337_v38, %v2336_v28  ;;  %v1200_v44 = vpop.f32.mrf.mxu0  ;;  %v1456_v45 = vpop.f32.mrf.mxu1 }
 0x15a   : > { %2202 = vst.msk [vmem:[%s4288_s25 + $0x1c] sm:$0xf] %vm2194_vm0, %v3431_v37  ;;  %v2728_v46 = vsel %vm2323_vm1, %v2594_v39, 0.0  ;;  %2266 = vst.msk [vmem:[%s4288_s25 + $0x11c] sm:$0xf] %vm2194_vm0, %v3495_v42 }
 0x15b   : > { %v2729_v48 = vadd.f32 %v2728_v46, %v2727_v32  ;;  %v1203_v49 = vpop.f32.mrf.mxu0  ;;  %1394 = vmatmul.mubr.bf16.gmra.mxu0 %v3773_v34  ;;  %v4392_v50 = vpop.f32.mrf.mxu1  ;;  %1650 = vmatmul.mubr.bf16.gmra.mxu1 %v3826_v36  ;;  %v3793_v36 = vld [vmem:[%s4094_s22 + $0x1f4] ss:$8 sps:$4 sm:$0xff]  }
 0x15c   : > { %v3432_v51 = vpack.c.bf16 %v1203_v49, %v1203_v49  ;;  %v2339_v52 = vsel %vm2323_vm1, %v1203_v49, 0.0  ;;  %v2595_v53 = vmul.f32 %v1203_v49, %v1203_v49  ;;  %1401 = vmatprep.mubr.bf16.mxu0 %v3781_v41  ;;  %v3496_v54 = vpack.c.bf16 %v4392_v50, %v4392_v50  ;;  %1657 = vmatprep.mubr.bf16.mxu1 %v3831_v47 }
 0x15d   : > { %v2340_v56 = vadd.f32 %v2339_v52, %v2338_v43  ;;  %v1205_v57 = vpop.f32.mrf.mxu0  ;;  %v1461_v58 = vpop.f32.mrf.mxu1  ;;  %v3837_v43 = vld [vmem:[%s4094_s22 + $0x3f4] ss:$8 sps:$4 sm:$0xff]  }
 0x15e   : > { %2203 = vst.msk [vmem:[%s4288_s25 + $0x20] sm:$0xf] %vm2194_vm0, %v3432_v51  ;;  %v2730_v59 = vsel %vm2323_vm1, %v2595_v53, 0.0  ;;  %2267 = vst.msk [vmem:[%s4288_s25 + $0x120] sm:$0xf] %vm2194_vm0, %v3496_v54 }
 0x15f   : > { %v2731_v60 = vadd.f32 %v2730_v59, %v2729_v48  ;;  %v1206_v62 = vpop.f32.mrf.mxu0  ;;  %v4403_v0 = vpop.f32.mrf.mxu1  ;;  %v3791_v59 = vld [vmem:[%s4094_s22 + $0x1f0] ss:$8 sps:$4 sm:$0xff]  }
 0x160   : > { %v3433_v2 = vpack.c.bf16 %v1206_v62, %v1206_v62  ;;  %v2341_v3 = vsel %vm2323_vm1, %v1206_v62, 0.0  ;;  %v2596_v4 = vmul.f32 %v1206_v62, %v1206_v62  ;;  %v3497_v6 = vpack.c.bf16 %v4403_v0, %v4403_v0  ;;  %v3835_v62 = vld [vmem:[%s4094_s22 + $0x3f0] ss:$8 sps:$4 sm:$0xff]   ;;  %s3418_s22 = sshll.u32 %s4014_s19, 4 }
 0x161   : > { %v2342_v8 = vadd.f32 %v2341_v3, %v2340_v56  ;;  %v1208_v10 = vpop.f32.mrf.mxu0  ;;  %v1464_v11 = vpop.f32.mrf.mxu1  ;;  %s5464_s14 = scalar_lea.hbm %s5542_s3, %s3418_s22  ;;  %s5472_s8 = scalar_lea.hbm %s5543_s4, %s3418_s22 }
 0x162   : > { %2204 = vst.msk [vmem:[%s4288_s25 + $0x24] sm:$0xf] %vm2194_vm0, %v3433_v2  ;;  %v2732_v12 = vsel %vm2323_vm1, %v2596_v4, 0.0  ;;  %2268 = vst.msk [vmem:[%s4288_s25 + $0x124] sm:$0xf] %vm2194_vm0, %v3497_v6 }
 0x163   : > { %v2733_v14 = vadd.f32 %v2732_v12, %v2731_v60  ;;  %v1211_v15 = vpop.f32.mrf.mxu0  ;;  %1402 = vmatmul.mubr.bf16.gmra.mxu0 %v3779_v63  ;;  %v4416_v16 = vpop.f32.mrf.mxu1  ;;  %1658 = vmatmul.mubr.bf16.gmra.mxu1 %v3829_v1 }
 0x164   : > { %v3434_v17 = vpack.c.bf16 %v1211_v15, %v1211_v15  ;;  %v2343_v18 = vsel %vm2323_vm1, %v1211_v15, 0.0  ;;  %v2597_v19 = vmul.f32 %v1211_v15, %v1211_v15  ;;  %1409 = vmatprep.mubr.bf16.mxu0 %v3787_v5  ;;  %v3498_v20 = vpack.c.bf16 %v4416_v16, %v4416_v16  ;;  %1665 = vmatprep.mubr.bf16.mxu1 %v3834_v13 }
 0x165   : > { %v2344_v21 = vadd.f32 %v2343_v18, %v2342_v8  ;;  %v1213_v23 = vpop.f32.mrf.mxu0  ;;  %v1469_v24 = vpop.f32.mrf.mxu1 }
 0x166   : > { %2205 = vst.msk [vmem:[%s4288_s25 + $0x28] sm:$0xf] %vm2194_vm0, %v3434_v17  ;;  %v2734_v26 = vsel %vm2323_vm1, %v2597_v19, 0.0  ;;  %2269 = vst.msk [vmem:[%s4288_s25 + $0x128] sm:$0xf] %vm2194_vm0, %v3498_v20 }
 0x167   : > { %v2735_v27 = vadd.f32 %v2734_v26, %v2733_v14  ;;  %v1214_v28 = vpop.f32.mrf.mxu0  ;;  %v4427_v30 = vpop.f32.mrf.mxu1 }
 0x168   : > { %v3435_v32 = vpack.c.bf16 %v1214_v28, %v1214_v28  ;;  %v2345_v33 = vsel %vm2323_vm1, %v1214_v28, 0.0  ;;  %v2598_v34 = vmul.f32 %v1214_v28, %v1214_v28  ;;  %v3499_v37 = vpack.c.bf16 %v4427_v30, %v4427_v30 }
 0x169   : > { %v2346_v38 = vadd.f32 %v2345_v33, %v2344_v21  ;;  %v1216_v39 = vpop.f32.mrf.mxu0  ;;  %v1472_v41 = vpop.f32.mrf.mxu1 }
 0x16a   : > { %2206 = vst.msk [vmem:[%s4288_s25 + $0x2c] sm:$0xf] %vm2194_vm0, %v3435_v32  ;;  %v2736_v42 = vsel %vm2323_vm1, %v2598_v34, 0.0  ;;  %2270 = vst.msk [vmem:[%s4288_s25 + $0x12c] sm:$0xf] %vm2194_vm0, %v3499_v37 }
 0x16b   : > { %v2737_v44 = vadd.f32 %v2736_v42, %v2735_v27  ;;  %v1219_v45 = vpop.f32.mrf.mxu0  ;;  %1410 = vmatmul.mubr.bf16.gmra.mxu0 %v3785_v29  ;;  %v4440_v46 = vpop.f32.mrf.mxu1  ;;  %1666 = vmatmul.mubr.bf16.gmra.mxu1 %v3832_v31 }
 0x16c   : > { %v3436_v47 = vpack.c.bf16 %v1219_v45, %v1219_v45  ;;  %v2347_v48 = vsel %vm2323_vm1, %v1219_v45, 0.0  ;;  %v2599_v49 = vmul.f32 %v1219_v45, %v1219_v45  ;;  %1417 = vmatprep.mubr.bf16.mxu0 %v3793_v36  ;;  %v3500_v51 = vpack.c.bf16 %v4440_v46, %v4440_v46  ;;  %1673 = vmatprep.mubr.bf16.mxu1 %v3837_v43 }
 0x16d   : > { %v2348_v52 = vadd.f32 %v2347_v48, %v2346_v38  ;;  %v1221_v53 = vpop.f32.mrf.mxu0  ;;  %v1477_v54 = vpop.f32.mrf.mxu1 }
 0x16e   : > { %2207 = vst.msk [vmem:[%s4288_s25 + $0x30] sm:$0xf] %vm2194_vm0, %v3436_v47  ;;  %v2738_v56 = vsel %vm2323_vm1, %v2599_v49, 0.0  ;;  %2271 = vst.msk [vmem:[%s4288_s25 + $0x130] sm:$0xf] %vm2194_vm0, %v3500_v51 }
 0x16f   : > { %v2739_v57 = vadd.f32 %v2738_v56, %v2737_v44  ;;  %v1222_v58 = vpop.f32.mrf.mxu0  ;;  %v4451_v60 = vpop.f32.mrf.mxu1 }
 0x170   : > { %v3437_v63 = vpack.c.bf16 %v1222_v58, %v1222_v58  ;;  %v2349_v1 = vsel %vm2323_vm1, %v1222_v58, 0.0  ;;  %v2600_v2 = vmul.f32 %v1222_v58, %v1222_v58  ;;  %v3501_v3 = vpack.c.bf16 %v4451_v60, %v4451_v60 }
 0x171   : > { %v2350_v4 = vadd.f32 %v2349_v1, %v2348_v52  ;;  %v1224_v5 = vpop.f32.mrf.mxu0  ;;  %v1480_v6 = vpop.f32.mrf.mxu1 }
 0x172   : > { %2208 = vst.msk [vmem:[%s4288_s25 + $0x34] sm:$0xf] %vm2194_vm0, %v3437_v63  ;;  %v2740_v8 = vsel %vm2323_vm1, %v2600_v2, 0.0  ;;  %2272 = vst.msk [vmem:[%s4288_s25 + $0x134] sm:$0xf] %vm2194_vm0, %v3501_v3 }
 0x173   : > { %v2741_v10 = vadd.f32 %v2740_v8, %v2739_v57  ;;  %v1227_v11 = vpop.f32.mrf.mxu0  ;;  %1418 = vmatmul.mubr.bf16.gmra.mxu0 %v3791_v59  ;;  %v4462_v12 = vpop.f32.mrf.mxu1  ;;  %1674 = vmatmul.mubr.bf16.gmra.mxu1 %v3835_v62 }
 0x174   : > { %v3438_v13 = vpack.c.bf16 %v1227_v11, %v1227_v11  ;;  %v2351_v14 = vsel %vm2323_vm1, %v1227_v11, 0.0  ;;  %v2601_v15 = vmul.f32 %v1227_v11, %v1227_v11  ;;  %v3502_v17 = vpack.c.bf16 %v4462_v12, %v4462_v12 }
 0x175   : > { %v2352_v18 = vadd.f32 %v2351_v14, %v2350_v4  ;;  %v1229_v19 = vpop.f32.mrf.mxu0  ;;  %v1485_v20 = vpop.f32.mrf.mxu1 }
 0x176   : > { %2209 = vst.msk [vmem:[%s4288_s25 + $0x38] sm:$0xf] %vm2194_vm0, %v3438_v13  ;;  %v2742_v21 = vsel %vm2323_vm1, %v2601_v15, 0.0  ;;  %2273 = vst.msk [vmem:[%s4288_s25 + $0x138] sm:$0xf] %vm2194_vm0, %v3502_v17 }
 0x177   : > { %v2743_v23 = vadd.f32 %v2742_v21, %v2741_v10  ;;  %v1230_v24 = vpop.f32.mrf.mxu0  ;;  %v4472_v26 = vpop.f32.mrf.mxu1 }
 0x178   : > { %v3439_v27 = vpack.c.bf16 %v1230_v24, %v1230_v24  ;;  %v2353_v28 = vsel %vm2323_vm1, %v1230_v24, 0.0  ;;  %v2602_v29 = vmul.f32 %v1230_v24, %v1230_v24  ;;  %v3503_v31 = vpack.c.bf16 %v4472_v26, %v4472_v26 }
 0x179   : > { %v2354_v32 = vadd.f32 %v2353_v28, %v2352_v18  ;;  %v1232_v33 = vpop.f32.mrf.mxu0  ;;  %v1488_v34 = vpop.f32.mrf.mxu1 }
 0x17a   : > { %2210 = vst.msk [vmem:[%s4288_s25 + $0x3c] sm:$0xf] %vm2194_vm0, %v3439_v27  ;;  %v2744_v36 = vsel %vm2323_vm1, %v2602_v29, 0.0  ;;  %2274 = vst.msk [vmem:[%s4288_s25 + $0x13c] sm:$0xf] %vm2194_vm0, %v3503_v31 }
 0x17b   : > { %v2745_v37 = vadd.f32 %v2744_v36, %v2743_v23  ;;  %v1235_v38 = vpop.f32.mrf.mxu0  ;;  %v4482_v39 = vpop.f32.mrf.mxu1 }
 0x17c   : > { %v3440_v41 = vpack.c.bf16 %v1235_v38, %v1235_v38  ;;  %v2355_v42 = vsel %vm2323_vm1, %v1235_v38, 0.0  ;;  %v2603_v43 = vmul.f32 %v1235_v38, %v1235_v38  ;;  %v3504_v44 = vpack.c.bf16 %v4482_v39, %v4482_v39 }
 0x17d   : > { %v2356_v45 = vadd.f32 %v2355_v42, %v2354_v32  ;;  %v1237_v47 = vpop.f32.mrf.mxu0  ;;  %v1493_v48 = vpop.f32.mrf.mxu1 }
 0x17e   : > { %2211 = vst.msk [vmem:[%s4288_s25 + $0x40] sm:$0xf] %vm2194_vm0, %v3440_v41  ;;  %v2746_v49 = vsel %vm2323_vm1, %v2603_v43, 0.0  ;;  %2275 = vst.msk [vmem:[%s4288_s25 + $0x140] sm:$0xf] %vm2194_vm0, %v3504_v44 }
 0x17f   : > { %v2747_v51 = vadd.f32 %v2746_v49, %v2745_v37  ;;  %v1238_v52 = vpop.f32.mrf.mxu0  ;;  %v4492_v53 = vpop.f32.mrf.mxu1 }
 0x180   : > { %v3441_v54 = vpack.c.bf16 %v1238_v52, %v1238_v52  ;;  %v2357_v56 = vsel %vm2323_vm1, %v1238_v52, 0.0  ;;  %v2604_v57 = vmul.f32 %v1238_v52, %v1238_v52  ;;  %v3505_v58 = vpack.c.bf16 %v4492_v53, %v4492_v53 }
 0x181   : > { %v2358_v59 = vadd.f32 %v2357_v56, %v2356_v45  ;;  %v1240_v62 = vpop.f32.mrf.mxu0  ;;  %v1496_v63 = vpop.f32.mrf.mxu1 }
 0x182   : > { %2212 = vst.msk [vmem:[%s4288_s25 + $0x44] sm:$0xf] %vm2194_vm0, %v3441_v54  ;;  %v2748_v1 = vsel %vm2323_vm1, %v2604_v57, 0.0  ;;  %2276 = vst.msk [vmem:[%s4288_s25 + $0x144] sm:$0xf] %vm2194_vm0, %v3505_v58 }
 0x183   : > { %v2749_v2 = vadd.f32 %v2748_v1, %v2747_v51  ;;  %v1243_v3 = vpop.f32.mrf.mxu0  ;;  %v4502_v4 = vpop.f32.mrf.mxu1 }
 0x184   : > { %v3442_v5 = vpack.c.bf16 %v1243_v3, %v1243_v3  ;;  %v2359_v6 = vsel %vm2323_vm1, %v1243_v3, 0.0  ;;  %v2605_v8 = vmul.f32 %v1243_v3, %v1243_v3  ;;  %v3506_v10 = vpack.c.bf16 %v4502_v4, %v4502_v4 }
 0x185   : > { %v2360_v11 = vadd.f32 %v2359_v6, %v2358_v59  ;;  %v1245_v13 = vpop.f32.mrf.mxu0  ;;  %v1501_v14 = vpop.f32.mrf.mxu1 }
 0x186   : > { %2213 = vst.msk [vmem:[%s4288_s25 + $0x48] sm:$0xf] %vm2194_vm0, %v3442_v5  ;;  %v2750_v15 = vsel %vm2323_vm1, %v2605_v8, 0.0  ;;  %2277 = vst.msk [vmem:[%s4288_s25 + $0x148] sm:$0xf] %vm2194_vm0, %v3506_v10 }
 0x187   : > { %v2751_v17 = vadd.f32 %v2750_v15, %v2749_v2  ;;  %v1246_v18 = vpop.f32.mrf.mxu0  ;;  %v4512_v19 = vpop.f32.mrf.mxu1 }
 0x188   : > { %v3443_v20 = vpack.c.bf16 %v1246_v18, %v1246_v18  ;;  %v2361_v21 = vsel %vm2323_vm1, %v1246_v18, 0.0  ;;  %v2606_v23 = vmul.f32 %v1246_v18, %v1246_v18  ;;  %v3507_v24 = vpack.c.bf16 %v4512_v19, %v4512_v19 }
 0x189   : > { %v2362_v27 = vadd.f32 %v2361_v21, %v2360_v11  ;;  %v1248_v28 = vpop.f32.mrf.mxu0  ;;  %v1504_v29 = vpop.f32.mrf.mxu1 }
 0x18a   : > { %2214 = vst.msk [vmem:[%s4288_s25 + $0x4c] sm:$0xf] %vm2194_vm0, %v3443_v20  ;;  %v2752_v31 = vsel %vm2323_vm1, %v2606_v23, 0.0  ;;  %2278 = vst.msk [vmem:[%s4288_s25 + $0x14c] sm:$0xf] %vm2194_vm0, %v3507_v24 }
 0x18b   : > { %v2753_v32 = vadd.f32 %v2752_v31, %v2751_v17  ;;  %v1251_v33 = vpop.f32.mrf.mxu0  ;;  %v4522_v34 = vpop.f32.mrf.mxu1 }
 0x18c   : > { %v3444_v36 = vpack.c.bf16 %v1251_v33, %v1251_v33  ;;  %v2363_v37 = vsel %vm2323_vm1, %v1251_v33, 0.0  ;;  %v2607_v38 = vmul.f32 %v1251_v33, %v1251_v33  ;;  %v3508_v41 = vpack.c.bf16 %v4522_v34, %v4522_v34 }
 0x18d   : > { %v2364_v42 = vadd.f32 %v2363_v37, %v2362_v27  ;;  %v1253_v43 = vpop.f32.mrf.mxu0  ;;  %v1509_v44 = vpop.f32.mrf.mxu1 }
 0x18e   : > { %2215 = vst.msk [vmem:[%s4288_s25 + $0x50] sm:$0xf] %vm2194_vm0, %v3444_v36  ;;  %v2754_v45 = vsel %vm2323_vm1, %v2607_v38, 0.0  ;;  %2279 = vst.msk [vmem:[%s4288_s25 + $0x150] sm:$0xf] %vm2194_vm0, %v3508_v41 }
 0x18f   : > { %v2755_v47 = vadd.f32 %v2754_v45, %v2753_v32  ;;  %v1254_v48 = vpop.f32.mrf.mxu0  ;;  %v4532_v49 = vpop.f32.mrf.mxu1 }
 0x190   : > { %v3445_v51 = vpack.c.bf16 %v1254_v48, %v1254_v48  ;;  %v2365_v52 = vsel %vm2323_vm1, %v1254_v48, 0.0  ;;  %v2608_v54 = vmul.f32 %v1254_v48, %v1254_v48  ;;  %v3509_v56 = vpack.c.bf16 %v4532_v49, %v4532_v49 }
 0x191   : > { %v2366_v57 = vadd.f32 %v2365_v52, %v2364_v42  ;;  %v1256_v58 = vpop.f32.mrf.mxu0  ;;  %v1512_v59 = vpop.f32.mrf.mxu1 }
 0x192   : > { %2216 = vst.msk [vmem:[%s4288_s25 + $0x54] sm:$0xf] %vm2194_vm0, %v3445_v51  ;;  %v2756_v62 = vsel %vm2323_vm1, %v2608_v54, 0.0  ;;  %2280 = vst.msk [vmem:[%s4288_s25 + $0x154] sm:$0xf] %vm2194_vm0, %v3509_v56 }
 0x193   : > { %v2757_v63 = vadd.f32 %v2756_v62, %v2755_v47  ;;  %v1259_v1 = vpop.f32.mrf.mxu0  ;;  %v4542_v2 = vpop.f32.mrf.mxu1 }
 0x194   : > { %v3446_v3 = vpack.c.bf16 %v1259_v1, %v1259_v1  ;;  %v2367_v5 = vsel %vm2323_vm1, %v1259_v1, 0.0  ;;  %v2609_v6 = vmul.f32 %v1259_v1, %v1259_v1  ;;  %v3510_v8 = vpack.c.bf16 %v4542_v2, %v4542_v2 }
 0x195   : > { %v2368_v10 = vadd.f32 %v2367_v5, %v2366_v57  ;;  %v1261_v11 = vpop.f32.mrf.mxu0  ;;  %v1517_v13 = vpop.f32.mrf.mxu1 }
 0x196   : > { %2217 = vst.msk [vmem:[%s4288_s25 + $0x58] sm:$0xf] %vm2194_vm0, %v3446_v3  ;;  %v2758_v14 = vsel %vm2323_vm1, %v2609_v6, 0.0  ;;  %2281 = vst.msk [vmem:[%s4288_s25 + $0x158] sm:$0xf] %vm2194_vm0, %v3510_v8 }
 0x197   : > { %v2759_v15 = vadd.f32 %v2758_v14, %v2757_v63  ;;  %v1262_v17 = vpop.f32.mrf.mxu0  ;;  %v4552_v18 = vpop.f32.mrf.mxu1 }
 0x198   : > { %v3447_v20 = vpack.c.bf16 %v1262_v17, %v1262_v17  ;;  %v2369_v21 = vsel %vm2323_vm1, %v1262_v17, 0.0  ;;  %v2610_v23 = vmul.f32 %v1262_v17, %v1262_v17  ;;  %v3511_v24 = vpack.c.bf16 %v4552_v18, %v4552_v18 }
 0x199   : > { %v2370_v27 = vadd.f32 %v2369_v21, %v2368_v10  ;;  %v1264_v28 = vpop.f32.mrf.mxu0  ;;  %v1520_v29 = vpop.f32.mrf.mxu1 }
 0x19a   : > { %2218 = vst.msk [vmem:[%s4288_s25 + $0x5c] sm:$0xf] %vm2194_vm0, %v3447_v20  ;;  %v2760_v31 = vsel %vm2323_vm1, %v2610_v23, 0.0  ;;  %2282 = vst.msk [vmem:[%s4288_s25 + $0x15c] sm:$0xf] %vm2194_vm0, %v3511_v24 }
 0x19b   : > { %v2761_v32 = vadd.f32 %v2760_v31, %v2759_v15  ;;  %v1267_v33 = vpop.f32.mrf.mxu0  ;;  %v4562_v36 = vpop.f32.mrf.mxu1 }
 0x19c   : > { %v3448_v37 = vpack.c.bf16 %v1267_v33, %v1267_v33  ;;  %v2371_v38 = vsel %vm2323_vm1, %v1267_v33, 0.0  ;;  %v2611_v41 = vmul.f32 %v1267_v33, %v1267_v33  ;;  %v3512_v42 = vpack.c.bf16 %v4562_v36, %v4562_v36 }
 0x19d   : > { %v2372_v43 = vadd.f32 %v2371_v38, %v2370_v27  ;;  %v1269_v44 = vpop.f32.mrf.mxu0  ;;  %v1525_v45 = vpop.f32.mrf.mxu1 }
 0x19e   : > { %2219 = vst.msk [vmem:[%s4288_s25 + $0x60] sm:$0xf] %vm2194_vm0, %v3448_v37  ;;  %v2762_v47 = vsel %vm2323_vm1, %v2611_v41, 0.0  ;;  %2283 = vst.msk [vmem:[%s4288_s25 + $0x160] sm:$0xf] %vm2194_vm0, %v3512_v42 }
 0x19f   : > { %v2763_v48 = vadd.f32 %v2762_v47, %v2761_v32  ;;  %v1270_v51 = vpop.f32.mrf.mxu0  ;;  %v4572_v52 = vpop.f32.mrf.mxu1 }
 0x1a0   : > { %v3449_v54 = vpack.c.bf16 %v1270_v51, %v1270_v51  ;;  %v2373_v56 = vsel %vm2323_vm1, %v1270_v51, 0.0  ;;  %v2612_v57 = vmul.f32 %v1270_v51, %v1270_v51  ;;  %v3513_v58 = vpack.c.bf16 %v4572_v52, %v4572_v52 }
 0x1a1   : > { %v2374_v59 = vadd.f32 %v2373_v56, %v2372_v43  ;;  %v1272_v62 = vpop.f32.mrf.mxu0  ;;  %v1528_v63 = vpop.f32.mrf.mxu1 }
 0x1a2   : > { %2220 = vst.msk [vmem:[%s4288_s25 + $0x64] sm:$0xf] %vm2194_vm0, %v3449_v54  ;;  %v2764_v1 = vsel %vm2323_vm1, %v2612_v57, 0.0  ;;  %2284 = vst.msk [vmem:[%s4288_s25 + $0x164] sm:$0xf] %vm2194_vm0, %v3513_v58 }
 0x1a3   : > { %v2765_v3 = vadd.f32 %v2764_v1, %v2763_v48  ;;  %v1275_v5 = vpop.f32.mrf.mxu0  ;;  %v4582_v6 = vpop.f32.mrf.mxu1 }
 0x1a4   : > { %v3450_v8 = vpack.c.bf16 %v1275_v5, %v1275_v5  ;;  %v2375_v10 = vsel %vm2323_vm1, %v1275_v5, 0.0  ;;  %v2613_v11 = vmul.f32 %v1275_v5, %v1275_v5  ;;  %v3514_v13 = vpack.c.bf16 %v4582_v6, %v4582_v6 }
 0x1a5   : > { %v2376_v14 = vadd.f32 %v2375_v10, %v2374_v59  ;;  %v1277_v15 = vpop.f32.mrf.mxu0  ;;  %v1533_v17 = vpop.f32.mrf.mxu1 }
 0x1a6   : > { %2221 = vst.msk [vmem:[%s4288_s25 + $0x68] sm:$0xf] %vm2194_vm0, %v3450_v8  ;;  %v2766_v20 = vsel %vm2323_vm1, %v2613_v11, 0.0  ;;  %2285 = vst.msk [vmem:[%s4288_s25 + $0x168] sm:$0xf] %vm2194_vm0, %v3514_v13 }
 0x1a7   : > { %v2767_v21 = vadd.f32 %v2766_v20, %v2765_v3  ;;  %v1278_v23 = vpop.f32.mrf.mxu0  ;;  %v4592_v24 = vpop.f32.mrf.mxu1 }
 0x1a8   : > { %v3451_v27 = vpack.c.bf16 %v1278_v23, %v1278_v23  ;;  %v2377_v28 = vsel %vm2323_vm1, %v1278_v23, 0.0  ;;  %v2614_v29 = vmul.f32 %v1278_v23, %v1278_v23  ;;  %v3515_v31 = vpack.c.bf16 %v4592_v24, %v4592_v24 }
 0x1a9   : > { %v2378_v32 = vadd.f32 %v2377_v28, %v2376_v14  ;;  %v1280_v33 = vpop.f32.mrf.mxu0  ;;  %v1536_v37 = vpop.f32.mrf.mxu1 }
 0x1aa   : > { %2222 = vst.msk [vmem:[%s4288_s25 + $0x6c] sm:$0xf] %vm2194_vm0, %v3451_v27  ;;  %v2768_v38 = vsel %vm2323_vm1, %v2614_v29, 0.0  ;;  %2286 = vst.msk [vmem:[%s4288_s25 + $0x16c] sm:$0xf] %vm2194_vm0, %v3515_v31 }
 0x1ab   : > { %v2769_v41 = vadd.f32 %v2768_v38, %v2767_v21  ;;  %v1283_v42 = vpop.f32.mrf.mxu0  ;;  %v4602_v43 = vpop.f32.mrf.mxu1 }
 0x1ac   : > { %v3452_v44 = vpack.c.bf16 %v1283_v42, %v1283_v42  ;;  %v2379_v45 = vsel %vm2323_vm1, %v1283_v42, 0.0  ;;  %v2615_v47 = vmul.f32 %v1283_v42, %v1283_v42  ;;  %v3516_v48 = vpack.c.bf16 %v4602_v43, %v4602_v43 }
 0x1ad   : > { %v2380_v51 = vadd.f32 %v2379_v45, %v2378_v32  ;;  %v1285_v54 = vpop.f32.mrf.mxu0  ;;  %v1541_v56 = vpop.f32.mrf.mxu1 }
 0x1ae   : > { %2223 = vst.msk [vmem:[%s4288_s25 + $0x70] sm:$0xf] %vm2194_vm0, %v3452_v44  ;;  %v2770_v57 = vsel %vm2323_vm1, %v2615_v47, 0.0  ;;  %2287 = vst.msk [vmem:[%s4288_s25 + $0x170] sm:$0xf] %vm2194_vm0, %v3516_v48 }
 0x1af   : > { %v2771_v58 = vadd.f32 %v2770_v57, %v2769_v41  ;;  %v1286_v59 = vpop.f32.mrf.mxu0  ;;  %v4612_v62 = vpop.f32.mrf.mxu1 }
 0x1b0   : > { %v3453_v63 = vpack.c.bf16 %v1286_v59, %v1286_v59  ;;  %v2381_v1 = vsel %vm2323_vm1, %v1286_v59, 0.0  ;;  %v2616_v3 = vmul.f32 %v1286_v59, %v1286_v59  ;;  %v3517_v5 = vpack.c.bf16 %v4612_v62, %v4612_v62 }
 0x1b1   : > { %v2382_v8 = vadd.f32 %v2381_v1, %v2380_v51  ;;  %v1288_v10 = vpop.f32.mrf.mxu0  ;;  %v1544_v11 = vpop.f32.mrf.mxu1 }
 0x1b2   : > { %2224 = vst.msk [vmem:[%s4288_s25 + $0x74] sm:$0xf] %vm2194_vm0, %v3453_v63  ;;  %v2772_v13 = vsel %vm2323_vm1, %v2616_v3, 0.0  ;;  %2288 = vst.msk [vmem:[%s4288_s25 + $0x174] sm:$0xf] %vm2194_vm0, %v3517_v5 }
 0x1b3   : > { %v2773_v14 = vadd.f32 %v2772_v13, %v2771_v58  ;;  %v1291_v15 = vpop.f32.mrf.mxu0  ;;  %v4622_v17 = vpop.f32.mrf.mxu1 }
 0x1b4   : > { %v3454_v20 = vpack.c.bf16 %v1291_v15, %v1291_v15  ;;  %v2383_v21 = vsel %vm2323_vm1, %v1291_v15, 0.0  ;;  %v2617_v23 = vmul.f32 %v1291_v15, %v1291_v15  ;;  %v3518_v27 = vpack.c.bf16 %v4622_v17, %v4622_v17 }
 0x1b5   : > { %v2384_v28 = vadd.f32 %v2383_v21, %v2382_v8  ;;  %v1293_v29 = vpop.f32.mrf.mxu0  ;;  %v1549_v31 = vpop.f32.mrf.mxu1 }
 0x1b6   : > { %2225 = vst.msk [vmem:[%s4288_s25 + $0x78] sm:$0xf] %vm2194_vm0, %v3454_v20  ;;  %v2774_v32 = vsel %vm2323_vm1, %v2617_v23, 0.0  ;;  %2289 = vst.msk [vmem:[%s4288_s25 + $0x178] sm:$0xf] %vm2194_vm0, %v3518_v27 }
 0x1b7   : > { %v2775_v33 = vadd.f32 %v2774_v32, %v2773_v14  ;;  %v1294_v37 = vpop.f32.mrf.mxu0  ;;  %v4632_v38 = vpop.f32.mrf.mxu1 }
 0x1b8   : > { %5594 = vst [vmem:[#allocation11_spill] sm:$0xff] %v4632_v38  ;;  %v3455_v41 = vpack.c.bf16 %v1294_v37, %v1294_v37  ;;  %v2385_v42 = vsel %vm2323_vm1, %v1294_v37, 0.0  ;;  %v2618_v44 = vmul.f32 %v1294_v37, %v1294_v37  ;;  %v3519_v45 = vpack.c.bf16 %v4632_v38, %v4632_v38 }
 0x1b9   : > { %v4637_v47 = vadd.f32 %v2385_v42, %v2384_v28  ;;  %v1296_v48 = vpop.f32.mrf.mxu0  ;;  %v1552_v51 = vpop.f32.mrf.mxu1 }
 0x1ba   : > { %2226 = vst.msk [vmem:[%s4288_s25 + $0x7c] sm:$0xf] %vm2194_vm0, %v3455_v41  ;;  %v2776_v54 = vsel %vm2323_vm1, %v2618_v44, 0.0  ;;  %2290 = vst.msk [vmem:[%s4288_s25 + $0x17c] sm:$0xf] %vm2194_vm0, %v3519_v45 }
 0x1bb   : > { %v4644_v56 = vadd.f32 %v2776_v54, %v2775_v33  ;;  %v4646_v57 = vpop.f32.mrf.mxu0  ;;  %v4648_v58 = vpop.f32.mrf.mxu1 }
 0x1bc   : > { %5595 = vst [vmem:[#allocation12_spill] sm:$0xff] %v4648_v58  ;;  %v3456_v59 = vpack.c.bf16 %v4646_v57, %v4646_v57  ;;  %v3520_v63 = vpack.c.bf16 %v4648_v58, %v4648_v58 }
 0x1bd   : > { %v1301_v1 = vpop.f32.mrf.mxu0  ;;  %v1557_v3 = vpop.f32.mrf.mxu1 }
 0x1be   : > { %2227 = vst.msk [vmem:[%s4288_s25 + $0x80] sm:$0xf] %vm2194_vm0, %v3456_v59  ;;  %2291 = vst.msk [vmem:[%s4288_s25 + $0x180] sm:$0xf] %vm2194_vm0, %v3520_v63 }
 0x1bf   : > { %v4658_v5 = vpop.f32.mrf.mxu0  ;;  %v4660_v8 = vpop.f32.mrf.mxu1 }
 0x1c0   : > { %5596 = vst [vmem:[#allocation13_spill] sm:$0xff] %v4660_v8  ;;  %v3457_v10 = vpack.c.bf16 %v4658_v5, %v4658_v5  ;;  %v3521_v11 = vpack.c.bf16 %v4660_v8, %v4660_v8 }
 0x1c1   : > { %v1304_v13 = vpop.f32.mrf.mxu0  ;;  %v1560_v14 = vpop.f32.mrf.mxu1 }
 0x1c2   : > { %2228 = vst.msk [vmem:[%s4288_s25 + $0x84] sm:$0xf] %vm2194_vm0, %v3457_v10  ;;  %2292 = vst.msk [vmem:[%s4288_s25 + $0x184] sm:$0xf] %vm2194_vm0, %v3521_v11 }
 0x1c3   : > { %v4670_v15 = vpop.f32.mrf.mxu0  ;;  %v4672_v20 = vpop.f32.mrf.mxu1 }
 0x1c4   : > { %5597 = vst [vmem:[#allocation14_spill] sm:$0xff] %v4672_v20  ;;  %v3458_v21 = vpack.c.bf16 %v4670_v15, %v4670_v15  ;;  %v3522_v23 = vpack.c.bf16 %v4672_v20, %v4672_v20 }
 0x1c5   : > { %v1309_v27 = vpop.f32.mrf.mxu0  ;;  %v1565_v28 = vpop.f32.mrf.mxu1 }
 0x1c6   : > { %2229 = vst.msk [vmem:[%s4288_s25 + $0x88] sm:$0xf] %vm2194_vm0, %v3458_v21  ;;  %2293 = vst.msk [vmem:[%s4288_s25 + $0x188] sm:$0xf] %vm2194_vm0, %v3522_v23 }
 0x1c7   : > { %v4682_v29 = vpop.f32.mrf.mxu0  ;;  %v4684_v31 = vpop.f32.mrf.mxu1 }
 0x1c8   : > { %5598 = vst [vmem:[#allocation15_spill] sm:$0xff] %v4684_v31  ;;  %v3459_v32 = vpack.c.bf16 %v4682_v29, %v4682_v29  ;;  %v3523_v33 = vpack.c.bf16 %v4684_v31, %v4684_v31  ;;  %v2621_v31 = vmul.f32 %v4670_v15, %v4670_v15  ;;  %v2393_v38 = vsel %vm2323_vm1, %v4682_v29, 0.0 }
 0x1c9   : > { %v1312_v37 = vpop.f32.mrf.mxu0  ;;  %v1568_v41 = vpop.f32.mrf.mxu1 }
 0x1ca   : > { %2230 = vst.msk [vmem:[%s4288_s25 + $0x8c] sm:$0xf] %vm2194_vm0, %v3459_v32  ;;  %2294 = vst.msk [vmem:[%s4288_s25 + $0x18c] sm:$0xf] %vm2194_vm0, %v3523_v33  ;;  %v2782_v58 = vsel %vm2323_vm1, %v2621_v31, 0.0 }
 0x1cb   : > { %v4694_v42 = vpop.f32.mrf.mxu0  ;;  %v4696_v44 = vpop.f32.mrf.mxu1 }
 0x1cc   : > { %5599 = vst [vmem:[#allocation16_spill] sm:$0xff] %v4696_v44  ;;  %v3460_v45 = vpack.c.bf16 %v4694_v42, %v4694_v42  ;;  %v3524_v48 = vpack.c.bf16 %v4696_v44, %v4696_v44  ;;  %v2389_v44 = vsel %vm2323_vm1, %v4658_v5, 0.0 }
 0x1cd   : > { %v1317_v51 = vpop.f32.mrf.mxu0  ;;  %v1573_v54 = vpop.f32.mrf.mxu1 }
 0x1ce   : > { %2231 = vst.msk [vmem:[%s4288_s25 + $0x90] sm:$0xf] %vm2194_vm0, %v3460_v45  ;;  %2295 = vst.msk [vmem:[%s4288_s25 + $0x190] sm:$0xf] %vm2194_vm0, %v3524_v48 }
 0x1cf   : > { %v4706_v59 = vpop.f32.mrf.mxu0  ;;  %v4708_v63 = vpop.f32.mrf.mxu1 }
 0x1d0   : > { %5600 = vst [vmem:[#allocation17_spill] sm:$0xff] %v4708_v63  ;;  %v3461_v1 = vpack.c.bf16 %v4706_v59, %v4706_v59  ;;  %v3525_v3 = vpack.c.bf16 %v4708_v63, %v4708_v63  ;;  %v2624_v31 = vmul.f32 %v4706_v59, %v4706_v59 }
 0x1d1   : > { %v1320_v10 = vpop.f32.mrf.mxu0  ;;  %v1576_v11 = vpop.f32.mrf.mxu1 }
 0x1d2   : > { %2232 = vst.msk [vmem:[%s4288_s25 + $0x94] sm:$0xf] %vm2194_vm0, %v3461_v1  ;;  %2296 = vst.msk [vmem:[%s4288_s25 + $0x194] sm:$0xf] %vm2194_vm0, %v3525_v3 }
 0x1d3   : > { %v4718_v13 = vpop.f32.mrf.mxu0  ;;  %v4720_v14 = vpop.f32.mrf.mxu1 }
 0x1d4   : > { %5601 = vst [vmem:[#allocation18_spill] sm:$0xff] %v4720_v14  ;;  %v3462_v21 = vpack.c.bf16 %v4718_v13, %v4718_v13  ;;  %v3526_v23 = vpack.c.bf16 %v4720_v14, %v4720_v14 }
 0x1d5   : > { %v1325_v27 = vpop.f32.mrf.mxu0  ;;  %v1581_v28 = vpop.f32.mrf.mxu1 }
 0x1d6   : > { %2233 = vst.msk [vmem:[%s4288_s25 + $0x98] sm:$0xf] %vm2194_vm0, %v3462_v21  ;;  %2297 = vst.msk [vmem:[%s4288_s25 + $0x198] sm:$0xf] %vm2194_vm0, %v3526_v23 }
 0x1d7   : > { %v4730_v32 = vpop.f32.mrf.mxu0  ;;  %v4732_v33 = vpop.f32.mrf.mxu1 }
 0x1d8   : > { %5602 = vst [vmem:[#allocation19_spill] sm:$0xff] %v4732_v33  ;;  %v3463_v37 = vpack.c.bf16 %v4730_v32, %v4730_v32  ;;  %v3527_v41 = vpack.c.bf16 %v4732_v33, %v4732_v33 }
 0x1d9   : > { %v1328_v45 = vpop.f32.mrf.mxu0  ;;  %v1584_v48 = vpop.f32.mrf.mxu1 }
 0x1da   : > { %2234 = vst.msk [vmem:[%s4288_s25 + $0x9c] sm:$0xf] %vm2194_vm0, %v3463_v37  ;;  %2298 = vst.msk [vmem:[%s4288_s25 + $0x19c] sm:$0xf] %vm2194_vm0, %v3527_v41 }
 0x1db   : > { %v4742_v51 = vpop.f32.mrf.mxu0  ;;  %v4744_v54 = vpop.f32.mrf.mxu1 }
 0x1dc   : > { %5603 = vst [vmem:[#allocation20_spill] sm:$0xff] %v4744_v54  ;;  %v3464_v1 = vpack.c.bf16 %v4742_v51, %v4742_v51  ;;  %v3528_v3 = vpack.c.bf16 %v4744_v54, %v4744_v54 }
 0x1dd   : > { %v1333_v10 = vpop.f32.mrf.mxu0  ;;  %v1589_v11 = vpop.f32.mrf.mxu1 }
 0x1de   : > { %2235 = vst.msk [vmem:[%s4288_s25 + $0xa0] sm:$0xf] %vm2194_vm0, %v3464_v1  ;;  %2299 = vst.msk [vmem:[%s4288_s25 + $0x1a0] sm:$0xf] %vm2194_vm0, %v3528_v3 }
 0x1df   : > { %v4754_v21 = vpop.f32.mrf.mxu0  ;;  %v4756_v23 = vpop.f32.mrf.mxu1 }
 0x1e0   : > { %5604 = vst [vmem:[#allocation21_spill] sm:$0xff] %v4756_v23  ;;  %v3465_v27 = vpack.c.bf16 %v4754_v21, %v4754_v21  ;;  %v3529_v28 = vpack.c.bf16 %v4756_v23, %v4756_v23 }
 0x1e1   : > { %v1336_v37 = vpop.f32.mrf.mxu0  ;;  %v1592_v41 = vpop.f32.mrf.mxu1 }
 0x1e2   : > { %2236 = vst.msk [vmem:[%s4288_s25 + $0xa4] sm:$0xf] %vm2194_vm0, %v3465_v27  ;;  %2300 = vst.msk [vmem:[%s4288_s25 + $0x1a4] sm:$0xf] %vm2194_vm0, %v3529_v28 }
 0x1e3   : > { %v4766_v45 = vpop.f32.mrf.mxu0  ;;  %v4768_v48 = vpop.f32.mrf.mxu1 }
 0x1e4   : > { %5605 = vst [vmem:[#allocation22_spill] sm:$0xff] %v4768_v48  ;;  %v3466_v1 = vpack.c.bf16 %v4766_v45, %v4766_v45  ;;  %v3530_v3 = vpack.c.bf16 %v4768_v48, %v4768_v48 }
 0x1e5   : > { %v1341_v10 = vpop.f32.mrf.mxu0  ;;  %v1597_v11 = vpop.f32.mrf.mxu1 }
 0x1e6   : > { %2237 = vst.msk [vmem:[%s4288_s25 + $0xa8] sm:$0xf] %vm2194_vm0, %v3466_v1  ;;  %2301 = vst.msk [vmem:[%s4288_s25 + $0x1a8] sm:$0xf] %vm2194_vm0, %v3530_v3 }
 0x1e7   : > { %v4778_v27 = vpop.f32.mrf.mxu0  ;;  %v4780_v28 = vpop.f32.mrf.mxu1 }
 0x1e8   : > { %5606 = vst [vmem:[#allocation23_spill] sm:$0xff] %v4780_v28  ;;  %v3467_v37 = vpack.c.bf16 %v4778_v27, %v4778_v27  ;;  %v3531_v41 = vpack.c.bf16 %v4780_v28, %v4780_v28 }
 0x1e9   : > { %v1344_v23 = vpop.f32.mrf.mxu0  ;;  %v1600_v48 = vpop.f32.mrf.mxu1 }
 0x1ea   : > { %2238 = vst.msk [vmem:[%s4288_s25 + $0xac] sm:$0xf] %vm2194_vm0, %v3467_v37  ;;  %2302 = vst.msk [vmem:[%s4288_s25 + $0x1ac] sm:$0xf] %vm2194_vm0, %v3531_v41 }
 0x1eb   : > { %v4790_v1 = vpop.f32.mrf.mxu0  ;;  %v4792_v3 = vpop.f32.mrf.mxu1 }
 0x1ec   : > { %5607 = vst [vmem:[#allocation24_spill] sm:$0xff] %v4792_v3  ;;  %v3468_v10 = vpack.c.bf16 %v4790_v1, %v4790_v1  ;;  %v3532_v11 = vpack.c.bf16 %v4792_v3, %v4792_v3 }
 0x1ed   : > { %v1349_v54 = vpop.f32.mrf.mxu0  ;;  %v1605_v28 = vpop.f32.mrf.mxu1 }
 0x1ee   : > { %2239 = vst.msk [vmem:[%s4288_s25 + $0xb0] sm:$0xf] %vm2194_vm0, %v3468_v10  ;;  %2303 = vst.msk [vmem:[%s4288_s25 + $0x1b0] sm:$0xf] %vm2194_vm0, %v3532_v11 }
 0x1ef   : > { %v4802_v23 = vpop.f32.mrf.mxu0  ;;  %v4804_v48 = vpop.f32.mrf.mxu1 }
 0x1f0   : > { %5608 = vst [vmem:[#allocation25_spill] sm:$0xff] %v4804_v48  ;;  %v3469_v37 = vpack.c.bf16 %v4802_v23, %v4802_v23  ;;  %v3533_v41 = vpack.c.bf16 %v4804_v48, %v4804_v48 }
 0x1f1   : > { %v1352_v33 = vpop.f32.mrf.mxu0  ;;  %v1608_v3 = vpop.f32.mrf.mxu1 }
 0x1f2   : > { %2240 = vst.msk [vmem:[%s4288_s25 + $0xb4] sm:$0xf] %vm2194_vm0, %v3469_v37  ;;  %2304 = vst.msk [vmem:[%s4288_s25 + $0x1b4] sm:$0xf] %vm2194_vm0, %v3533_v41  ;;  %v2619_v33 = vmul.f32 %v4646_v57, %v4646_v57  ;;  %v2387_v41 = vsel %vm2323_vm1, %v4646_v57, 0.0 }
 0x1f3   : > { %v4814_v54 = vpop.f32.mrf.mxu0  ;;  %v4816_v28 = vpop.f32.mrf.mxu1  ;;  %v2388_v57 = vadd.f32 %v2387_v41, %v4637_v47 }
 0x1f4   : > { %5609 = vst [vmem:[#allocation26_spill] sm:$0xff] %v4816_v28  ;;  %v3470_v10 = vpack.c.bf16 %v4814_v54, %v4814_v54  ;;  %v3534_v11 = vpack.c.bf16 %v4816_v28, %v4816_v28 }
 0x1f5   : > { %v1357_v14 = vpop.f32.mrf.mxu0  ;;  %v1613_v63 = vpop.f32.mrf.mxu1  ;;  %v2390_v41 = vadd.f32 %v2389_v44, %v2388_v57 }
 0x1f6   : > { %2241 = vst.msk [vmem:[%s4288_s25 + $0xb8] sm:$0xf] %vm2194_vm0, %v3470_v10  ;;  %2305 = vst.msk [vmem:[%s4288_s25 + $0x1b8] sm:$0xf] %vm2194_vm0, %v3534_v11  ;;  %v2620_v14 = vmul.f32 %v4658_v5, %v4658_v5  ;;  %v2778_v11 = vsel %vm2323_vm1, %v2619_v33, 0.0 }
 0x1f7   : > { %v4828_v3 = vpop.f32.mrf.mxu0  ;;  %v4830_v37 = vpop.f32.mrf.mxu1  ;;  %v2779_v47 = vadd.f32 %v2778_v11, %v4644_v56 }
 0x1f8   : > { %5610 = vst [vmem:[#allocation27_spill] sm:$0xff] %v4830_v37  ;;  %v3471_v63 = vpack.c.bf16 %v4828_v3, %v4828_v3  ;;  %v3535_v28 = vpack.c.bf16 %v4830_v37, %v4830_v37  ;;  %v2780_v5 = vsel %vm2323_vm1, %v2620_v14, 0.0  ;;  %v2391_v37 = vsel %vm2323_vm1, %v4670_v15, 0.0 }
 0x1f9   : > { %v1360_v48 = vpop.f32.mrf.mxu0  ;;  %v1616_v10 = vpop.f32.mrf.mxu1  ;;  %v2623_v14 = vmul.f32 %v4694_v42, %v4694_v42  ;;  %v2781_v15 = vadd.f32 %v2780_v5, %v2779_v47 }
 0x1fa   : > { %2242 = vst.msk [vmem:[%s4288_s25 + $0xbc] sm:$0xf] %vm2194_vm0, %v3471_v63  ;;  %2306 = vst.msk [vmem:[%s4288_s25 + $0x1bc] sm:$0xf] %vm2194_vm0, %v3535_v28  ;;  %v2622_v48 = vmul.f32 %v4682_v29, %v4682_v29  ;;  %v2395_v29 = vsel %vm2323_vm1, %v4694_v42, 0.0  ;;  %v2625_v42 = vmul.f32 %v4718_v13, %v4718_v13 }
 0x1fb   : > { %v4852_v10 = vpop.f32.mrf.mxu0  ;;  %v4854_v33 = vpop.f32.mrf.mxu1 }
 0x1fc   : > { %5611 = vst [vmem:[#allocation28_spill] sm:$0xff] %v4854_v33  ;;  %v3472_v63 = vpack.c.bf16 %v4852_v10, %v4852_v10  ;;  %v3536_v28 = vpack.c.bf16 %v4854_v33, %v4854_v33  ;;  %v2392_v33 = vadd.f32 %v2391_v37, %v2390_v41  ;;  %v2784_v56 = vsel %vm2323_vm1, %v2622_v48, 0.0 }
 0x1fd   : > { %v1365_v20 = vpop.f32.mrf.mxu0  ;;  %v1621_v8 = vpop.f32.mrf.mxu1  ;;  %v2783_v37 = vadd.f32 %v2782_v58, %v2781_v15 }
 0x1fe   : > { %2243 = vst.msk [vmem:[%s4288_s25 + $0xc0] sm:$0xf] %vm2194_vm0, %v3472_v63  ;;  %2307 = vst.msk [vmem:[%s4288_s25 + $0x1c0] sm:$0xf] %vm2194_vm0, %v3536_v28  ;;  %v2394_v57 = vadd.f32 %v2393_v38, %v2392_v33  ;;  %v2786_v63 = vsel %vm2323_vm1, %v2623_v14, 0.0  ;;  %v2397_v28 = vsel %vm2323_vm1, %v4706_v59, 0.0  ;;  %v2626_v38 = vmul.f32 %v4730_v32, %v4730_v32 }
 0x1ff   : > { %v4874_v20 = vpop.f32.mrf.mxu0  ;;  %v4876_v8 = vpop.f32.mrf.mxu1  ;;  %v2785_v47 = vadd.f32 %v2784_v56, %v2783_v37  ;;  %v2788_v59 = vsel %vm2323_vm1, %v2624_v31, 0.0  ;;  %v2399_v14 = vsel %vm2323_vm1, %v4718_v13, 0.0  ;;  %v2627_v31 = vmul.f32 %v4742_v51, %v4742_v51 }
 0x200   : > { %v3473_v44 = vpack.c.bf16 %v4874_v20, %v4874_v20  ;;  %v3537_v11 = vpack.c.bf16 %v4876_v8, %v4876_v8  ;;  %v2396_v41 = vadd.f32 %v2395_v29, %v2394_v57  ;;  %v2790_v57 = vsel %vm2323_vm1, %v2625_v42, 0.0 }
 0x201   : > { %v1368_v5 = vpop.f32.mrf.mxu0  ;;  %v1624_v48 = vpop.f32.mrf.mxu1  ;;  %v2787_v29 = vadd.f32 %v2786_v63, %v2785_v47  ;;  %v2792_v63 = vsel %vm2323_vm1, %v2626_v38, 0.0  ;;  %v2628_v42 = vmul.f32 %v4754_v21, %v4754_v21 }
 0x202   : > { %2244 = vst.msk [vmem:[%s4288_s25 + $0xc4] sm:$0xf] %vm2194_vm0, %v3473_v44  ;;  %2308 = vst.msk [vmem:[%s4288_s25 + $0x1c4] sm:$0xf] %vm2194_vm0, %v3537_v11  ;;  %v2398_v44 = vadd.f32 %v2397_v28, %v2396_v41  ;;  %v2401_v5 = vsel %vm2323_vm1, %v4730_v32, 0.0  ;;  %v2403_v32 = vsel %vm2323_vm1, %v4742_v51, 0.0  ;;  %v2629_v51 = vmul.f32 %v4766_v45, %v4766_v45 }
 0x203   : > { %v4897_v58 = vpop.f32.mrf.mxu0  ;;  %v4899_v33 = vpop.f32.mrf.mxu1  ;;  %v2789_v13 = vadd.f32 %v2788_v59, %v2787_v29  ;;  %v2794_v29 = vsel %vm2323_vm1, %v2627_v31, 0.0 }
 0x204   : > { %v3474_v15 = vpack.c.bf16 %v4897_v58, %v4897_v58  ;;  %v3538_v56 = vpack.c.bf16 %v4899_v33, %v4899_v33  ;;  %v2400_v48 = vadd.f32 %v2399_v14, %v2398_v44  ;;  %v2405_v44 = vsel %vm2323_vm1, %v4754_v21, 0.0 }
 0x205   : > { %v1373_v11 = vpop.f32.mrf.mxu0  ;;  %v1629_v37 = vpop.f32.mrf.mxu1  ;;  %v2791_v14 = vadd.f32 %v2790_v57, %v2789_v13  ;;  %v2630_v57 = vmul.f32 %v4778_v27, %v4778_v27  ;;  %v2796_v21 = vsel %vm2323_vm1, %v2628_v42, 0.0  ;;  %v2407_v13 = vsel %vm2323_vm1, %v4766_v45, 0.0 }
 0x206   : > { %2245 = vst.msk [vmem:[%s4288_s25 + $0xc8] sm:$0xf] %vm2194_vm0, %v3474_v15  ;;  %2309 = vst.msk [vmem:[%s4288_s25 + $0x1c8] sm:$0xf] %vm2194_vm0, %v3538_v56  ;;  %v2402_v15 = vadd.f32 %v2401_v5, %v2400_v48  ;;  %v2631_v42 = vmul.f32 %v4790_v1, %v4790_v1 }
 0x207   : > { %v4918_v28 = vpop.f32.mrf.mxu0  ;;  %v4920_v47 = vpop.f32.mrf.mxu1  ;;  %v2793_v11 = vadd.f32 %v2792_v63, %v2791_v14 }
 0x208   : > { %v3475_v41 = vpack.c.bf16 %v4918_v28, %v4918_v28  ;;  %v3539_v59 = vpack.c.bf16 %v4920_v47, %v4920_v47  ;;  %v2404_v37 = vadd.f32 %v2403_v32, %v2402_v15  ;;  %v2798_v15 = vsel %vm2323_vm1, %v2629_v51, 0.0 }
 0x209   : > { %v1376_v56 = vpop.f32.mrf.mxu0  ;;  %v1632_v38 = vpop.f32.mrf.mxu1  ;;  %v2795_v32 = vadd.f32 %v2794_v29, %v2793_v11  ;;  %v2800_v29 = vsel %vm2323_vm1, %v2630_v57, 0.0  ;;  %v2632_v51 = vmul.f32 %v4802_v23, %v4802_v23 }
 0x20a   : > { %2246 = vst.msk [vmem:[%s4288_s25 + $0xcc] sm:$0xf] %vm2194_vm0, %v3475_v41  ;;  %2310 = vst.msk [vmem:[%s4288_s25 + $0x1cc] sm:$0xf] %vm2194_vm0, %v3539_v59  ;;  %v2406_v41 = vadd.f32 %v2405_v44, %v2404_v37  ;;  %v2409_v56 = vsel %vm2323_vm1, %v4778_v27, 0.0  ;;  %v2411_v27 = vsel %vm2323_vm1, %v4790_v1, 0.0  ;;  %v2633_v1 = vmul.f32 %v4814_v54, %v4814_v54 }
 0x20b   : > { %v4941_v5 = vpop.f32.mrf.mxu0  ;;  %v4943_v31 = vpop.f32.mrf.mxu1  ;;  %v2797_v45 = vadd.f32 %v2796_v21, %v2795_v32  ;;  %v2802_v32 = vsel %vm2323_vm1, %v2631_v42, 0.0 }
 0x20c   : > { %v3476_v48 = vpack.c.bf16 %v4941_v5, %v4941_v5  ;;  %v3540_v63 = vpack.c.bf16 %v4943_v31, %v4943_v31  ;;  %v2408_v38 = vadd.f32 %v2407_v13, %v2406_v41  ;;  %v2413_v41 = vsel %vm2323_vm1, %v4802_v23, 0.0 }
 0x20d   : > { %v1381_v59 = vpop.f32.mrf.mxu0  ;;  %v1637_v14 = vpop.f32.mrf.mxu1  ;;  %v2799_v13 = vadd.f32 %v2798_v15, %v2797_v45  ;;  %v2634_v15 = vmul.f32 %v4828_v3, %v4828_v3  ;;  %v2804_v23 = vsel %vm2323_vm1, %v2632_v51, 0.0  ;;  %v2415_v45 = vsel %vm2323_vm1, %v4814_v54, 0.0 }
 0x20e   : > { %2247 = vst.msk [vmem:[%s4288_s25 + $0xd0] sm:$0xf] %vm2194_vm0, %v3476_v48  ;;  %2311 = vst.msk [vmem:[%s4288_s25 + $0x1d0] sm:$0xf] %vm2194_vm0, %v3540_v63  ;;  %v2410_v48 = vadd.f32 %v2409_v56, %v2408_v38  ;;  %v2635_v51 = vmul.f32 %v4852_v10, %v4852_v10 }
 0x20f   : > { %v4962_v44 = vpop.f32.mrf.mxu0  ;;  %v4964_v11 = vpop.f32.mrf.mxu1  ;;  %v2801_v59 = vadd.f32 %v2800_v29, %v2799_v13 }
 0x210   : > { %v3477_v37 = vpack.c.bf16 %v4962_v44, %v4962_v44  ;;  %v3541_v21 = vpack.c.bf16 %v4964_v11, %v4964_v11  ;;  %v2412_v14 = vadd.f32 %v2411_v27, %v2410_v48  ;;  %v2806_v48 = vsel %vm2323_vm1, %v2633_v1, 0.0 }
 0x211   : > { %v1384_v63 = vpop.f32.mrf.mxu0  ;;  %v1640_v57 = vpop.f32.mrf.mxu1  ;;  %v2803_v27 = vadd.f32 %v2802_v32, %v2801_v59  ;;  %v2808_v32 = vsel %vm2323_vm1, %v2634_v15, 0.0  ;;  %v2636_v1 = vmul.f32 %v4874_v20, %v4874_v20 }
 0x212   : > { %2248 = vst.msk [vmem:[%s4288_s25 + $0xd4] sm:$0xf] %vm2194_vm0, %v3477_v37  ;;  %2312 = vst.msk [vmem:[%s4288_s25 + $0x1d4] sm:$0xf] %vm2194_vm0, %v3541_v21  ;;  %v2414_v37 = vadd.f32 %v2413_v41, %v2412_v14  ;;  %v2417_v63 = vsel %vm2323_vm1, %v4828_v3, 0.0  ;;  %v2419_v3 = vsel %vm2323_vm1, %v4852_v10, 0.0  ;;  %v2637_v10 = vmul.f32 %v4897_v58, %v4897_v58 }
 0x213   : > { %v4985_v56 = vpop.f32.mrf.mxu0  ;;  %v4987_v42 = vpop.f32.mrf.mxu1  ;;  %v2805_v54 = vadd.f32 %v2804_v23, %v2803_v27  ;;  %v2810_v27 = vsel %vm2323_vm1, %v2635_v51, 0.0  ;;  %v2812_v51 = vsel %vm2323_vm1, %v2636_v1, 0.0 }
 0x214   : > { %v3478_v38 = vpack.c.bf16 %v4985_v56, %v4985_v56  ;;  %v3542_v29 = vpack.c.bf16 %v4987_v42, %v4987_v42  ;;  %v2416_v57 = vadd.f32 %v2415_v45, %v2414_v37  ;;  %v2421_v37 = vsel %vm2323_vm1, %v4874_v20, 0.0 }
 0x215   : > { %v1389_v21 = vpop.f32.mrf.mxu0  ;;  %v1645_v13 = vpop.f32.mrf.mxu1  ;;  %v2807_v45 = vadd.f32 %v2806_v48, %v2805_v54  ;;  %v2638_v48 = vmul.f32 %v4918_v28, %v4918_v28  ;;  %v2423_v20 = vsel %vm2323_vm1, %v4897_v58, 0.0 }
 0x216   : > { %2249 = vst.msk [vmem:[%s4288_s25 + $0xd8] sm:$0xf] %vm2194_vm0, %v3478_v38  ;;  %2313 = vst.msk [vmem:[%s4288_s25 + $0x1d8] sm:$0xf] %vm2194_vm0, %v3542_v29  ;;  %v2418_v38 = vadd.f32 %v2417_v63, %v2416_v57 }
 0x217   : > { %v5006_v41 = vpop.f32.mrf.mxu0  ;;  %v5008_v59 = vpop.f32.mrf.mxu1  ;;  %v2809_v21 = vadd.f32 %v2808_v32, %v2807_v45 }
 0x218   : > { %v3479_v14 = vpack.c.bf16 %v5006_v41, %v5006_v41  ;;  %v3543_v23 = vpack.c.bf16 %v5008_v59, %v5008_v59  ;;  %v2420_v13 = vadd.f32 %v2419_v3, %v2418_v38  ;;  %v2814_v38 = vsel %vm2323_vm1, %v2637_v10, 0.0 }
 0x219   : > { %v1392_v29 = vpop.f32.mrf.mxu0  ;;  %v1648_v15 = vpop.f32.mrf.mxu1  ;;  %v2427_v10 = vsel %vm2323_vm1, %v4941_v5, 0.0 }
 0x21a   : > { %2250 = vst.msk [vmem:[%s4288_s25 + $0xdc] sm:$0xf] %vm2194_vm0, %v3479_v14  ;;  %2314 = vst.msk [vmem:[%s4288_s25 + $0x1dc] sm:$0xf] %vm2194_vm0, %v3543_v23  ;;  %v2811_v23 = vadd.f32 %v2810_v27, %v2809_v21  ;;  %v2422_v32 = vadd.f32 %v2421_v37, %v2420_v13  ;;  %v2425_v29 = vsel %vm2323_vm1, %v4918_v28, 0.0  ;;  %v2639_v15 = vmul.f32 %v4941_v5, %v4941_v5 }
 0x21b   : > { %v1395_v63 = vpop.f32.mrf.mxu0  ;;  %v5029_v54 = vpop.f32.mrf.mxu1  ;;  %v2816_v27 = vsel %vm2323_vm1, %v2638_v48, 0.0  ;;  %v2640_v28 = vmul.f32 %v4962_v44, %v4962_v44  ;;  %v2429_v48 = vsel %vm2323_vm1, %v4962_v44, 0.0  ;;  %v2431_v44 = vsel %vm2323_vm1, %v4985_v56, 0.0 }
 0x21c   : > { %v3480_v57 = vpack.c.bf16 %v1395_v63, %v1395_v63  ;;  %v3544_v14 = vpack.c.bf16 %v5029_v54, %v5029_v54  ;;  %v2813_v58 = vadd.f32 %v2812_v51, %v2811_v23  ;;  %v2424_v1 = vadd.f32 %v2423_v20, %v2422_v32 }
 0x21d   : > { %v1397_v45 = vpop.f32.mrf.mxu0  ;;  %v1653_v3 = vpop.f32.mrf.mxu1  ;;  %v2818_v32 = vsel %vm2323_vm1, %v2639_v15, 0.0  ;;  %v2820_v15 = vsel %vm2323_vm1, %v2640_v28, 0.0 }
 0x21e   : > { %2251 = vst.msk [vmem:[%s4288_s25 + $0xe0] sm:$0xf] %vm2194_vm0, %v3480_v57  ;;  %2315 = vst.msk [vmem:[%s4288_s25 + $0x1e0] sm:$0xf] %vm2194_vm0, %v3544_v14  ;;  %v2815_v14 = vadd.f32 %v2814_v38, %v2813_v58  ;;  %v2426_v51 = vadd.f32 %v2425_v29, %v2424_v1  ;;  %v2641_v45 = vmul.f32 %v4985_v56, %v4985_v56 }
 0x21f   : > { %v1398_v37 = vpop.f32.mrf.mxu0  ;;  %v5046_v21 = vpop.f32.mrf.mxu1  ;;  %v2642_v38 = vmul.f32 %v5006_v41, %v5006_v41 }
 0x220   : > { %5612 = vst [vmem:[#allocation29_spill] sm:$0xff] %v5046_v21  ;;  %v3481_v13 = vpack.c.bf16 %v1398_v37, %v1398_v37  ;;  %v3545_v57 = vpack.c.bf16 %v5046_v21, %v5046_v21  ;;  %v2817_v5 = vadd.f32 %v2816_v27, %v2815_v14  ;;  %v2428_v3 = vadd.f32 %v2427_v10, %v2426_v51 }
 0x221   : > { %v1400_v23 = vpop.f32.mrf.mxu0  ;;  %v1656_v20 = vpop.f32.mrf.mxu1  ;;  %v2822_v51 = vsel %vm2323_vm1, %v2641_v45, 0.0  ;;  %v2644_v45 = vmul.f32 %v1398_v37, %v1398_v37 }
 0x222   : > { %2252 = vst.msk [vmem:[%s4288_s25 + $0xe4] sm:$0xf] %vm2194_vm0, %v3481_v13  ;;  %2316 = vst.msk [vmem:[%s4288_s25 + $0x1e4] sm:$0xf] %vm2194_vm0, %v3545_v57  ;;  %v2819_v57 = vadd.f32 %v2818_v32, %v2817_v5  ;;  %v2430_v27 = vadd.f32 %v2429_v48, %v2428_v3  ;;  %v2433_v23 = vsel %vm2323_vm1, %v5006_v41, 0.0  ;;  %v2643_v20 = vmul.f32 %v1395_v63, %v1395_v63 }
 0x223   : > { %v1403_v29 = vpop.f32.mrf.mxu0  ;;  %v5065_v58 = vpop.f32.mrf.mxu1  ;;  %v2435_v5 = vsel %vm2323_vm1, %v1395_v63, 0.0 }
 0x224   : > { %5613 = vst [vmem:[#allocation30_spill] sm:$0xff] %v5065_v58  ;;  %v3482_v1 = vpack.c.bf16 %v1403_v29, %v1403_v29  ;;  %v3546_v13 = vpack.c.bf16 %v5065_v58, %v5065_v58  ;;  %v2821_v28 = vadd.f32 %v2820_v15, %v2819_v57  ;;  %v2432_v56 = vadd.f32 %v2431_v44, %v2430_v27 }
 0x225   : > { %v1405_v14 = vpop.f32.mrf.mxu0  ;;  %v1661_v10 = vpop.f32.mrf.mxu1  ;;  %v2824_v58 = vsel %vm2323_vm1, %v2642_v38, 0.0  ;;  %v2826_v15 = vsel %vm2323_vm1, %v2643_v20, 0.0  ;;  %v2437_v44 = vsel %vm2323_vm1, %v1398_v37, 0.0  ;;  %v2645_v57 = vmul.f32 %v1403_v29, %v1403_v29 }
 0x226   : > { %2253 = vst.msk [vmem:[%s4288_s25 + $0xe8] sm:$0xf] %vm2194_vm0, %v3482_v1  ;;  %2317 = vst.msk [vmem:[%s4288_s25 + $0x1e8] sm:$0xf] %vm2194_vm0, %v3546_v13  ;;  %v2823_v14 = vadd.f32 %v2822_v51, %v2821_v28  ;;  %v2434_v1 = vadd.f32 %v2433_v23, %v2432_v56  ;;  %v2828_v51 = vsel %vm2323_vm1, %v2644_v45, 0.0  ;;  %v2439_v23 = vsel %vm2323_vm1, %v1403_v29, 0.0 }
 0x227   : > { %v1406_v32 = vpop.f32.mrf.mxu0  ;;  %v5080_v48 = vpop.f32.mrf.mxu1 }
 0x228   : > { %5614 = vst [vmem:[#allocation31_spill] sm:$0xff] %v5080_v48  ;;  %v3483_v3 = vpack.c.bf16 %v1406_v32, %v1406_v32  ;;  %v3547_v41 = vpack.c.bf16 %v5080_v48, %v5080_v48  ;;  %v2825_v63 = vadd.f32 %v2824_v58, %v2823_v14  ;;  %v2436_v38 = vadd.f32 %v2435_v5, %v2434_v1 }
 0x229   : > { %v1408_v10 = vpop.f32.mrf.mxu0  ;;  %v1664_v13 = vpop.f32.mrf.mxu1  ;;  %v2646_v27 = vmul.f32 %v1406_v32, %v1406_v32  ;;  %v2830_v58 = vsel %vm2323_vm1, %v2645_v57, 0.0  ;;  %v2441_v5 = vsel %vm2323_vm1, %v1406_v32, 0.0 }
 0x22a   : > { %2254 = vst.msk [vmem:[%s4288_s25 + $0xec] sm:$0xf] %vm2194_vm0, %v3483_v3  ;;  %2318 = vst.msk [vmem:[%s4288_s25 + $0x1ec] sm:$0xf] %vm2194_vm0, %v3547_v41  ;;  %v2827_v28 = vadd.f32 %v2826_v15, %v2825_v63  ;;  %v2438_v56 = vadd.f32 %v2437_v44, %v2436_v38 }
 0x22b   : > { %v1411_v21 = vpop.f32.mrf.mxu0  ;;  %v5091_v48 = vpop.f32.mrf.mxu1  ;;  %v2832_v1 = vsel %vm2323_vm1, %v2646_v27, 0.0 }
 0x22c   : > { %v3484_v20 = vpack.c.bf16 %v1411_v21, %v1411_v21  ;;  %v3548_v37 = vpack.c.bf16 %v5091_v48, %v5091_v48  ;;  %v2647_v14 = vmul.f32 %v1411_v21, %v1411_v21  ;;  %v2829_v45 = vadd.f32 %v2828_v51, %v2827_v28 }
 0x22d   : > { %v1413_v3 = vpop.f32.mrf.mxu0  ;;  %v1669_v41 = vpop.f32.mrf.mxu1  ;;  %v2440_v29 = vadd.f32 %v2439_v23, %v2438_v56  ;;  %v2443_v15 = vsel %vm2323_vm1, %v1411_v21, 0.0 }
 0x22e   : > { %2255 = vst.msk [vmem:[%s4288_s25 + $0xf0] sm:$0xf] %vm2194_vm0, %v3484_v20  ;;  %2319 = vst.msk [vmem:[%s4288_s25 + $0x1f0] sm:$0xf] %vm2194_vm0, %v3548_v37  ;;  %v2831_v63 = vadd.f32 %v2830_v58, %v2829_v45  ;;  %v2834_v51 = vsel %vm2323_vm1, %v2647_v14, 0.0 }
 0x22f   : > { %v1414_v10 = vpop.f32.mrf.mxu0  ;;  %v5104_v13 = vpop.f32.mrf.mxu1  ;;  %v2442_v38 = vadd.f32 %v2441_v5, %v2440_v29 }
 0x230   : > { %v3485_v44 = vpack.c.bf16 %v1414_v10, %v1414_v10  ;;  %v2648_v57 = vmul.f32 %v1414_v10, %v1414_v10  ;;  %v3549_v32 = vpack.c.bf16 %v5104_v13, %v5104_v13  ;;  %v2445_v27 = vsel %vm2323_vm1, %v1414_v10, 0.0 }
 0x231   : > { %v1416_v20 = vpop.f32.mrf.mxu0  ;;  %v1672_v3 = vpop.f32.mrf.mxu1  ;;  %v2833_v21 = vadd.f32 %v2832_v1, %v2831_v63  ;;  %v2444_v23 = vadd.f32 %v2443_v15, %v2442_v38  ;;  %v2651_v15 = vmul.f32 %v4291_v61, %v4291_v61 }
 0x232   : > { %2256 = vst.msk [vmem:[%s4288_s25 + $0xf4] sm:$0xf] %vm2194_vm0, %v3485_v44  ;;  %2320 = vst.msk [vmem:[%s4288_s25 + $0x1f4] sm:$0xf] %vm2194_vm0, %v3549_v32  ;;  %v2836_v37 = vsel %vm2323_vm1, %v2648_v57, 0.0 }
 0x233   : > { %v1419_v28 = vpop.f32.mrf.mxu0  ;;  %v5116_v56 = vpop.f32.mrf.mxu1  ;;  %v2835_v45 = vadd.f32 %v2834_v51, %v2833_v21  ;;  %v2446_v29 = vadd.f32 %v2445_v27, %v2444_v23 }
 0x234   : > { %v3486_v41 = vpack.c.bf16 %v1419_v28, %v1419_v28  ;;  %v2447_v58 = vsel %vm2323_vm1, %v1419_v28, 0.0  ;;  %v2649_v5 = vmul.f32 %v1419_v28, %v1419_v28  ;;  %v3550_v14 = vpack.c.bf16 %v5116_v56, %v5116_v56 }
 0x235   : > { %v1421_v10 = vpop.f32.mrf.mxu0  ;;  %v1677_v44 = vpop.f32.mrf.mxu1  ;;  %v2837_v57 = vadd.f32 %v2836_v37, %v2835_v45  ;;  %v2448_v32 = vadd.f32 %v2447_v58, %v2446_v29  ;;  %v2652_v37 = vmul.f32 %v4303_v9, %v4303_v9  ;;  %v2842_v29 = vsel %vm2323_vm1, %v2651_v15, 0.0 }
 0x236   : > { %2257 = vst.msk [vmem:[%s4288_s25 + $0xf8] sm:$0xf] %vm2194_vm0, %v3486_v41  ;;  %v2838_v1 = vsel %vm2323_vm1, %v2649_v5, 0.0  ;;  %2321 = vst.msk [vmem:[%s4288_s25 + $0x1f8] sm:$0xf] %vm2194_vm0, %v3550_v14  ;;  %v2451_v5 = vsel %vm2323_vm1, %v4291_v61, 0.0  ;;  %v2653_v44 = vmul.f32 %v4317_v25, %v4317_v25 }
 0x237   : > { %v1422_v63 = vpop.f32.mrf.mxu0  ;;  %v5128_v38 = vpop.f32.mrf.mxu1  ;;  %v2839_v21 = vadd.f32 %v2838_v1, %v2837_v57  ;;  %v2453_v10 = vsel %vm2323_vm1, %v4303_v9, 0.0  ;;  %v2844_v57 = vsel %vm2323_vm1, %v2652_v37, 0.0  ;;  %v2457_v9 = vsel %vm2323_vm1, %v4330_v40, 0.0 }
 0x238   : > { %v3487_v20 = vpack.c.bf16 %v1422_v63, %v1422_v63  ;;  %v2449_v3 = vsel %vm2323_vm1, %v1422_v63, 0.0  ;;  %v2650_v51 = vmul.f32 %v1422_v63, %v1422_v63  ;;  %v3551_v27 = vpack.c.bf16 %v5128_v38, %v5128_v38 }
 0x239   : > { %v2450_v23 = vadd.f32 %v2449_v3, %v2448_v32  ;;  %v1424_v28 = vpop.f32.mrf.mxu0  ;;  %v1680_v41 = vpop.f32.mrf.mxu1  ;;  %v2455_v32 = vsel %vm2323_vm1, %v4317_v25, 0.0  ;;  %v2654_v63 = vmul.f32 %v4330_v40, %v4330_v40  ;;  %v2846_v15 = vsel %vm2323_vm1, %v2653_v44, 0.0 }
 0x23a   : > { %2258 = vst.msk [vmem:[%s4288_s25 + $0xfc] sm:$0xf] %vm2194_vm0, %v3487_v20  ;;  %v2840_v58 = vsel %vm2323_vm1, %v2650_v51, 0.0  ;;  %2322 = vst.msk [vmem:[%s4288_s25 + $0x1fc] sm:$0xf] %vm2194_vm0, %v3551_v27  ;;  %v2655_v51 = vmul.f32 %v4343_v55, %v4343_v55  ;;  %v2459_v25 = vsel %vm2323_vm1, %v4343_v55, 0.0  ;;  %v2656_v28 = vmul.f32 %v4356_v7, %v4356_v7 }
 0x23b   : > { %v2452_v14 = vadd.f32 %v2451_v5, %v2450_v23  ;;  %v2841_v45 = vadd.f32 %v2840_v58, %v2839_v21  ;;  %v2848_v23 = vsel %vm2323_vm1, %v2654_v63, 0.0  ;;  %v2461_v40 = vsel %vm2323_vm1, %v4356_v7, 0.0 }
 0x23c   : > { %v2850_v37 = vsel %vm2323_vm1, %v2655_v51, 0.0  ;;  %v2657_v58 = vmul.f32 %v4368_v22, %v4368_v22  ;;  %v2463_v55 = vsel %vm2323_vm1, %v4368_v22, 0.0  ;;  %v2465_v7 = vsel %vm2323_vm1, %v4379_v35, 0.0 }
 0x23d   : > { %v2454_v61 = vadd.f32 %v2453_v10, %v2452_v14  ;;  %v2843_v1 = vadd.f32 %v2842_v29, %v2841_v45  ;;  %v2852_v29 = vsel %vm2323_vm1, %v2656_v28, 0.0  ;;  %v2658_v10 = vmul.f32 %v4379_v35, %v4379_v35 }
 0x23e   : > { %v2467_v22 = vsel %vm2323_vm1, %v4392_v50, 0.0  ;;  %v2469_v35 = vsel %vm2323_vm1, %v4403_v0, 0.0  ;;  %v2662_v28 = vmul.f32 %v4427_v30, %v4427_v30 }
 0x23f   : > { %v2456_v20 = vadd.f32 %v2455_v32, %v2454_v61  ;;  %v2845_v3 = vadd.f32 %v2844_v57, %v2843_v1  ;;  %v2854_v1 = vsel %vm2323_vm1, %v2657_v58, 0.0  ;;  %v2659_v57 = vmul.f32 %v4392_v50, %v4392_v50 }
 0x240   : > { %v2471_v50 = vsel %vm2323_vm1, %v4416_v16, 0.0 }
 0x241   : > { %v2458_v27 = vadd.f32 %v2457_v9, %v2456_v20  ;;  %v2847_v21 = vadd.f32 %v2846_v15, %v2845_v3  ;;  %v2856_v20 = vsel %vm2323_vm1, %v2658_v10, 0.0  ;;  %v2660_v3 = vmul.f32 %v4403_v0, %v4403_v0 }
 0x242   : > { %v2858_v51 = vsel %vm2323_vm1, %v2659_v57, 0.0  ;;  %v2473_v0 = vsel %vm2323_vm1, %v4427_v30, 0.0  ;;  %v2477_v30 = vsel %vm2323_vm1, %v4451_v60, 0.0 }
 0x243   : > { %v2460_v41 = vadd.f32 %v2459_v25, %v2458_v27  ;;  %v2849_v5 = vadd.f32 %v2848_v23, %v2847_v21  ;;  %v2661_v27 = vmul.f32 %v4416_v16, %v4416_v16  ;;  %v2860_v25 = vsel %vm2323_vm1, %v2660_v3, 0.0 }
 0x244   : > { %v2475_v16 = vsel %vm2323_vm1, %v4440_v46, 0.0  ;;  %v2667_v3 = vmul.f32 %v4482_v39, %v4482_v39 }
 0x245   : > { %v2462_v14 = vadd.f32 %v2461_v40, %v2460_v41  ;;  %v2851_v45 = vadd.f32 %v2850_v37, %v2849_v5  ;;  %v2862_v37 = vsel %vm2323_vm1, %v2661_v27, 0.0  ;;  %v2663_v40 = vmul.f32 %v4440_v46, %v4440_v46 }
 0x246   : > { %v2479_v46 = vsel %vm2323_vm1, %v4462_v12, 0.0 }
 0x247   : > { %v2464_v44 = vadd.f32 %v2463_v55, %v2462_v14  ;;  %v2853_v61 = vadd.f32 %v2852_v29, %v2851_v45  ;;  %v2864_v45 = vsel %vm2323_vm1, %v2662_v28, 0.0  ;;  %v2664_v29 = vmul.f32 %v4451_v60, %v4451_v60 }
 0x248   : > { %v2481_v60 = vsel %vm2323_vm1, %v4472_v26, 0.0 }
 0x249   : > { %v2466_v32 = vadd.f32 %v2465_v7, %v2464_v44  ;;  %v2855_v63 = vadd.f32 %v2854_v1, %v2853_v61  ;;  %v2866_v44 = vsel %vm2323_vm1, %v2663_v40, 0.0  ;;  %v2665_v61 = vmul.f32 %v4462_v12, %v4462_v12 }
 0x24a   : > { %v2868_v57 = vsel %vm2323_vm1, %v2664_v29, 0.0  ;;  %v2483_v12 = vsel %vm2323_vm1, %v4482_v39, 0.0  ;;  %v2487_v39 = vsel %vm2323_vm1, %v4502_v4, 0.0  ;;  %v2672_v29 = vmul.f32 %v4532_v49, %v4532_v49 }
 0x24b   : > { %v2468_v15 = vadd.f32 %v2467_v22, %v2466_v32  ;;  %v2857_v9 = vadd.f32 %v2856_v20, %v2855_v63  ;;  %v2666_v32 = vmul.f32 %v4472_v26, %v4472_v26  ;;  %v2870_v22 = vsel %vm2323_vm1, %v2665_v61, 0.0 }
 0x24c   : > { %v2485_v26 = vsel %vm2323_vm1, %v4492_v53, 0.0 }
 0x24d   : > { %v2470_v21 = vadd.f32 %v2469_v35, %v2468_v15  ;;  %v2859_v23 = vadd.f32 %v2858_v51, %v2857_v9  ;;  %v2872_v51 = vsel %vm2323_vm1, %v2666_v32, 0.0  ;;  %v2668_v35 = vmul.f32 %v4492_v53, %v4492_v53 }
 0x24e   : > { %v2489_v53 = vsel %vm2323_vm1, %v4512_v19, 0.0 }
 0x24f   : > { %v2472_v41 = vadd.f32 %v2471_v50, %v2470_v21  ;;  %v2861_v5 = vadd.f32 %v2860_v25, %v2859_v23  ;;  %v2874_v23 = vsel %vm2323_vm1, %v2667_v3, 0.0  ;;  %v2669_v25 = vmul.f32 %v4502_v4, %v4502_v4 }
 0x250   : > { %v2491_v4 = vsel %vm2323_vm1, %v4522_v34, 0.0 }
 0x251   : > { %v2474_v58 = vadd.f32 %v2473_v0, %v2472_v41  ;;  %v2863_v14 = vadd.f32 %v2862_v37, %v2861_v5  ;;  %v2876_v41 = vsel %vm2323_vm1, %v2668_v35, 0.0  ;;  %v2670_v5 = vmul.f32 %v4512_v19, %v4512_v19 }
 0x252   : > { %v2878_v40 = vsel %vm2323_vm1, %v2669_v25, 0.0  ;;  %v2493_v19 = vsel %vm2323_vm1, %v4532_v49, 0.0  ;;  %v2497_v49 = vsel %vm2323_vm1, %v4552_v18, 0.0  ;;  %v2677_v35 = vmul.f32 %v4582_v6, %v4582_v6 }
 0x253   : > { %v2476_v55 = vadd.f32 %v2475_v16, %v2474_v58  ;;  %v2865_v10 = vadd.f32 %v2864_v45, %v2863_v14  ;;  %v2671_v58 = vmul.f32 %v4522_v34, %v4522_v34  ;;  %v2880_v16 = vsel %vm2323_vm1, %v2670_v5, 0.0 }
 0x254   : > { %v2495_v34 = vsel %vm2323_vm1, %v4542_v2, 0.0 }
 0x255   : > { %v2478_v1 = vadd.f32 %v2477_v30, %v2476_v55  ;;  %v2867_v7 = vadd.f32 %v2866_v44, %v2865_v10  ;;  %v2882_v44 = vsel %vm2323_vm1, %v2671_v58, 0.0  ;;  %v2673_v30 = vmul.f32 %v4542_v2, %v4542_v2 }
 0x256   : > { %v2499_v2 = vsel %vm2323_vm1, %v4562_v36, 0.0 }
 0x257   : > { %v2480_v63 = vadd.f32 %v2479_v46, %v2478_v1  ;;  %v2869_v20 = vadd.f32 %v2868_v57, %v2867_v7  ;;  %v2884_v7 = vsel %vm2323_vm1, %v2672_v29, 0.0  ;;  %v2674_v57 = vmul.f32 %v4552_v18, %v4552_v18  ;;  %v5615_v29 = vld [vmem:[#allocation11_spill] sm:$0xff] }
 0x258   : > { %v2501_v18 = vsel %vm2323_vm1, %v4572_v52, 0.0 }
 0x259   : > { %v2482_v15 = vadd.f32 %v2481_v60, %v2480_v63  ;;  %v2871_v9 = vadd.f32 %v2870_v22, %v2869_v20  ;;  %v2886_v63 = vsel %vm2323_vm1, %v2673_v30, 0.0  ;;  %v2675_v20 = vmul.f32 %v4562_v36, %v4562_v36  ;;  %v5616_v30 = vld [vmem:[#allocation12_spill] sm:$0xff] }
 0x25a   : > { %v2888_v3 = vsel %vm2323_vm1, %v2674_v57, 0.0  ;;  %v2503_v36 = vsel %vm2323_vm1, %v4582_v6, 0.0  ;;  %v2507_v6 = vsel %vm2323_vm1, %v4602_v43, 0.0  ;;  %v5617_v57 = vld [vmem:[#allocation13_spill] sm:$0xff] }
 0x25b   : > { %v2484_v27 = vadd.f32 %v2483_v12, %v2482_v15  ;;  %v2873_v21 = vadd.f32 %v2872_v51, %v2871_v9  ;;  %v2676_v15 = vmul.f32 %v4572_v52, %v4572_v52  ;;  %v2890_v12 = vsel %vm2323_vm1, %v2675_v20, 0.0 }
 0x25c   : > { %v2505_v52 = vsel %vm2323_vm1, %v4592_v24, 0.0  ;;  %v2517_v20 = vsel %vm2323_vm1, %v5617_v57, 0.0 }
 0x25d   : > { %v2875_v50 = vadd.f32 %v2874_v23, %v2873_v21  ;;  %v2486_v28 = vadd.f32 %v2485_v26, %v2484_v27  ;;  %v2892_v23 = vsel %vm2323_vm1, %v2676_v15, 0.0  ;;  %v2678_v26 = vmul.f32 %v4592_v24, %v4592_v24 }
 0x25e   : > { %v2509_v24 = vsel %vm2323_vm1, %v4612_v62, 0.0 }
 0x25f   : > { %v2488_v37 = vadd.f32 %v2487_v39, %v2486_v28  ;;  %v2877_v0 = vadd.f32 %v2876_v41, %v2875_v50  ;;  %v2894_v28 = vsel %vm2323_vm1, %v2677_v35, 0.0  ;;  %v2679_v41 = vmul.f32 %v4602_v43, %v4602_v43 }
 0x260   : > { %v2511_v43 = vsel %vm2323_vm1, %v4622_v17, 0.0 }
 0x261   : > { %v2490_v14 = vadd.f32 %v2489_v53, %v2488_v37  ;;  %v2879_v45 = vadd.f32 %v2878_v40, %v2877_v0  ;;  %v2896_v37 = vsel %vm2323_vm1, %v2678_v26, 0.0  ;;  %v2680_v0 = vmul.f32 %v4612_v62, %v4612_v62 }
 0x262   : > { %v2898_v58 = vsel %vm2323_vm1, %v2679_v41, 0.0  ;;  %v2513_v62 = vsel %vm2323_vm1, %v5615_v29, 0.0 }
 0x263   : > { %v2492_v55 = vadd.f32 %v2491_v4, %v2490_v14  ;;  %v2881_v10 = vadd.f32 %v2880_v16, %v2879_v45  ;;  %v2681_v14 = vmul.f32 %v4622_v17, %v4622_v17  ;;  %v2900_v4 = vsel %vm2323_vm1, %v2680_v0, 0.0  ;;  %v5622_v0 = vld [vmem:[#allocation18_spill] sm:$0xff] }
 0x264   : > { %v2515_v17 = vsel %vm2323_vm1, %v5616_v30, 0.0 }
 0x265   : > { %v2494_v61 = vadd.f32 %v2493_v19, %v2492_v55  ;;  %v2883_v1 = vadd.f32 %v2882_v44, %v2881_v10  ;;  %v2682_v55 = vmul.f32 %v5615_v29, %v5615_v29  ;;  %v2902_v19 = vsel %vm2323_vm1, %v2681_v14, 0.0 }
 0x266   : > { %v2527_v14 = vsel %vm2323_vm1, %v5622_v0, 0.0 }
 0x267   : > { %v2496_v46 = vadd.f32 %v2495_v34, %v2494_v61  ;;  %v2885_v32 = vadd.f32 %v2884_v7, %v2883_v1  ;;  %v2683_v61 = vmul.f32 %v5616_v30, %v5616_v30  ;;  %v2904_v34 = vsel %vm2323_vm1, %v2682_v55, 0.0 }
 0x269   : > { %v2498_v22 = vadd.f32 %v2497_v49, %v2496_v46  ;;  %v2887_v60 = vadd.f32 %v2886_v63, %v2885_v32  ;;  %v2684_v46 = vmul.f32 %v5617_v57, %v5617_v57  ;;  %v2906_v49 = vsel %vm2323_vm1, %v2683_v61, 0.0 }
 0x26b   : > { %v2500_v9 = vadd.f32 %v2499_v2, %v2498_v22  ;;  %v2889_v51 = vadd.f32 %v2888_v3, %v2887_v60  ;;  %v5618_v22 = vld [vmem:[#allocation14_spill] sm:$0xff]  ;;  %v2908_v15 = vsel %vm2323_vm1, %v2684_v46, 0.0 }
 0x26c   : > { %v2685_v60 = vmul.f32 %v5618_v22, %v5618_v22 }
 0x26d   : > { %v2502_v27 = vadd.f32 %v2501_v18, %v2500_v9  ;;  %v2891_v21 = vadd.f32 %v2890_v12, %v2889_v51  ;;  %v2519_v9 = vsel %vm2323_vm1, %v5618_v22, 0.0  ;;  %v5619_v51 = vld [vmem:[#allocation15_spill] sm:$0xff] }
 0x26e   : > { %v2686_v12 = vmul.f32 %v5619_v51, %v5619_v51 }
 0x26f   : > { %v2504_v25 = vadd.f32 %v2503_v36, %v2502_v27  ;;  %v2893_v50 = vadd.f32 %v2892_v23, %v2891_v21  ;;  %v2910_v27 = vsel %vm2323_vm1, %v2685_v60, 0.0  ;;  %v2521_v21 = vsel %vm2323_vm1, %v5619_v51, 0.0  ;;  %v5620_v23 = vld [vmem:[#allocation16_spill] sm:$0xff] }
 0x270   : > { %v2687_v36 = vmul.f32 %v5620_v23, %v5620_v23 }
 0x271   : > { %v2506_v39 = vadd.f32 %v2505_v52, %v2504_v25  ;;  %v2895_v5 = vadd.f32 %v2894_v28, %v2893_v50  ;;  %v2912_v50 = vsel %vm2323_vm1, %v2686_v12, 0.0  ;;  %v2523_v28 = vsel %vm2323_vm1, %v5620_v23, 0.0  ;;  %v5621_v52 = vld [vmem:[#allocation17_spill] sm:$0xff] }
 0x272   : > { %v2688_v41 = vmul.f32 %v5621_v52, %v5621_v52 }
 0x273   : > { %v2508_v40 = vadd.f32 %v2507_v6, %v2506_v39  ;;  %v2897_v53 = vadd.f32 %v2896_v37, %v2895_v5  ;;  %v2914_v37 = vsel %vm2323_vm1, %v2687_v36, 0.0  ;;  %v2525_v6 = vsel %vm2323_vm1, %v5621_v52, 0.0 }
 0x275   : > { %v2510_v45 = vadd.f32 %v2509_v24, %v2508_v40  ;;  %v2899_v16 = vadd.f32 %v2898_v58, %v2897_v53  ;;  %v2689_v40 = vmul.f32 %v5622_v0, %v5622_v0  ;;  %v2916_v24 = vsel %vm2323_vm1, %v2688_v41, 0.0 }
 0x277   : > { %v2512_v10 = vadd.f32 %v2511_v43, %v2510_v45  ;;  %v2901_v44 = vadd.f32 %v2900_v4, %v2899_v16  ;;  %v5623_v45 = vld [vmem:[#allocation19_spill] sm:$0xff]  ;;  %v2918_v29 = vsel %vm2323_vm1, %v2689_v40, 0.0 }
 0x278   : > { %v2690_v16 = vmul.f32 %v5623_v45, %v5623_v45  ;;  %v2529_v55 = vsel %vm2323_vm1, %v5623_v45, 0.0 }
 0x279   : > { %v2514_v1 = vadd.f32 %v2513_v62, %v2512_v10  ;;  %v2903_v7 = vadd.f32 %v2902_v19, %v2901_v44  ;;  %v5624_v10 = vld [vmem:[#allocation20_spill] sm:$0xff] }
 0x27a   : > { %v2691_v44 = vmul.f32 %v5624_v10, %v5624_v10  ;;  %v2920_v30 = vsel %vm2323_vm1, %v2690_v16, 0.0  ;;  %v2531_v61 = vsel %vm2323_vm1, %v5624_v10, 0.0 }
 0x27b   : > { %v2516_v32 = vadd.f32 %v2515_v17, %v2514_v1  ;;  %v2905_v63 = vadd.f32 %v2904_v34, %v2903_v7  ;;  %v5625_v1 = vld [vmem:[#allocation21_spill] sm:$0xff] }
 0x27c   : > { %v2692_v7 = vmul.f32 %v5625_v1, %v5625_v1  ;;  %v2922_v57 = vsel %vm2323_vm1, %v2691_v44, 0.0  ;;  %v2533_v46 = vsel %vm2323_vm1, %v5625_v1, 0.0  ;;  %v2549_v1 = vsel %vm2323_vm1, %v4876_v8, 0.0 }
 0x27d   : > { %v2518_v3 = vadd.f32 %v2517_v20, %v2516_v32  ;;  %v2907_v2 = vadd.f32 %v2906_v49, %v2905_v63  ;;  %v5626_v32 = vld [vmem:[#allocation22_spill] sm:$0xff] }
 0x27e   : > { %v2693_v63 = vmul.f32 %v5626_v32, %v5626_v32  ;;  %v2924_v22 = vsel %vm2323_vm1, %v2692_v7, 0.0  ;;  %v2535_v60 = vsel %vm2323_vm1, %v5626_v32, 0.0  ;;  %v2701_v7 = vmul.f32 %v4899_v33, %v4899_v33 }
 0x27f   : > { %v2909_v18 = vadd.f32 %v2908_v15, %v2907_v2  ;;  %v2520_v35 = vadd.f32 %v2519_v9, %v2518_v3  ;;  %v5627_v3 = vld [vmem:[#allocation23_spill] sm:$0xff]  ;;  %v2702_v32 = vmul.f32 %v4920_v47, %v4920_v47 }
 0x280   : > { %v2694_v2 = vmul.f32 %v5627_v3, %v5627_v3  ;;  %v2926_v51 = vsel %vm2323_vm1, %v2693_v63, 0.0  ;;  %v2537_v12 = vsel %vm2323_vm1, %v5627_v3, 0.0 }
 0x281   : > { %v2911_v26 = vadd.f32 %v2910_v27, %v2909_v18  ;;  %v2522_v25 = vadd.f32 %v2521_v21, %v2520_v35  ;;  %v5628_v18 = vld [vmem:[#allocation24_spill] sm:$0xff] }
 0x282   : > { %v2695_v35 = vmul.f32 %v5628_v18, %v5628_v18  ;;  %v2928_v23 = vsel %vm2323_vm1, %v2694_v2, 0.0  ;;  %v2539_v36 = vsel %vm2323_vm1, %v5628_v18, 0.0  ;;  %v2944_v2 = vsel %vm2323_vm1, %v2702_v32, 0.0 }
 0x283   : > { %v2913_v39 = vadd.f32 %v2912_v50, %v2911_v26  ;;  %v2524_v5 = vadd.f32 %v2523_v28, %v2522_v25  ;;  %v5629_v26 = vld [vmem:[#allocation25_spill] sm:$0xff]  ;;  %v2705_v18 = vmul.f32 %v4987_v42, %v4987_v42 }
 0x284   : > { %v2696_v25 = vmul.f32 %v5629_v26, %v5629_v26  ;;  %v2930_v52 = vsel %vm2323_vm1, %v2695_v35, 0.0  ;;  %v2541_v41 = vsel %vm2323_vm1, %v5629_v26, 0.0 }
 0x285   : > { %v2915_v53 = vadd.f32 %v2914_v37, %v2913_v39  ;;  %v2526_v58 = vadd.f32 %v2525_v6, %v2524_v5  ;;  %v5630_v39 = vld [vmem:[#allocation26_spill] sm:$0xff] }
 0x286   : > { %v2697_v5 = vmul.f32 %v5630_v39, %v5630_v39  ;;  %v2932_v0 = vsel %vm2323_vm1, %v2696_v25, 0.0  ;;  %v2543_v40 = vsel %vm2323_vm1, %v5630_v39, 0.0  ;;  %v2950_v25 = vsel %vm2323_vm1, %v2705_v18, 0.0  ;;  %v5633_v39 = vld [vmem:[#allocation29_spill] sm:$0xff] }
 0x287   : > { %v2917_v4 = vadd.f32 %v2916_v24, %v2915_v53  ;;  %v2528_v43 = vadd.f32 %v2527_v14, %v2526_v58  ;;  %v5631_v53 = vld [vmem:[#allocation27_spill] sm:$0xff] }
 0x288   : > { %v2698_v58 = vmul.f32 %v5631_v53, %v5631_v53  ;;  %v2934_v45 = vsel %vm2323_vm1, %v2697_v5, 0.0  ;;  %v2545_v16 = vsel %vm2323_vm1, %v5631_v53, 0.0  ;;  %v2708_v5 = vmul.f32 %v5633_v39, %v5633_v39 }
 0x289   : > { %v2919_v19 = vadd.f32 %v2918_v29, %v2917_v4  ;;  %v2530_v62 = vadd.f32 %v2529_v55, %v2528_v43  ;;  %v5632_v4 = vld [vmem:[#allocation28_spill] sm:$0xff] }
 0x28a   : > { %v2699_v43 = vmul.f32 %v5632_v4, %v5632_v4  ;;  %v2936_v10 = vsel %vm2323_vm1, %v2698_v58, 0.0  ;;  %v2547_v44 = vsel %vm2323_vm1, %v5632_v4, 0.0 }
 0x28b   : > { %v2921_v34 = vadd.f32 %v2920_v30, %v2919_v19  ;;  %v2532_v17 = vadd.f32 %v2531_v61, %v2530_v62  ;;  %v2700_v19 = vmul.f32 %v4876_v8, %v4876_v8  ;;  %v2553_v8 = vsel %vm2323_vm1, %v4920_v47, 0.0 }
 0x28c   : > { %v2938_v61 = vsel %vm2323_vm1, %v2699_v43, 0.0  ;;  %v2557_v47 = vsel %vm2323_vm1, %v4964_v11, 0.0 }
 0x28d   : > { %v2923_v49 = vadd.f32 %v2922_v57, %v2921_v34  ;;  %v2534_v20 = vadd.f32 %v2533_v46, %v2532_v17  ;;  %v2940_v57 = vsel %vm2323_vm1, %v2700_v19, 0.0  ;;  %v2551_v46 = vsel %vm2323_vm1, %v4899_v33, 0.0 }
 0x28e   : > { %v2555_v33 = vsel %vm2323_vm1, %v4943_v31, 0.0 }
 0x28f   : > { %v2925_v15 = vadd.f32 %v2924_v22, %v2923_v49  ;;  %v2536_v9 = vadd.f32 %v2535_v60, %v2534_v20  ;;  %v2942_v20 = vsel %vm2323_vm1, %v2701_v7, 0.0  ;;  %v2703_v22 = vmul.f32 %v4943_v31, %v4943_v31 }
 0x290   : > { %v2559_v31 = vsel %vm2323_vm1, %v4987_v42, 0.0  ;;  %v2563_v42 = vsel %vm2323_vm1, %v5029_v54, 0.0 }
 0x291   : > { %v2927_v27 = vadd.f32 %v2926_v51, %v2925_v15  ;;  %v2538_v21 = vadd.f32 %v2537_v12, %v2536_v9  ;;  %v2704_v15 = vmul.f32 %v4964_v11, %v4964_v11  ;;  %v2946_v12 = vsel %vm2323_vm1, %v2703_v22, 0.0 }
 0x292   : > { %v2561_v11 = vsel %vm2323_vm1, %v5008_v59, 0.0 }
 0x293   : > { %v2929_v50 = vadd.f32 %v2928_v23, %v2927_v27  ;;  %v2540_v28 = vadd.f32 %v2539_v36, %v2538_v21  ;;  %v2948_v21 = vsel %vm2323_vm1, %v2704_v15, 0.0  ;;  %v2706_v23 = vmul.f32 %v5008_v59, %v5008_v59 }
 0x294   : > { %v2565_v59 = vsel %vm2323_vm1, %v5633_v39, 0.0 }
 0x295   : > { %v2931_v37 = vadd.f32 %v2930_v52, %v2929_v50  ;;  %v2542_v6 = vadd.f32 %v2541_v41, %v2540_v28  ;;  %v2707_v50 = vmul.f32 %v5029_v54, %v5029_v54  ;;  %v2952_v41 = vsel %vm2323_vm1, %v2706_v23, 0.0 }
 0x297   : > { %v2933_v24 = vadd.f32 %v2932_v0, %v2931_v37  ;;  %v2544_v14 = vadd.f32 %v2543_v40, %v2542_v6  ;;  %v2954_v0 = vsel %vm2323_vm1, %v2707_v50, 0.0  ;;  %v5634_v40 = vld [vmem:[#allocation30_spill] sm:$0xff] }
 0x298   : > { %v2709_v53 = vmul.f32 %v5634_v40, %v5634_v40  ;;  %v2567_v54 = vsel %vm2323_vm1, %v5634_v40, 0.0 }
 0x299   : > { %v2935_v29 = vadd.f32 %v2934_v45, %v2933_v24  ;;  %v2546_v55 = vadd.f32 %v2545_v16, %v2544_v14  ;;  %v2956_v14 = vsel %vm2323_vm1, %v2708_v5, 0.0  ;;  %v5635_v45 = vld [vmem:[#allocation31_spill] sm:$0xff] }
 0x29a   : > { %v2710_v16 = vmul.f32 %v5635_v45, %v5635_v45 }
 0x29b   : > { %v2937_v62 = vadd.f32 %v2936_v10, %v2935_v29  ;;  %v2548_v30 = vadd.f32 %v2547_v44, %v2546_v55  ;;  %v2958_v29 = vsel %vm2323_vm1, %v2709_v53, 0.0  ;;  %v2569_v55 = vsel %vm2323_vm1, %v5635_v45, 0.0 }
 0x29c   : > { %v2711_v10 = vmul.f32 %v5091_v48, %v5091_v48 }
 0x29d   : > { %v2939_v34 = vadd.f32 %v2938_v61, %v2937_v62  ;;  %v2550_v17 = vadd.f32 %v2549_v1, %v2548_v30  ;;  %v2960_v62 = vsel %vm2323_vm1, %v2710_v16, 0.0  ;;  %v2571_v30 = vsel %vm2323_vm1, %v5091_v48, 0.0 }
 0x29e   : > { %v2712_v61 = vmul.f32 %v5104_v13, %v5104_v13  ;;  %v2575_v48 = vsel %vm2323_vm1, %v5116_v56, 0.0 }
 0x29f   : > { %v2941_v63 = vadd.f32 %v2940_v57, %v2939_v34  ;;  %v2552_v49 = vadd.f32 %v2551_v46, %v2550_v17  ;;  %v2962_v34 = vsel %vm2323_vm1, %v2711_v10, 0.0  ;;  %v2573_v17 = vsel %vm2323_vm1, %v5104_v13, 0.0 }
 0x2a0   : > { %v2713_v57 = vmul.f32 %v5116_v56, %v5116_v56  ;;  %v2577_v13 = vsel %vm2323_vm1, %v5128_v38, 0.0 }
 0x2a1   : > { %v2943_v60 = vadd.f32 %v2942_v20, %v2941_v63  ;;  %v2554_v3 = vadd.f32 %v2553_v8, %v2552_v49  ;;  %v2964_v63 = vsel %vm2323_vm1, %v2712_v61, 0.0  ;;  %v2714_v49 = vmul.f32 %v5128_v38, %v5128_v38 }
 0x2a2   : > { %v2966_v22 = vsel %vm2323_vm1, %v2713_v57, 0.0 }
 0x2a3   : > { %v2945_v9 = vadd.f32 %v2944_v2, %v2943_v60  ;;  %v2556_v51 = vadd.f32 %v2555_v33, %v2554_v3  ;;  %v2968_v2 = vsel %vm2323_vm1, %v2714_v49, 0.0 }
 0x2a5   : > { %v2947_v35 = vadd.f32 %v2946_v12, %v2945_v9  ;;  %v2558_v27 = vadd.f32 %v2557_v47, %v2556_v51 }
 0x2a7   : > { %v2949_v36 = vadd.f32 %v2948_v21, %v2947_v35  ;;  %v2560_v26 = vadd.f32 %v2559_v31, %v2558_v27 }
 0x2a9   : > { %v2951_v28 = vadd.f32 %v2950_v25, %v2949_v36  ;;  %v2562_v52 = vadd.f32 %v2561_v11, %v2560_v26 }
 0x2ab   : > { %v2953_v37 = vadd.f32 %v2952_v41, %v2951_v28  ;;  %v2564_v6 = vadd.f32 %v2563_v42, %v2562_v52 }
 0x2ad   : > { %v2955_v58 = vadd.f32 %v2954_v0, %v2953_v37  ;;  %v2566_v24 = vadd.f32 %v2565_v59, %v2564_v6 }
 0x2af   : > { %v2957_v4 = vadd.f32 %v2956_v14, %v2955_v58  ;;  %v2568_v43 = vadd.f32 %v2567_v54, %v2566_v24 }
 0x2b1   : > { %v2959_v44 = vadd.f32 %v2958_v29, %v2957_v4  ;;  %v2570_v19 = vadd.f32 %v2569_v55, %v2568_v43 }
 0x2b3   : > { %v2961_v1 = vadd.f32 %v2960_v62, %v2959_v44  ;;  %v2572_v7 = vadd.f32 %v2571_v30, %v2570_v19 }
 0x2b5   : > { %v2963_v46 = vadd.f32 %v2962_v34, %v2961_v1  ;;  %v2574_v32 = vadd.f32 %v2573_v17, %v2572_v7 }
 0x2b7   : > { %v2965_v20 = vadd.f32 %v2964_v63, %v2963_v46  ;;  %v2576_v8 = vadd.f32 %v2575_v48, %v2574_v32 }
 0x2b9   : > { %v2967_v60 = vadd.f32 %v2966_v22, %v2965_v20  ;;  %v2578_v3 = vadd.f32 %v2577_v13, %v2576_v8 }
 0x2bb   : > { %v2579_v33 = vrot.slane %v2578_v3, 4  ;;  %v2969_v56 = vadd.f32 %v2968_v2, %v2967_v60 }
 0x2bd   : > { %v2580_v15 = vadd.f32 %v2579_v33, %v2578_v3  ;;  %v2970_v9 = vrot.slane %v2969_v56, 4 }
 0x2bf   : > { %v2581_v51 = vrot.slane %v2580_v15, 2  ;;  %v2971_v12 = vadd.f32 %v2970_v9, %v2969_v56 }
 0x2c1   : > { %v2582_v47 = vadd.f32 %v2581_v51, %v2580_v15  ;;  %v2972_v18 = vrot.slane %v2971_v12, 2 }
 0x2c3   : > { %v2583_v35 = vrot.slane %v2582_v47, 1  ;;  %v2973_v38 = vadd.f32 %v2972_v18, %v2971_v12 }
 0x2c5   : > { %v2584_v27 = vadd.f32 %v2583_v35, %v2582_v47  ;;  %v2974_v21 = vrot.slane %v2973_v38, 1 }
 0x2c7   : > { %v2975_v31 = vadd.f32 %v2974_v21, %v2973_v38  ;;  %2586 = vst.msk [vmem:[%s226_s29] sm:$0x1] %vm2585_vm2, %v2584_v27 }
 0x2c8   : > { %3879 = shalt.err (!%p3876_p0)
}
 0x2c9   : > { %s3880_s25 = scalar_lea.hbm %s5464_s14, 16  ;;  %s3884_s7 = scalar_lea.hbm %s5542_s3, 32 }
 0x2ca   : > { %p3881_p2 = scmp.ne.s32.totalorder %s5464_s14, %s3880_s25  ;;  %p3885_p3 = scmp.lt.s32.totalorder %s5464_s14, %s5542_s3 }
 0x2cb   : > { %p3886_p6 = scmp.lt.s32.totalorder %s3884_s7, %s3880_s25 }
 0x2cc   : > { %p3882_p9 = pnand %p3881_p2, %p5636_p13 }
 0x2cd   : > { %p3887_p11 = por %p3886_p6, %p3885_p3 }
 0x2ce   : > { %p3883_p1 = pneg %p3882_p9 }
 0x2d0   : > { %p3888_p12 = pnand %p3887_p11, %p3883_p1 }
 0x2d2   : > { %3891 = shalt.err (!%p3888_p12)
}
 0x2d3   : > { %3586 = dma.vmem_to_hbm [thread:$0]  (%p5636_p13), %s5466_s30, 16, %s5464_s14, %s2983_s10   ;;  %2976 = vst.msk [vmem:[%s232_s5] sm:$0x1] %vm2585_vm2, %v2975_v31 }
 0x2d4   : > { %s2987_s20 = scalar_lea.sflag [#allocation7], %s4090_s13  ;;  %s3892_s11 = scalar_lea.vmem %s5474_s6, 16 }
 0x2d5   : > { %p3893_p4 = scmp.ne.s32.totalorder %s5474_s6, %s3892_s11  ;;  %s3967_s12 = smov [#allocation6]  }
 0x2d6   : > { %s3896_s26 = sshll.u32 %s3967_s12, 4  ;;  %s3897_s26 = int_to_ptr.vmem [resolvable:$false] %s3896_s26 }
 0x2d7   : > { %p3894_p5 = pnand %p3893_p4, %p5636_p13  ;;  %s3898_s23 = scalar_lea.vmem %s3897_s26, 32 }
 0x2d8   : > { %p3899_p8 = scmp.lt.s32.totalorder %s5474_s6, %s3897_s26  ;;  %p3900_p10 = scmp.lt.s32.totalorder %s3898_s23, %s3892_s11 }
 0x2d9   : > { %p3895_p7 = pneg %p3894_p5 }
 0x2da   : > { %p3901_p0 = por %p3900_p10, %p3899_p8 }
 0x2dc   : > { %p3902_p2 = pnand %p3901_p0, %p3895_p7 }
 0x2de   : > { %3905 = shalt.err (!%p3902_p2)
}
 0x2df   : > { %s3906_s30 = scalar_lea.hbm %s5472_s8, 16  ;;  %s3910_s14 = scalar_lea.hbm %s5543_s4, 32 }
 0x2e0   : > { %p3907_p9 = scmp.ne.s32.totalorder %s5472_s8, %s3906_s30  ;;  %p3911_p6 = scmp.lt.s32.totalorder %s5472_s8, %s5543_s4 }
 0x2e1   : > { %p3912_p11 = scmp.lt.s32.totalorder %s3910_s14, %s3906_s30 }
 0x2e2   : > { %p3908_p1 = pnand %p3907_p9, %p5636_p13 }
 0x2e3   : > { %p3913_p12 = por %p3912_p11, %p3911_p6 }
 0x2e4   : > { %p3909_p3 = pneg %p3908_p1 }
 0x2e6   : > { %p3914_p4 = pnand %p3913_p12, %p3909_p3 }
 0x2e8   : > { %3917 = shalt.err (!%p3914_p4)
}
 0x2e9   : > { %3587 = dma.vmem_to_hbm [thread:$0]  (%p5636_p13), %s5474_s6, 16, %s5472_s8, %s2987_s20  }
 0x2ea PF: > { %s3036_s22 = sand.u32 1, %s3948_s15   ;;  %p5637_p5 = scmp.ne.s32.totalorder %s5591_s28, 0 }
 0x2eb   : > { %p5638_p7 = scmp.ge.s32.totalorder %s3960_s18, 2  ;;  %s3037_s29 = scalar_lea.sflag [#allocation4], %s3036_s22 }
 0x2ed   : > { %p3595_p8 = pnand %p5638_p7, %p5637_p5 }
 0x2ef   : > { %p3596_p10 = pneg %p3595_p8 }
 0x2f1   : > { %3939 = dma.done.wait (%p3596_p10), %s3037_s29, 16  }
 0x2f2   : > { %3941 = vsyncadd (%p3596_p10), %s3037_s29, 4294967280  ;;  %s3045_s7 = scalar_lea.sflag [#allocation7], %s3036_s22 }
 0x2f3   : > { %3943 = dma.done.wait (%p3596_p10), %s3045_s7, 16  }
 0x2f4   : > { %3945 = vsyncadd (%p3596_p10), %s3045_s7, 4294967280  ;;  %p21_p13 = scmp.ge.s32.totalorder %s4018_s21, 4   ;;  %s5639_s15 = smov %s3952_s16 }
 0x2f5   : > { %s5640_s16 = smov %s3956_s17  ;;  %s5641_s17 = smov %s4030_s24 }
 0x2f6   : > { %s5642_s18 = smov %s4018_s21  ;;  %23 = sbr.rel (!%p21_p13) target bundleno = 7 (0x7), region = 102 }
 0x2fb   :  { %3049 = vsyncpa [#allocation3], 1 }
 0x2fc   :  { %3051 = vsyncpa [#allocation3 + $0x1], 1 }
 0x2fd   :  { %3052 = vsyncpa [#allocation4], 1 }
 0x2fe   :  { %3054 = vsyncpa [#allocation4 + $0x1], 1 }
 0x2ff   :  { %3055 = vsyncpa [#allocation7], 1 }
 0x300   :  { %3057 = vsyncpa [#allocation7 + $0x1], 1 }

</bundles_post_ra>
